<compile_context>
chip_gen: v5e
topology: v5e:2x2
jax: 0.10.0
libtpu: 0.0.40
codegen_flags: <defaults>
</compile_context>

<pallas_src>
import functools

import numpy as np
import jax
import jax.numpy as jnp
from jax import lax
from jax.experimental import pallas as pl
from jax.experimental.pallas import tpu as pltpu


# Network geometry implied by the PyTorch module (fc1 expects 32*9*8).
H_IN, W_IN = 84, 76
H1, W1 = 20, 18                    # conv1 output (k=8, s=4)
H2, W2 = 9, 8                      # conv2 output (k=4, s=2)
C1, C2 = 16, 32
K1, K2 = 8, 4
P1_FEAT = K1 * K1                  # 64   pixels per conv1 patch
P2_ROWS = H2 * W2                  # 72   conv2 output positions
SUPER_FEAT = K2 * K2 * P1_FEAT     # 1024 = 16 conv1 taps x 64 pixels
CONV2_FEAT = K2 * K2 * C1          # 256  conv2 im2col features
FLAT = C2 * H2 * W2                # 2304
FC1_OUT = 256
FC2_PAD = 128                      # lane-dense fc2 output width


def _conv2_row_gather_idx():
    """Row index into the (360, 64) conv1-patch matrix for every
    (conv2 output position, conv2 tap), ordered (oh, ow, kh, kw)."""
    oh = np.arange(H2)[:, None, None, None]
    ow = np.arange(W2)[None, :, None, None]
    kh = np.arange(K2)[None, None, :, None]
    kw = np.arange(K2)[None, None, None, :]
    idx = (2 * oh + kh) * W1 + (2 * ow + kw)           # (9, 8, 4, 4)
    return idx.reshape(-1).astype(np.int32)            # (1152,)


_CONV2_GATHER_IDX = _conv2_row_gather_idx()


# -----------------------------------------------------------------------------
# Kernel A: conv1 + conv2 fused (one grid step per batch element).
#   p_ref : (1, 72, 1024) bf16  "super patches" (16 conv1 taps x 64 pixels)
#   w1_ref: (1024, 256)   bf16  block-diagonal conv1 weight
#   b1_ref: (1, 256)      f32   conv1 bias tiled over the 16 taps
#   w2_ref: (256, 32)     bf16  conv2 weight, rows ordered (kh, kw, in_c)
#   b2_ref: (1, 32)       f32
#   o_ref : (1, 72, 32)   bf16  relu(conv2), rows = (oh, ow), cols = out_c
# -----------------------------------------------------------------------------
def _conv_stage_kernel(p_ref, w1_ref, b1_ref, w2_ref, b2_ref, o_ref):
    p = p_ref[0]                                                  # (72, 1024)
    a1 = jnp.dot(p, w1_ref[...], preferred_element_type=jnp.float32)
    a1 = jnp.maximum(a1 + b1_ref[...], 0.0)                       # relu(conv1), (72, 256)
    a2 = jnp.dot(a1.astype(jnp.bfloat16), w2_ref[...],
                 preferred_element_type=jnp.float32)
    a2 = jnp.maximum(a2 + b2_ref[...], 0.0)                       # relu(conv2), (72, 32)
    o_ref[0] = a2.astype(o_ref.dtype)


# -----------------------------------------------------------------------------
# Kernel B: fc1 + fc2 fused (single grid step, M = batch).
# -----------------------------------------------------------------------------
def _fc_stage_kernel(x_ref, w1_ref, b1_ref, w2_ref, b2_ref, o_ref):
    h = jnp.dot(x_ref[...], w1_ref[...], preferred_element_type=jnp.float32)
    h = jnp.maximum(h + b1_ref[...], 0.0)                         # (B, 256)
    q = jnp.dot(h.astype(jnp.bfloat16), w2_ref[...],
                preferred_element_type=jnp.float32)
    o_ref[...] = (q + b2_ref[...]).astype(o_ref.dtype)            # (B, 128)


def _conv_stage(p2d, prep):
    B = p2d.shape[0]
    flops = 2 * B * (P2_ROWS * SUPER_FEAT * CONV2_FEAT + P2_ROWS * CONV2_FEAT * C2)
    bytes_accessed = (B * P2_ROWS * SUPER_FEAT * 2 + SUPER_FEAT * CONV2_FEAT * 2
                      + CONV2_FEAT * 4 + CONV2_FEAT * C2 * 2 + C2 * 4
                      + B * P2_ROWS * C2 * 2)
    return pl.pallas_call(
        _conv_stage_kernel,
        out_shape=jax.ShapeDtypeStruct((B, P2_ROWS, C2), jnp.bfloat16),
        grid=(B,),
        in_specs=[
            pl.BlockSpec((1, P2_ROWS, SUPER_FEAT), lambda b: (b, 0, 0)),
            pl.BlockSpec((SUPER_FEAT, CONV2_FEAT), lambda b: (0, 0)),
            pl.BlockSpec((1, CONV2_FEAT), lambda b: (0, 0)),
            pl.BlockSpec((CONV2_FEAT, C2), lambda b: (0, 0)),
            pl.BlockSpec((1, C2), lambda b: (0, 0)),
        ],
        out_specs=pl.BlockSpec((1, P2_ROWS, C2), lambda b: (b, 0, 0)),
        compiler_params=pltpu.CompilerParams(dimension_semantics=("parallel",)),
        cost_estimate=pl.CostEstimate(flops=flops, transcendentals=0,
                                      bytes_accessed=bytes_accessed),
    )(p2d, prep["w1_block"], prep["b1_tiled"], prep["w2_mat"], prep["b2"])


def _fc_stage(flat, prep):
    B = flat.shape[0]
    flops = 2 * B * (FLAT * FC1_OUT + FC1_OUT * FC2_PAD)
    bytes_accessed = (B * FLAT * 2 + FLAT * FC1_OUT * 2 + FC1_OUT * 4
                      + FC1_OUT * FC2_PAD * 2 + FC2_PAD * 4 + B * FC2_PAD * 4)
    return pl.pallas_call(
        _fc_stage_kernel,
        out_shape=jax.ShapeDtypeStruct((B, FC2_PAD), jnp.float32),
        grid=(1,),
        in_specs=[
            pl.BlockSpec((B, FLAT), lambda i: (0, 0)),
            pl.BlockSpec((FLAT, FC1_OUT), lambda i: (0, 0)),
            pl.BlockSpec((1, FC1_OUT), lambda i: (0, 0)),
            pl.BlockSpec((FC1_OUT, FC2_PAD), lambda i: (0, 0)),
            pl.BlockSpec((1, FC2_PAD), lambda i: (0, 0)),
        ],
        out_specs=pl.BlockSpec((B, FC2_PAD), lambda i: (0, 0)),
        compiler_params=pltpu.CompilerParams(dimension_semantics=("arbitrary",)),
        cost_estimate=pl.CostEstimate(flops=flops, transcendentals=0,
                                      bytes_accessed=bytes_accessed),
    )(flat, prep["wfc1"], prep["bfc1"], prep["wfc2"], prep["bfc2"])


# -----------------------------------------------------------------------------
# One-time parameter re-layout (outside the per-forward hot path).
# -----------------------------------------------------------------------------
def prepare_params(params):
    f32 = jnp.float32
    # conv1 as a block-diagonal (1024, 256) matrix: one (64 -> 16) block per
    # conv2 tap, so the conv2 im2col needs no in-kernel relayout.
    w1_mat = params["conv1_w"].reshape(C1, P1_FEAT).T.astype(f32)        # (64, 16)
    eye = jnp.eye(K2 * K2, dtype=f32)
    w1_block = jnp.einsum("ab,fc->afbc", eye, w1_mat).reshape(SUPER_FEAT, CONV2_FEAT)
    b1_tiled = jnp.tile(params["conv1_b"].astype(f32), K2 * K2).reshape(1, CONV2_FEAT)

    # conv2 weight rows ordered (kh, kw, in_c) to match the p2 feature order.
    w2_mat = params["conv2_w"].transpose(2, 3, 1, 0).reshape(CONV2_FEAT, C2).astype(f32)
    b2 = params["conv2_b"].reshape(1, C2).astype(f32)

    # fc1 rows permuted once so it consumes the kernel's (oh, ow, c) flatten
    # order directly (removes the runtime NHWC->NCHW transpose).
    m = np.arange(FLAT)
    perm = (m % C2) * (H2 * W2) + (m // C2)        # kernel index -> torch index
    wfc1 = params["fc1_w"][perm, :].astype(f32)                          # (2304, 256)
    bfc1 = params["fc1_b"].reshape(1, FC1_OUT).astype(f32)

    # fc2 zero-padded to 128 output lanes for a lane-dense store.
    n_action = params["fc2_w"].shape[1]
    assert n_action <= FC2_PAD
    wfc2 = jnp.zeros((FC1_OUT, FC2_PAD), f32).at[:, :n_action].set(params["fc2_w"])
    bfc2 = jnp.zeros((1, FC2_PAD), f32).at[0, :n_action].set(params["fc2_b"])

    bf16 = jnp.bfloat16
    return {
        "w1_block": w1_block.astype(bf16), "b1_tiled": b1_tiled,
        "w2_mat": w2_mat.astype(bf16), "b2": b2,
        "wfc1": wfc1.astype(bf16), "bfc1": bfc1,
        "wfc2": wfc2.astype(bf16), "bfc2": bfc2,
    }


# -----------------------------------------------------------------------------
# DQN forward: matches the PyTorch module semantics for x: (B, 1, 84, 76).
# -----------------------------------------------------------------------------
def dqn_forward(prep, x_nchw, *, n_action):
    B = x_nchw.shape[0]
    x = x_nchw.astype(jnp.bfloat16)

    # conv1 im2col in one XLA op: (B, 64, 20, 18), channel order = (dy, dx).
    p1 = lax.conv_general_dilated_patches(x, (K1, K1), (4, 4), "VALID")
    p1 = p1.reshape(B, P1_FEAT, H1 * W1).transpose(0, 2, 1)              # (B, 360, 64)

    # Re-gather conv1 patches per (conv2 position, conv2 tap) so kernel A sees
    # one matmul-ready operand: (B, 72, 16*64).
    p2d = jnp.take(p1, _CONV2_GATHER_IDX, axis=1).reshape(B, P2_ROWS, SUPER_FEAT)

    y2 = _conv_stage(p2d, prep)                   # (B, 72, 32) bf16, rows=(oh,ow)
    flat = y2.reshape(B, FLAT)                    # free row-major view
    q = _fc_stage(flat, prep)                     # (B, 128) f32
    return q[:, :n_action]


# -----------------------------------------------------------------------------
# Deterministic synthetic parameters (shapes match the PyTorch module; fc1_w is
# stored matmul-ready as (2304, 256) == torch fc1.weight.T, rows indexed in the
# PyTorch NCHW flatten order c*72 + oh*8 + ow).
# -----------------------------------------------------------------------------
def init_params(key, n_action):
    ks = jax.random.split(key, 8)
    scale = 0.05
    return {
        "conv1_w": scale * jax.random.normal(ks[0], (C1, 1, K1, K1), jnp.float32),
        "conv1_b": scale * jax.random.normal(ks[1], (C1,), jnp.float32),
        "conv2_w": scale * jax.random.normal(ks[2], (C2, C1, K2, K2), jnp.float32),
        "conv2_b": scale * jax.random.normal(ks[3], (C2,), jnp.float32),
        "fc1_w": scale * jax.random.normal(ks[4], (FLAT, FC1_OUT), jnp.float32),
        "fc1_b": scale * jax.random.normal(ks[5], (FC1_OUT,), jnp.float32),
        "fc2_w": scale * jax.random.normal(ks[6], (FC1_OUT, n_action), jnp.float32),
        "fc2_b": scale * jax.random.normal(ks[7], (n_action,), jnp.float32),
    }


def dqn_reference(params, x):
    """Pure-JAX f32 reference with PyTorch semantics (for validation)."""
    dn = ("NCHW", "OIHW", "NCHW")
    y = lax.conv_general_dilated(x, params["conv1_w"], (4, 4), "VALID",
                                 dimension_numbers=dn)
    y = jnp.maximum(y + params["conv1_b"][None, :, None, None], 0.0)
    y = lax.conv_general_dilated(y, params["conv2_w"], (2, 2), "VALID",
                                 dimension_numbers=dn)
    y = jnp.maximum(y + params["conv2_b"][None, :, None, None], 0.0)
    flat = y.reshape(y.shape[0], -1)
    h = jnp.maximum(flat @ params["fc1_w"] + params["fc1_b"], 0.0)
    return h @ params["fc2_w"] + params["fc2_b"]


if __name__ == "__main__":
    n_action = 4
    batch = 2

    key = jax.random.PRNGKey(0)
    pkey, xkey = jax.random.split(key)
    params = init_params(pkey, n_action)
    prep = prepare_params(params)

    # Input spatial size is fixed by the module (fc1 expects 32*9*8): 84 x 76.
    x = jax.random.normal(xkey, (batch, 1, H_IN, W_IN), jnp.float32)

    fwd = jax.jit(functools.partial(dqn_forward, n_action=n_action))
    q = jax.block_until_ready(fwd(prep, x))
    assert q.shape == (batch, n_action), q.shape

    # Validate against the f32 reference (bf16 MXU path -> loose tolerance).
    q_ref = jax.block_until_ready(dqn_reference(params, x))
    np.testing.assert_allclose(np.asarray(q, np.float32), np.asarray(q_ref),
                               rtol=1e-1, atol=5e-2)
    print("KERNEL_OK")
</pallas_src>

<mosaic_0001>
module attributes {stable_mosaic.version = 11 : i64} {
  func.func @_conv_stage_kernel(%arg0: i32, %arg1: memref<1x72x1024xbf16, #tpu.memory_space<vmem>>, %arg2: memref<1024x256xbf16, #tpu.memory_space<vmem>>, %arg3: memref<1x256xf32, #tpu.memory_space<vmem>>, %arg4: memref<256x32xbf16, #tpu.memory_space<vmem>>, %arg5: memref<1x32xf32, #tpu.memory_space<vmem>>, %arg6: memref<1x72x32xbf16, #tpu.memory_space<vmem>>) attributes {dimension_semantics = [#tpu.dimension_semantics<parallel>], iteration_bounds = array<i64: 2>, scalar_prefetch = 0 : i64, scratch_operands = 0 : i64, tpu.core_type = #tpu.core_type<tc>, window_params = [{transform_indices = @transform_0, window_bounds = array<i64: 1, 72, 1024>}, {pipeline_mode = #tpu.pipeline_mode<synchronous>, transform_indices = @transform_1, window_bounds = array<i64: 1024, 256>}, {pipeline_mode = #tpu.pipeline_mode<synchronous>, transform_indices = @transform_2, window_bounds = array<i64: 1, 256>}, {pipeline_mode = #tpu.pipeline_mode<synchronous>, transform_indices = @transform_3, window_bounds = array<i64: 256, 32>}, {pipeline_mode = #tpu.pipeline_mode<synchronous>, transform_indices = @transform_4, window_bounds = array<i64: 1, 32>}, {transform_indices = @transform_5, window_bounds = array<i64: 1, 72, 32>}]} {
    %c0 = arith.constant 0 : index
    %c0_0 = arith.constant 0 : index
    %c0_1 = arith.constant 0 : index
    %0 = vector.load %arg1[%c0, %c0_0, %c0_1] : memref<1x72x1024xbf16, #tpu.memory_space<vmem>>, vector<1x72x1024xbf16>
    %1 = vector.shape_cast %0 : vector<1x72x1024xbf16> to vector<72x1024xbf16>
    %c0_2 = arith.constant 0 : index
    %c0_3 = arith.constant 0 : index
    %2 = vector.load %arg2[%c0_2, %c0_3] : memref<1024x256xbf16, #tpu.memory_space<vmem>>, vector<1024x256xbf16>
    %cst = arith.constant dense<0.000000e+00> : vector<72x256xf32>
    %3 = tpu.matmul %1, %2, %cst {dimension_numbers = #tpu.dot_dimension_numbers<[1], [0], [0], [1], [0, 0, 1, 1], [], []>} : vector<72x1024xbf16>, vector<1024x256xbf16>, vector<72x256xf32> -> vector<72x256xf32>
    %c0_4 = arith.constant 0 : index
    %c0_5 = arith.constant 0 : index
    %4 = vector.load %arg3[%c0_4, %c0_5] : memref<1x256xf32, #tpu.memory_space<vmem>>, vector<1x256xf32>
    %5 = vector.broadcast %4 : vector<1x256xf32> to vector<72x256xf32>
    %6 = arith.addf %3, %5 : vector<72x256xf32>
    %cst_6 = arith.constant 0.000000e+00 : f32
    %7 = vector.broadcast %cst_6 : f32 to vector<72x256xf32>
    %8 = arith.maximumf %6, %7 : vector<72x256xf32>
    %9 = arith.truncf %8 : vector<72x256xf32> to vector<72x256xbf16>
    %c0_7 = arith.constant 0 : index
    %c0_8 = arith.constant 0 : index
    %10 = vector.load %arg4[%c0_7, %c0_8] : memref<256x32xbf16, #tpu.memory_space<vmem>>, vector<256x32xbf16>
    %cst_9 = arith.constant dense<0.000000e+00> : vector<72x32xf32>
    %11 = tpu.matmul %9, %10, %cst_9 {dimension_numbers = #tpu.dot_dimension_numbers<[1], [0], [0], [1], [0, 0, 1, 1], [], []>} : vector<72x256xbf16>, vector<256x32xbf16>, vector<72x32xf32> -> vector<72x32xf32>
    %c0_10 = arith.constant 0 : index
    %c0_11 = arith.constant 0 : index
    %12 = vector.load %arg5[%c0_10, %c0_11] : memref<1x32xf32, #tpu.memory_space<vmem>>, vector<1x32xf32>
    %13 = vector.broadcast %12 : vector<1x32xf32> to vector<72x32xf32>
    %14 = arith.addf %11, %13 : vector<72x32xf32>
    %cst_12 = arith.constant 0.000000e+00 : f32
    %15 = vector.broadcast %cst_12 : f32 to vector<72x32xf32>
    %16 = arith.maximumf %14, %15 : vector<72x32xf32>
    %17 = arith.truncf %16 : vector<72x32xf32> to vector<72x32xbf16>
    %c0_13 = arith.constant 0 : index
    %c0_14 = arith.constant 0 : index
    %c0_15 = arith.constant 0 : index
    %18 = vector.load %arg6[%c0_13, %c0_14, %c0_15] : memref<1x72x32xbf16, #tpu.memory_space<vmem>>, vector<1x72x32xbf16>
    %19 = vector.shape_cast %18 : vector<1x72x32xbf16> to vector<72x32xbf16>
    %20 = vector.shape_cast %17 : vector<72x32xbf16> to vector<1x72x32xbf16>
    tpu.vector_store %arg6[%c0_13, %c0_14, %c0_15], %20 {strides = array<i32>} : memref<1x72x32xbf16, #tpu.memory_space<vmem>>, vector<1x72x32xbf16>,
    return
  }
  func.func @transform_0(%arg0: i32) -> (i32, i32, i32) {
    %c0_i32 = arith.constant 0 : i32
    %c0_i32_0 = arith.constant 0 : i32
    %c0_i32_1 = arith.constant 0 : i32
    return %arg0, %c0_i32, %c0_i32_0 : i32, i32, i32
  }
  func.func @transform_1(%arg0: i32) -> (i32, i32) {
    %c0_i32 = arith.constant 0 : i32
    %c0_i32_0 = arith.constant 0 : i32
    %c0_i32_1 = arith.constant 0 : i32
    return %c0_i32, %c0_i32_0 : i32, i32
  }
  func.func @transform_2(%arg0: i32) -> (i32, i32) {
    %c0_i32 = arith.constant 0 : i32
    %c0_i32_0 = arith.constant 0 : i32
    %c0_i32_1 = arith.constant 0 : i32
    return %c0_i32, %c0_i32_0 : i32, i32
  }
  func.func @transform_3(%arg0: i32) -> (i32, i32) {
    %c0_i32 = arith.constant 0 : i32
    %c0_i32_0 = arith.constant 0 : i32
    %c0_i32_1 = arith.constant 0 : i32
    return %c0_i32, %c0_i32_0 : i32, i32
  }
  func.func @transform_4(%arg0: i32) -> (i32, i32) {
    %c0_i32 = arith.constant 0 : i32
    %c0_i32_0 = arith.constant 0 : i32
    %c0_i32_1 = arith.constant 0 : i32
    return %c0_i32, %c0_i32_0 : i32, i32
  }
  func.func @transform_5(%arg0: i32) -> (i32, i32, i32) {
    %c0_i32 = arith.constant 0 : i32
    %c0_i32_0 = arith.constant 0 : i32
    %c0_i32_1 = arith.constant 0 : i32
    return %arg0, %c0_i32, %c0_i32_0 : i32, i32, i32
  }
}

module attributes {stable_mosaic.version = 11 : i64} {
  func.func @_fc_stage_kernel(%arg0: i32, %arg1: memref<2x2304xbf16, #tpu.memory_space<vmem>>, %arg2: memref<2304x256xbf16, #tpu.memory_space<vmem>>, %arg3: memref<1x256xf32, #tpu.memory_space<vmem>>, %arg4: memref<256x128xbf16, #tpu.memory_space<vmem>>, %arg5: memref<1x128xf32, #tpu.memory_space<vmem>>, %arg6: memref<2x128xf32, #tpu.memory_space<vmem>>) attributes {dimension_semantics = [#tpu.dimension_semantics<arbitrary>], iteration_bounds = array<i64: 1>, scalar_prefetch = 0 : i64, scratch_operands = 0 : i64, tpu.core_type = #tpu.core_type<tc>, window_params = [{pipeline_mode = #tpu.pipeline_mode<synchronous>, transform_indices = @transform_0, window_bounds = array<i64: 2, 2304>}, {pipeline_mode = #tpu.pipeline_mode<synchronous>, transform_indices = @transform_1, window_bounds = array<i64: 2304, 256>}, {pipeline_mode = #tpu.pipeline_mode<synchronous>, transform_indices = @transform_2, window_bounds = array<i64: 1, 256>}, {pipeline_mode = #tpu.pipeline_mode<synchronous>, transform_indices = @transform_3, window_bounds = array<i64: 256, 128>}, {pipeline_mode = #tpu.pipeline_mode<synchronous>, transform_indices = @transform_4, window_bounds = array<i64: 1, 128>}, {pipeline_mode = #tpu.pipeline_mode<synchronous>, transform_indices = @transform_5, window_bounds = array<i64: 2, 128>}]} {
    %c0 = arith.constant 0 : index
    %c0_0 = arith.constant 0 : index
    %0 = vector.load %arg1[%c0, %c0_0] : memref<2x2304xbf16, #tpu.memory_space<vmem>>, vector<2x2304xbf16>
    %c0_1 = arith.constant 0 : index
    %c0_2 = arith.constant 0 : index
    %1 = vector.load %arg2[%c0_1, %c0_2] : memref<2304x256xbf16, #tpu.memory_space<vmem>>, vector<2304x256xbf16>
    %cst = arith.constant dense<0.000000e+00> : vector<2x256xf32>
    %2 = tpu.matmul %0, %1, %cst {dimension_numbers = #tpu.dot_dimension_numbers<[1], [0], [0], [1], [0, 0, 1, 1], [], []>} : vector<2x2304xbf16>, vector<2304x256xbf16>, vector<2x256xf32> -> vector<2x256xf32>
    %c0_3 = arith.constant 0 : index
    %c0_4 = arith.constant 0 : index
    %3 = vector.load %arg3[%c0_3, %c0_4] : memref<1x256xf32, #tpu.memory_space<vmem>>, vector<1x256xf32>
    %4 = vector.broadcast %3 : vector<1x256xf32> to vector<2x256xf32>
    %5 = arith.addf %2, %4 : vector<2x256xf32>
    %cst_5 = arith.constant 0.000000e+00 : f32
    %6 = vector.broadcast %cst_5 : f32 to vector<2x256xf32>
    %7 = arith.maximumf %5, %6 : vector<2x256xf32>
    %8 = arith.truncf %7 : vector<2x256xf32> to vector<2x256xbf16>
    %c0_6 = arith.constant 0 : index
    %c0_7 = arith.constant 0 : index
    %9 = vector.load %arg4[%c0_6, %c0_7] : memref<256x128xbf16, #tpu.memory_space<vmem>>, vector<256x128xbf16>
    %cst_8 = arith.constant dense<0.000000e+00> : vector<2x128xf32>
    %10 = tpu.matmul %8, %9, %cst_8 {dimension_numbers = #tpu.dot_dimension_numbers<[1], [0], [0], [1], [0, 0, 1, 1], [], []>} : vector<2x256xbf16>, vector<256x128xbf16>, vector<2x128xf32> -> vector<2x128xf32>
    %c0_9 = arith.constant 0 : index
    %c0_10 = arith.constant 0 : index
    %11 = vector.load %arg5[%c0_9, %c0_10] : memref<1x128xf32, #tpu.memory_space<vmem>>, vector<1x128xf32>
    %12 = vector.broadcast %11 : vector<1x128xf32> to vector<2x128xf32>
    %13 = arith.addf %10, %12 : vector<2x128xf32>
    %c0_11 = arith.constant 0 : index
    %c0_12 = arith.constant 0 : index
    %14 = vector.load %arg6[%c0_11, %c0_12] : memref<2x128xf32, #tpu.memory_space<vmem>>, vector<2x128xf32>
    tpu.vector_store %arg6[%c0_11, %c0_12], %13 {strides = array<i32>} : memref<2x128xf32, #tpu.memory_space<vmem>>, vector<2x128xf32>,
    return
  }
  func.func @transform_0(%arg0: i32) -> (i32, i32) {
    %c0_i32 = arith.constant 0 : i32
    %c0_i32_0 = arith.constant 0 : i32
    %c0_i32_1 = arith.constant 0 : i32
    return %c0_i32, %c0_i32_0 : i32, i32
  }
  func.func @transform_1(%arg0: i32) -> (i32, i32) {
    %c0_i32 = arith.constant 0 : i32
    %c0_i32_0 = arith.constant 0 : i32
    %c0_i32_1 = arith.constant 0 : i32
    return %c0_i32, %c0_i32_0 : i32, i32
  }
  func.func @transform_2(%arg0: i32) -> (i32, i32) {
    %c0_i32 = arith.constant 0 : i32
    %c0_i32_0 = arith.constant 0 : i32
    %c0_i32_1 = arith.constant 0 : i32
    return %c0_i32, %c0_i32_0 : i32, i32
  }
  func.func @transform_3(%arg0: i32) -> (i32, i32) {
    %c0_i32 = arith.constant 0 : i32
    %c0_i32_0 = arith.constant 0 : i32
    %c0_i32_1 = arith.constant 0 : i32
    return %c0_i32, %c0_i32_0 : i32, i32
  }
  func.func @transform_4(%arg0: i32) -> (i32, i32) {
    %c0_i32 = arith.constant 0 : i32
    %c0_i32_0 = arith.constant 0 : i32
    %c0_i32_1 = arith.constant 0 : i32
    return %c0_i32, %c0_i32_0 : i32, i32
  }
  func.func @transform_5(%arg0: i32) -> (i32, i32) {
    %c0_i32 = arith.constant 0 : i32
    %c0_i32_0 = arith.constant 0 : i32
    %c0_i32_1 = arith.constant 0 : i32
    return %c0_i32, %c0_i32_0 : i32, i32
  }
}

</mosaic_0001>

<bundles_post_ra>
// kernel: dqn_forward.2
= control target key start
LH: loop header
LB: loop body
LE: loop exit
PB: predicated region body
PF: predicated region fallthrough
CT: control target
= control target key end

     0   :  { %s3014_s18 = smov 0   ;;  %s4313_s0 = inlined_call_operand.vmem [shape: bf16[2,72,1024], index: 0, kind: input, shape index: {}]   ;;  %s4314_s1 = inlined_call_operand.vmem [shape: bf16[1024,256], index: 1, kind: input, shape index: {}]   ;;  %s4315_s2 = inlined_call_operand.vmem [shape: f32[1,256], index: 2, kind: input, shape index: {}]   ;;  %s4316_s3 = inlined_call_operand.vmem [shape: bf16[256,32], index: 3, kind: input, shape index: {}]   ;;  %s4317_s4 = inlined_call_operand.vmem [shape: f32[1,32], index: 4, kind: input, shape index: {}]   ;;  %s4318_s5 = inlined_call_operand.vmem [shape: bf16[2,72,32], index: 5, kind: output, shape index: {}]  }
   0x1 LB: > { %s2060_s19 = sadd.s32 4294967295, %s2982_s18   ;;  %p2064_p0 = scmp.ge.s32.totalorder %s2982_s18, 1  ;;  %s2982_s18 = sphi %s3014_s18, %s15_s18  }
   0x2   : > { %p187_p1 = scmp.lt.s32.totalorder %s2982_s18, 3 }
   0x4   : > { %p188_p2 = pnand %p2064_p0, %p187_p1 }
   0x5   : > { %p215_p3 = scmp.lt.s32.totalorder (!%p188_p2), %s2060_s19, 1 }
   0x6   : > { %191 = sbr.rel (%p188_p2) target bundleno = 680 (0x2a8), region = 40 }
   0xb   : > { %v2253_v0 = vld [vmem:[%s4314_s1 + $0x70] sm:$0xf]  ;;  %v2820_v1 = vld [vmem:[%s4314_s1 + $0x74] sm:$0xf0]  ;;  %v2245_v5 = vld [vmem:[%s4314_s1 + $0x60] sm:$0xf] }
   0xc   : > { %v2317_v2 = vld [vmem:[%s4314_s1 + $0xf0] sm:$0xf]  ;;  %v2254_v3 = vor.u32 %v2820_v1, %v2253_v0  ;;  %v2836_v4 = vld [vmem:[%s4314_s1 + $0xf4] sm:$0xf0]  ;;  %v2818_v6 = vld [vmem:[%s4314_s1 + $0x64] sm:$0xf0] }
   0xd   : > { %v2318_v7 = vor.u32 %v2836_v4, %v2317_v2  ;;  %v2309_v8 = vld [vmem:[%s4314_s1 + $0xe0] sm:$0xf]  ;;  %v2834_v9 = vld [vmem:[%s4314_s1 + $0xe4] sm:$0xf0]  ;;  %v2246_v10 = vor.u32 %v2818_v6, %v2245_v5  ;;  %v2237_v12 = vld [vmem:[%s4314_s1 + $0x50] sm:$0xf] }
   0xe   : > { %2949 = vmatpush.bf16.msra.mxu2 %v2254_v3  ;;  %1223 = vmatpush.bf16.msra.mxu0 %v2254_v3  ;;  %v2310_v11 = vor.u32 %v2834_v9, %v2309_v8  ;;  %v2816_v13 = vld [vmem:[%s4314_s1 + $0x54] sm:$0xf0]  ;;  %v2301_v14 = vld [vmem:[%s4314_s1 + $0xd0] sm:$0xf]  ;;  %v2229_v18 = vld [vmem:[%s4314_s1 + $0x40] sm:$0xf] }
   0xf   : > { %2957 = vmatpush.bf16.msra.mxu3 %v2318_v7  ;;  %1256 = vmatpush.bf16.msra.mxu1 %v2318_v7  ;;  %v2832_v15 = vld [vmem:[%s4314_s1 + $0xd4] sm:$0xf0]  ;;  %v2238_v16 = vor.u32 %v2816_v13, %v2237_v12  ;;  %v2814_v19 = vld [vmem:[%s4314_s1 + $0x44] sm:$0xf0]  ;;  %v2293_v20 = vld [vmem:[%s4314_s1 + $0xc0] sm:$0xf] }
  0x10   : > { %v2302_v17 = vor.u32 %v2832_v15, %v2301_v14  ;;  %v2830_v21 = vld [vmem:[%s4314_s1 + $0xc4] sm:$0xf0]  ;;  %v2230_v22 = vor.u32 %v2814_v19, %v2229_v18  ;;  %v2221_v24 = vld [vmem:[%s4314_s1 + $0x30] sm:$0xf]  ;;  %v2812_v25 = vld [vmem:[%s4314_s1 + $0x34] sm:$0xf0] }
  0x11   : > { %v2294_v23 = vor.u32 %v2830_v21, %v2293_v20  ;;  %v2285_v26 = vld [vmem:[%s4314_s1 + $0xb0] sm:$0xf]  ;;  %v2828_v27 = vld [vmem:[%s4314_s1 + $0xb4] sm:$0xf0]  ;;  %v2222_v28 = vor.u32 %v2812_v25, %v2221_v24  ;;  %s4320_s19 = smov (!%p215_p3, %s2060_s19), 1  ;;  %vm1995_vm0 = vcmask 257024  }
  0x12   : > { %2950 = vmatpush.bf16.msra.mxu2 %v2246_v10  ;;  %1224 = vmatpush.bf16.msra.mxu0 %v2246_v10  ;;  %v2286_v29 = vor.u32 %v2828_v27, %v2285_v26  ;;  %v2213_v30 = vld [vmem:[%s4314_s1 + $0x20] sm:$0xf]  ;;  %v2810_v31 = vld [vmem:[%s4314_s1 + $0x24] sm:$0xf0]  ;;  %s2965_s22 = smul.u32 288, %s4320_s19 }
  0x13   : > { %2958 = vmatpush.bf16.msra.mxu3 %v2310_v11  ;;  %1257 = vmatpush.bf16.msra.mxu1 %v2310_v11  ;;  %v2277_v32 = vld [vmem:[%s4314_s1 + $0xa0] sm:$0xf]  ;;  %v2826_v33 = vld [vmem:[%s4314_s1 + $0xa4] sm:$0xf0]  ;;  %v2214_v34 = vor.u32 %v2810_v31, %v2213_v30  ;;  %v2205_v36 = vld [vmem:[%s4314_s1 + $0x10] sm:$0xf] }
  0x14   : > { %v2278_v35 = vor.u32 %v2826_v33, %v2277_v32  ;;  %v2808_v37 = vld [vmem:[%s4314_s1 + $0x14] sm:$0xf0]  ;;  %v2269_v38 = vld [vmem:[%s4314_s1 + $0x90] sm:$0xf]  ;;  %v2197_v41 = vld [vmem:[%s4314_s1] sm:$0xf]  ;;  %s3122_s12 = scalar_lea.vmem %s4313_s0, %s2965_s22 }
  0x15   : > { %v2824_v39 = vld [vmem:[%s4314_s1 + $0x94] sm:$0xf0]  ;;  %v2206_v40 = vor.u32 %v2808_v37, %v2205_v36  ;;  %v2806_v42 = vld [vmem:[%s4314_s1 + $0x4] sm:$0xf0]  ;;  %v2261_v44 = vld [vmem:[%s4314_s1 + $0x80] sm:$0xf] }
  0x16   : > { %2951 = vmatpush.bf16.msra.mxu2 %v2238_v16  ;;  %1225 = vmatpush.bf16.msra.mxu0 %v2238_v16  ;;  %v2270_v43 = vor.u32 %v2824_v39, %v2269_v38  ;;  %v2822_v45 = vld [vmem:[%s4314_s1 + $0x84] sm:$0xf0]  ;;  %v2381_v46 = vld [vmem:[%s4314_s1 + $0x170] sm:$0xf]  ;;  %v2852_v47 = vld [vmem:[%s4314_s1 + $0x174] sm:$0xf0]  ;;  %v2198_v53 = vor.u32 %v2806_v42, %v2197_v41 }
  0x17   : > { %2959 = vmatpush.bf16.msra.mxu3 %v2302_v17  ;;  %1258 = vmatpush.bf16.msra.mxu1 %v2302_v17  ;;  %v2445_v48 = vld [vmem:[%s4314_s1 + $0x1f0] sm:$0xf]  ;;  %v2868_v49 = vld [vmem:[%s4314_s1 + $0x1f4] sm:$0xf0]  ;;  %v2133_v50 = vld [vmem:[%s3122_s12 + $0x80] sm:$0xf]  ;;  %v2262_v59 = vor.u32 %v2822_v45, %v2261_v44  ;;  %v2382_v62 = vor.u32 %v2852_v47, %v2381_v46 }
  0x18   : > { %v2509_v51 = vld [vmem:[%s4314_s1 + $0x270] sm:$0xf]  ;;  %v2884_v52 = vld [vmem:[%s4314_s1 + $0x274] sm:$0xf0]  ;;  %v2793_v54 = vld [vmem:[%s3122_s12 + $0x9c] sm:$0xf0]  ;;  %v2446_v0 = vor.u32 %v2868_v49, %v2445_v48 }
  0x19   : > { %v2069_v55 = vld [vmem:[%s3122_s12] sm:$0xf]  ;;  %v2850_v58 = vld [vmem:[%s4314_s1 + $0x164] sm:$0xf0]  ;;  %v2789_v60 = vld [vmem:[%s3122_s12 + $0x84] sm:$0xf]  ;;  %v2510_v1 = vor.u32 %v2884_v52, %v2509_v51  ;;  %v3169_v4 = vor.u32 %v2793_v54, %v2133_v50 }
  0x1a   : > { %2952 = vmatpush.bf16.msra.mxu2 %v2230_v22  ;;  %1226 = vmatpush.bf16.msra.mxu0 %v2230_v22  ;;  %v2777_v56 = vld [vmem:[%s3122_s12 + $0x1c] sm:$0xf0]  ;;  %v2135_v61 = vld [vmem:[%s3122_s12 + $0xa0] sm:$0xf0]  ;;  %v2573_v2 = vld [vmem:[%s4314_s1 + $0x2f0] sm:$0xf] }
  0x1b   : > { %2960 = vmatpush.bf16.msra.mxu3 %v2294_v23  ;;  %1259 = vmatpush.bf16.msra.mxu1 %v2294_v23  ;;  %v2373_v57 = vld [vmem:[%s4314_s1 + $0x160] sm:$0xf]  ;;  %v2900_v3 = vld [vmem:[%s4314_s1 + $0x2f4] sm:$0xf0]  ;;  %v3171_v5 = vor.u32 %v2777_v56, %v2069_v55  ;;  %v2866_v6 = vld [vmem:[%s4314_s1 + $0x1e4] sm:$0xf0]  ;;  %v3182_v9 = vor.u32 %v2789_v60, %v2135_v61 }
  0x1c   : > { %v2437_v63 = vld [vmem:[%s4314_s1 + $0x1e0] sm:$0xf]  ;;  %v2882_v8 = vld [vmem:[%s4314_s1 + $0x264] sm:$0xf0]  ;;  %v2773_v10 = vld [vmem:[%s3122_s12 + $0x4] sm:$0xf]  ;;  %v2374_v12 = vor.u32 %v2850_v58, %v2373_v57  ;;  %v2574_v15 = vor.u32 %v2900_v3, %v2573_v2 }
  0x1d   : > { %v2501_v7 = vld [vmem:[%s4314_s1 + $0x260] sm:$0xf]  ;;  %v2071_v11 = vld [vmem:[%s3122_s12 + $0x20] sm:$0xf0]  ;;  %v2365_v13 = vld [vmem:[%s4314_s1 + $0x150] sm:$0xf]  ;;  %v2438_v16 = vor.u32 %v2866_v6, %v2437_v63 }
  0x1e   : > { %2953 = vmatpush.bf16.msra.mxu2 %v2222_v28  ;;  %1227 = vmatpush.bf16.msra.mxu0 %v2222_v28  ;;  %v2848_v14 = vld [vmem:[%s4314_s1 + $0x154] sm:$0xf0]  ;;  %v2502_v17 = vor.u32 %v2882_v8, %v2501_v7  ;;  %v2493_v18 = vld [vmem:[%s4314_s1 + $0x250] sm:$0xf]  ;;  %v2565_v20 = vld [vmem:[%s4314_s1 + $0x2e0] sm:$0xf]  ;;  %v3209_v23 = vor.u32 %v2773_v10, %v2071_v11 }
  0x1f   : > { %2961 = vmatpush.bf16.msra.mxu3 %v2286_v29  ;;  %1260 = vmatpush.bf16.msra.mxu1 %v2286_v29  ;;  %v2880_v19 = vld [vmem:[%s4314_s1 + $0x254] sm:$0xf0]  ;;  %v2429_v21 = vld [vmem:[%s4314_s1 + $0x1d0] sm:$0xf]  ;;  %v2898_v24 = vld [vmem:[%s4314_s1 + $0x2e4] sm:$0xf0]  ;;  %v2366_v25 = vor.u32 %v2848_v14, %v2365_v13 }
  0x20   : > { %v2864_v22 = vld [vmem:[%s4314_s1 + $0x1d4] sm:$0xf0]  ;;  %v2485_v26 = vld [vmem:[%s4314_s1 + $0x240] sm:$0xf]  ;;  %v2566_v28 = vor.u32 %v2898_v24, %v2565_v20  ;;  %v2494_v29 = vor.u32 %v2880_v19, %v2493_v18  ;;  %v2846_v31 = vld [vmem:[%s4314_s1 + $0x144] sm:$0xf0] }
  0x21   : > { %v2357_v27 = vld [vmem:[%s4314_s1 + $0x140] sm:$0xf]  ;;  %v2430_v30 = vor.u32 %v2864_v22, %v2429_v21  ;;  %v2557_v32 = vld [vmem:[%s4314_s1 + $0x2d0] sm:$0xf]  ;;  %v2896_v33 = vld [vmem:[%s4314_s1 + $0x2d4] sm:$0xf0] }
  0x22   : > { %2954 = vmatpush.bf16.msra.mxu2 %v2214_v34  ;;  %1228 = vmatpush.bf16.msra.mxu0 %v2214_v34  ;;  %v2878_v34 = vld [vmem:[%s4314_s1 + $0x244] sm:$0xf0]  ;;  %v2358_v37 = vor.u32 %v2846_v31, %v2357_v27  ;;  %v2477_v38 = vld [vmem:[%s4314_s1 + $0x230] sm:$0xf]  ;;  %v2165_v41 = vld [vmem:[%s3122_s12 + $0xc0] sm:$0xf] }
  0x23   : > { %2962 = vmatpush.bf16.msra.mxu3 %v2278_v35  ;;  %1261 = vmatpush.bf16.msra.mxu1 %v2278_v35  ;;  %v2421_v35 = vld [vmem:[%s4314_s1 + $0x1c0] sm:$0xf]  ;;  %v2862_v36 = vld [vmem:[%s4314_s1 + $0x1c4] sm:$0xf0]  ;;  %v2349_v39 = vld [vmem:[%s4314_s1 + $0x130] sm:$0xf] }
  0x24   : > { %v2801_v42 = vld [vmem:[%s3122_s12 + $0xdc] sm:$0xf0]  ;;  %v2422_v44 = vor.u32 %v2862_v36, %v2421_v35  ;;  %v2844_v45 = vld [vmem:[%s4314_s1 + $0x134] sm:$0xf0]  ;;  %v2894_v47 = vld [vmem:[%s4314_s1 + $0x2c4] sm:$0xf0] }
  0x25   : > { %v2549_v46 = vld [vmem:[%s4314_s1 + $0x2c0] sm:$0xf]  ;;  %v2876_v48 = vld [vmem:[%s4314_s1 + $0x234] sm:$0xf0]  ;;  %v2413_v49 = vld [vmem:[%s4314_s1 + $0x1b0] sm:$0xf]  ;;  %v2350_v55 = vor.u32 %v2844_v45, %v2349_v39 }
  0x26   : > { %2955 = vmatpush.bf16.msra.mxu2 %v2206_v40  ;;  %1229 = vmatpush.bf16.msra.mxu0 %v2206_v40  ;;  %v2558_v40 = vor.u32 %v2896_v33, %v2557_v32  ;;  %v2860_v50 = vld [vmem:[%s4314_s1 + $0x1b4] sm:$0xf0]  ;;  %v2797_v51 = vld [vmem:[%s3122_s12 + $0xc4] sm:$0xf]  ;;  %v2101_v52 = vld [vmem:[%s3122_s12 + $0x40] sm:$0xf]  ;;  %v2550_v58 = vor.u32 %v2894_v47, %v2549_v46 }
  0x27   : > { %2963 = vmatpush.bf16.msra.mxu3 %v2270_v43  ;;  %1262 = vmatpush.bf16.msra.mxu1 %v2270_v43  ;;  %v2486_v43 = vor.u32 %v2878_v34, %v2485_v26  ;;  %v2167_v54 = vld [vmem:[%s3122_s12 + $0xe0] sm:$0xf0]  ;;  %v2469_v56 = vld [vmem:[%s4314_s1 + $0x220] sm:$0xf]  ;;  %v2414_v60 = vor.u32 %v2860_v50, %v2413_v49  ;;  %v2842_v61 = vld [vmem:[%s4314_s1 + $0x124] sm:$0xf0] }
  0x28   : > { %v2341_v57 = vld [vmem:[%s4314_s1 + $0x120] sm:$0xf]  ;;  %v2892_v63 = vld [vmem:[%s4314_s1 + $0x2b4] sm:$0xf0]  ;;  %v2874_v2 = vld [vmem:[%s4314_s1 + $0x224] sm:$0xf0]  ;;  %v3298_v7 = vor.u32 %v2797_v51, %v2167_v54 }
  0x29   : > { %v2405_v3 = vld [vmem:[%s4314_s1 + $0x1a0] sm:$0xf]  ;;  %v2858_v6 = vld [vmem:[%s4314_s1 + $0x1a4] sm:$0xf0]  ;;  %v2781_v8 = vld [vmem:[%s3122_s12 + $0x44] sm:$0xf] }
  0x2a   : > { %2956 = vmatpush.bf16.msra.mxu2 %v2198_v53  ;;  %1230 = vmatpush.bf16.msra.mxu0 %v2198_v53  ;;  %v2785_v53 = vld [vmem:[%s3122_s12 + $0x5c] sm:$0xf0]  ;;  %v2103_v10 = vld [vmem:[%s3122_s12 + $0x60] sm:$0xf0]  ;;  %v2461_v11 = vld [vmem:[%s4314_s1 + $0x210] sm:$0xf] }
  0x2b   : > { %2964 = vmatpush.bf16.msra.mxu3 %v2262_v59  ;;  %1263 = vmatpush.bf16.msra.mxu1 %v2262_v59  ;;  %v2478_v59 = vor.u32 %v2876_v48, %v2477_v38  ;;  %v2333_v13 = vld [vmem:[%s4314_s1 + $0x110] sm:$0xf]  ;;  %v2533_v18 = vld [vmem:[%s4314_s1 + $0x2a0] sm:$0xf]  ;;  %v2890_v19 = vld [vmem:[%s4314_s1 + $0x2a4] sm:$0xf0]  ;;  %v3328_v24 = vor.u32 %v2781_v8, %v2103_v10 }
  0x2c   : > { %v2872_v20 = vld [vmem:[%s4314_s1 + $0x214] sm:$0xf0]  ;;  %v2397_v21 = vld [vmem:[%s4314_s1 + $0x190] sm:$0xf]  ;;  %v2870_v26 = vld [vmem:[%s4314_s1 + $0x204] sm:$0xf0] }
  0x2d   : > { %1241 = vmatmul.bf16.vlgmr.msra.gmra.mxu2 %v3169_v4  ;;  %1231 = vmatmul.bf16.vlgmr.msra.gmra.mxu0 %v3171_v5  ;;  %v2856_v22 = vld [vmem:[%s4314_s1 + $0x194] sm:$0xf0]  ;;  %v257_v31 = vld [vmem:[%s3122_s12 + $0x100] sm:$0xff]  ;;  %v2838_v33 = vld [vmem:[%s4314_s1 + $0x104] sm:$0xf0]  ;;  %s2966_s13 = smul.u32 36, %s4320_s19 }
  0x2e   : > { %1289 = vmatpush.bf16.msrb.mxu2 %v2382_v62  ;;  %1355 = vmatpush.bf16.msrb.mxu0 %v2510_v1  ;;  %v2541_v62 = vld [vmem:[%s4314_s1 + $0x2b0] sm:$0xf]  ;;  %v3287_v1 = vor.u32 %v2785_v53, %v2101_v52  ;;  %v2398_v32 = vor.u32 %v2856_v22, %v2397_v21  ;;  %v2888_v35 = vld [vmem:[%s4314_s1 + $0x294] sm:$0xf0]  ;;  %v2389_v36 = vld [vmem:[%s4314_s1 + $0x180] sm:$0xf]  ;;  %v495_v48 = vunpack.c.l.b16 %v257_v31  ;;  %v496_v51 = vunpack.c.h.b16 %v257_v31 }
  0x2f   : > { %1322 = vmatpush.bf16.msrb.mxu3 %v2446_v0  ;;  %1388 = vmatpush.bf16.msrb.mxu1 %v2574_v15  ;;  %v3285_v0 = vor.u32 %v2801_v42, %v2165_v41  ;;  %v2542_v14 = vor.u32 %v2892_v63, %v2541_v62  ;;  %v2470_v15 = vor.u32 %v2874_v2, %v2469_v56  ;;  %v2525_v34 = vld [vmem:[%s4314_s1 + $0x290] sm:$0xf]  ;;  %v2916_v39 = vld [vmem:[%s4314_s1 + $0x374] sm:$0xf0]  ;;  %v2517_v46 = vld [vmem:[%s4314_s1 + $0x280] sm:$0xf]  ;;  %s4275_s15 = scalar_lea.vmem %s4318_s5, %s2966_s13 }
  0x30   : > { %1274 = vmatmul.bf16.vlgmr.msra.gmra.mxu3 %v3182_v9  ;;  %1264 = vmatmul.bf16.vlgmr.msra.gmra.mxu1 %v3209_v23  ;;  %v2637_v38 = vld [vmem:[%s4314_s1 + $0x370] sm:$0xf]  ;;  %v2932_v41 = vld [vmem:[%s4314_s1 + $0x3f4] sm:$0xf0]  ;;  %v2886_v47 = vld [vmem:[%s4314_s1 + $0x284] sm:$0xf0] }
  0x31   : > { %v2638_v49 = vor.u32 %v2916_v39, %v2637_v38  ;;  %v2085_v52 = vld [vmem:[%s3122_s12 + $0x10] sm:$0xf]  ;;  %v2518_v54 = vor.u32 %v2886_v47, %v2517_v46  ;;  %v2914_v56 = vld [vmem:[%s4314_s1 + $0x364] sm:$0xf0]  ;;  %v2775_v63 = vld [vmem:[%s3122_s12 + $0x14] sm:$0xf] }
  0x32   : > { %1290 = vmatpush.bf16.msrb.mxu2 %v2374_v12  ;;  %1356 = vmatpush.bf16.msrb.mxu0 %v2502_v17  ;;  %v2342_v12 = vor.u32 %v2842_v61, %v2341_v57  ;;  %v2840_v17 = vld [vmem:[%s4314_s1 + $0x114] sm:$0xf0]  ;;  %v2779_v53 = vld [vmem:[%s3122_s12 + $0x2c] sm:$0xf0]  ;;  %v2693_v57 = vld [vmem:[%s4314_s1 + $0x3e0] sm:$0xf]  ;;  %v3393_v61 = vpack.c.b16 %v496_v51, %v496_v51 }
  0x33   : > { %1323 = vmatpush.bf16.msrb.mxu3 %v2438_v16  ;;  %1389 = vmatpush.bf16.msrb.mxu1 %v2566_v28  ;;  %v2406_v16 = vor.u32 %v2858_v6, %v2405_v3  ;;  %v2334_v27 = vor.u32 %v2840_v17, %v2333_v13  ;;  %v2325_v28 = vld [vmem:[%s4314_s1 + $0x100] sm:$0xf]  ;;  %v2087_v2 = vld [vmem:[%s3122_s12 + $0x30] sm:$0xf0]  ;;  %v2621_v8 = vld [vmem:[%s4314_s1 + $0x350] sm:$0xf] }
  0x34   : > { %v2326_v42 = vor.u32 %v2838_v33, %v2325_v28  ;;  %v3399_v6 = vor.u32 %v2775_v63, %v2087_v2  ;;  %v2912_v10 = vld [vmem:[%s4314_s1 + $0x354] sm:$0xf0]  ;;  %v2787_v21 = vld [vmem:[%s3122_s12 + $0x6c] sm:$0xf0]  ;;  %v2774_v22 = vld [vmem:[%s3122_s12 + $0xc] sm:$0xf] }
  0x35   : > { %v2622_v13 = vor.u32 %v2912_v10, %v2621_v8  ;;  %v2926_v33 = vld [vmem:[%s4314_s1 + $0x3c4] sm:$0xf0]  ;;  %v2605_v38 = vld [vmem:[%s4314_s1 + $0x330] sm:$0xf]  ;;  %v2908_v39 = vld [vmem:[%s4314_s1 + $0x334] sm:$0xf0] }
  0x36   : > { %1291 = vmatpush.bf16.msrb.mxu2 %v2366_v25  ;;  %1357 = vmatpush.bf16.msrb.mxu0 %v2494_v29  ;;  %v2453_v25 = vld [vmem:[%s4314_s1 + $0x200] sm:$0xf]  ;;  %v2534_v29 = vor.u32 %v2890_v19, %v2533_v18  ;;  %v2077_v18 = vld [vmem:[%s3122_s12 + $0x8] sm:$0xf]  ;;  %v2815_v47 = vld [vmem:[%s4314_s1 + $0x54] sm:$0xf] }
  0x37   : > { %1324 = vmatpush.bf16.msrb.mxu3 %v2430_v30  ;;  %1390 = vmatpush.bf16.msrb.mxu1 %v2558_v40  ;;  %v2462_v30 = vor.u32 %v2872_v20, %v2461_v11  ;;  %v2701_v40 = vld [vmem:[%s4314_s1 + $0x3f0] sm:$0xf]  ;;  %v2778_v19 = vld [vmem:[%s3122_s12 + $0x24] sm:$0xf0]  ;;  %v2151_v63 = vld [vmem:[%s3122_s12 + $0xb0] sm:$0xf0] }
  0x38   : > { %v2702_v50 = vor.u32 %v2932_v41, %v2701_v40  ;;  %v2685_v11 = vld [vmem:[%s4314_s1 + $0x3d0] sm:$0xf]  ;;  %v2817_v40 = vld [vmem:[%s4314_s1 + $0x64] sm:$0xf]  ;;  %v2606_v41 = vor.u32 %v2908_v39, %v2605_v38 }
  0x39   : > { %v2117_v20 = vld [vmem:[%s3122_s12 + $0x50] sm:$0xf]  ;;  %v2813_v2 = vld [vmem:[%s4314_s1 + $0x44] sm:$0xf] }
  0x3a   : > { %1292 = vmatpush.bf16.msrb.mxu2 %v2358_v37  ;;  %1358 = vmatpush.bf16.msrb.mxu0 %v2486_v43  ;;  %v2854_v37 = vld [vmem:[%s4314_s1 + $0x184] sm:$0xf0]  ;;  %v2526_v43 = vor.u32 %v2888_v35, %v2525_v34  ;;  %v2819_v35 = vld [vmem:[%s4314_s1 + $0x74] sm:$0xf]  ;;  %v2149_v51 = vld [vmem:[%s3122_s12 + $0x90] sm:$0xf] }
  0x3b   : > { %1325 = vmatpush.bf16.msrb.mxu3 %v2422_v44  ;;  %1391 = vmatpush.bf16.msrb.mxu1 %v2550_v58  ;;  %v2454_v44 = vor.u32 %v2870_v26, %v2453_v25  ;;  %v2390_v45 = vor.u32 %v2854_v37, %v2389_v36  ;;  %v2930_v58 = vld [vmem:[%s4314_s1 + $0x3e4] sm:$0xf0]  ;;  %v2079_v25 = vld [vmem:[%s3122_s12 + $0x28] sm:$0xf0]  ;;  %v3427_v26 = vor.u32 %v2778_v19, %v2077_v18  ;;  %v2255_v36 = vld [vmem:[%s4314_s1 + $0x78] sm:$0xf0] }
  0x3c   : > { %v2694_v3 = vor.u32 %v2930_v58, %v2693_v57  ;;  %v3431_v28 = vor.u32 %v2774_v22, %v2079_v25  ;;  %v2258_v37 = vor.u32 %v2819_v35, %v2255_v36  ;;  %v2589_v22 = vld [vmem:[%s4314_s1 + $0x310] sm:$0xf]  ;;  %v2904_v25 = vld [vmem:[%s4314_s1 + $0x314] sm:$0xf0]  ;;  %v2807_v36 = vld [vmem:[%s4314_s1 + $0x14] sm:$0xf] }
  0x3d   : > { %1246 = vmatmul.bf16.gmra.mxu2 %v3285_v0  ;;  %1236 = vmatmul.bf16.gmra.mxu0 %v3287_v1  ;;  %v2920_v35 = vld [vmem:[%s4314_s1 + $0x394] sm:$0xf0] }
  0x3e   : > { %1293 = vmatpush.bf16.msrb.mxu2 %v2350_v55  ;;  %1359 = vmatpush.bf16.msrb.mxu0 %v2478_v59  ;;  %v2629_v55 = vld [vmem:[%s4314_s1 + $0x360] sm:$0xf]  ;;  %v3389_v59 = vpack.c.b16 %v495_v48, %v495_v48  ;;  %v2239_v48 = vld [vmem:[%s4314_s1 + $0x58] sm:$0xf0] }
  0x3f   : > { %1326 = vmatpush.bf16.msrb.mxu3 %v2414_v60  ;;  %1392 = vmatpush.bf16.msrb.mxu1 %v2542_v14  ;;  %v3391_v60 = vor.u32 %v2779_v53, %v2085_v52  ;;  %v2630_v62 = vor.u32 %v2914_v56, %v2629_v55  ;;  %v2795_v52 = vld [vmem:[%s3122_s12 + $0xac] sm:$0xf0]  ;;  %v2242_v53 = vor.u32 %v2815_v47, %v2239_v48  ;;  %v2111_v55 = vld [vmem:[%s3122_s12 + $0x68] sm:$0xf0] }
  0x40   : > { %1279 = vmatmul.bf16.gmra.mxu3 %v3298_v7  ;;  %1269 = vmatmul.bf16.gmra.mxu1 %v3328_v24  ;;  %v3485_v57 = vor.u32 %v2795_v52, %v2149_v51  ;;  %v2183_v51 = vld [vmem:[%s3122_s12 + $0xf0] sm:$0xf0]  ;;  %v2805_v52 = vld [vmem:[%s4314_s1 + $0x4] sm:$0xf] }
  0x42   : > { %1294 = vmatpush.bf16.msrb.mxu2 %v2342_v12  ;;  %1360 = vmatpush.bf16.msrb.mxu0 %v2470_v15  ;;  %v2928_v12 = vld [vmem:[%s4314_s1 + $0x3d4] sm:$0xf0]  ;;  %v2613_v15 = vld [vmem:[%s4314_s1 + $0x340] sm:$0xf] }
  0x43   : > { %1327 = vmatpush.bf16.msrb.mxu3 %v2406_v16  ;;  %1393 = vmatpush.bf16.msrb.mxu1 %v2534_v29  ;;  %v2686_v14 = vor.u32 %v2928_v12, %v2685_v11  ;;  %v2910_v16 = vld [vmem:[%s4314_s1 + $0x344] sm:$0xf0]  ;;  %v2783_v29 = vld [vmem:[%s3122_s12 + $0x54] sm:$0xf]  ;;  %v2597_v11 = vld [vmem:[%s4314_s1 + $0x320] sm:$0xf] }
  0x44   : > { %v2614_v17 = vor.u32 %v2910_v16, %v2613_v15  ;;  %v2906_v12 = vld [vmem:[%s4314_s1 + $0x324] sm:$0xf0]  ;;  %v2811_v16 = vld [vmem:[%s4314_s1 + $0x34] sm:$0xf] }
  0x45   : > { %v2922_v15 = vld [vmem:[%s4314_s1 + $0x3a4] sm:$0xf0] }
  0x46   : > { %1295 = vmatpush.bf16.msrb.mxu2 %v2334_v27  ;;  %1361 = vmatpush.bf16.msrb.mxu0 %v2462_v30  ;;  %v3429_v27 = vor.u32 %v2787_v21, %v2117_v20  ;;  %v2119_v30 = vld [vmem:[%s3122_s12 + $0x70] sm:$0xf0]  ;;  %v2809_v20 = vld [vmem:[%s4314_s1 + $0x24] sm:$0xf]  ;;  %v2215_v21 = vld [vmem:[%s4314_s1 + $0x28] sm:$0xf0] }
  0x47   : > { %1328 = vmatpush.bf16.msrb.mxu3 %v2398_v32  ;;  %1394 = vmatpush.bf16.msrb.mxu1 %v2526_v43  ;;  %v3437_v31 = vor.u32 %v2783_v29, %v2119_v30  ;;  %v2677_v32 = vld [vmem:[%s4314_s1 + $0x3c0] sm:$0xf]  ;;  %v2669_v43 = vld [vmem:[%s4314_s1 + $0x3b0] sm:$0xf]  ;;  %v2590_v29 = vor.u32 %v2904_v25, %v2589_v22  ;;  %v2835_v30 = vld [vmem:[%s4314_s1 + $0xf4] sm:$0xf] }
  0x48   : > { %v2678_v34 = vor.u32 %v2926_v33, %v2677_v32  ;;  %v2218_v32 = vor.u32 %v2809_v20, %v2215_v21  ;;  %v2319_v33 = vld [vmem:[%s4314_s1 + $0xf8] sm:$0xf0]  ;;  %v259_v20 = vld [vmem:[%s3122_s12 + $0x110] sm:$0xff] }
  0x49   : > { %v2322_v38 = vor.u32 %v2835_v30, %v2319_v33  ;;  %v499_v22 = vunpack.c.l.b16 %v259_v20  ;;  %v2827_v25 = vld [vmem:[%s4314_s1 + $0xb4] sm:$0xf]  ;;  %v2173_v30 = vld [vmem:[%s3122_s12 + $0xc8] sm:$0xf]  ;;  %v2798_v33 = vld [vmem:[%s3122_s12 + $0xcc] sm:$0xf] }
  0x4a   : > { %1296 = vmatpush.bf16.msrb.mxu2 %v2326_v42  ;;  %1362 = vmatpush.bf16.msrb.mxu0 %v2454_v44  ;;  %v2247_v42 = vld [vmem:[%s4314_s1 + $0x68] sm:$0xf0]  ;;  %v2924_v44 = vld [vmem:[%s4314_s1 + $0x3b4] sm:$0xf0] }
  0x4b   : > { %1329 = vmatpush.bf16.msrb.mxu3 %v2390_v45  ;;  %1395 = vmatpush.bf16.msrb.mxu1 %v2518_v54  ;;  %v2250_v45 = vor.u32 %v2817_v40, %v2247_v42  ;;  %v2670_v46 = vor.u32 %v2924_v44, %v2669_v43  ;;  %v2782_v54 = vld [vmem:[%s3122_s12 + $0x4c] sm:$0xf]  ;;  %v2141_v40 = vld [vmem:[%s3122_s12 + $0x88] sm:$0xf]  ;;  %v2181_v42 = vld [vmem:[%s3122_s12 + $0xd0] sm:$0xf] }
  0x4c   : > { %v3487_v58 = vor.u32 %v2782_v54, %v2111_v55  ;;  %v2803_v43 = vld [vmem:[%s3122_s12 + $0xec] sm:$0xf0]  ;;  %v2790_v44 = vld [vmem:[%s3122_s12 + $0x8c] sm:$0xf]  ;;  %v2833_v54 = vld [vmem:[%s4314_s1 + $0xe4] sm:$0xf] }
  0x4d   : > { %1251 = vmatmul.bf16.gmra.mxu2 %v3389_v59  ;;  %1363 = vmatmul.bf16.vlgmr.msrb.gmra.mxu0 %v3391_v60  ;;  %v3559_v48 = vor.u32 %v2803_v43, %v2181_v42 }
  0x4e   : > { %1421 = vmatpush.bf16.msra.mxu2 %v2638_v49  ;;  %1487 = vmatpush.bf16.msra.mxu0 %v2258_v37  ;;  %v2109_v49 = vld [vmem:[%s3122_s12 + $0x48] sm:$0xf]  ;;  %v2207_v37 = vld [vmem:[%s4314_s1 + $0x18] sm:$0xf0] }
  0x4f   : > { %1454 = vmatpush.bf16.msra.mxu3 %v2702_v50  ;;  %v2786_v50 = vld [vmem:[%s3122_s12 + $0x64] sm:$0xf0]  ;;  %1520 = vmatpush.bf16.msra.mxu1 %v2322_v38  ;;  %v500_v38 = vunpack.c.h.b16 %v259_v20 }
  0x50   : > { %1284 = vmatmul.bf16.gmra.mxu3 %v3393_v61  ;;  %1396 = vmatmul.bf16.vlgmr.msrb.gmra.mxu1 %v3399_v6  ;;  %v3483_v56 = vor.u32 %v2786_v50, %v2109_v49  ;;  %v2799_v50 = vld [vmem:[%s3122_s12 + $0xd4] sm:$0xf] }
  0x51   : > { %v3576_v55 = vor.u32 %v2799_v50, %v2183_v51  ;;  %v3632_v42 = vpack.c.b16 %v500_v38, %v500_v38  ;;  %v2867_v50 = vld [vmem:[%s4314_s1 + $0x1f4] sm:$0xf]  ;;  %v2447_v51 = vld [vmem:[%s4314_s1 + $0x1f8] sm:$0xf0] }
  0x52   : > { %1422 = vmatpush.bf16.msra.mxu2 %v2630_v62  ;;  %1488 = vmatpush.bf16.msra.mxu0 %v2250_v45  ;;  %v2791_v62 = vld [vmem:[%s3122_s12 + $0x94] sm:$0xf]  ;;  %v2143_v45 = vld [vmem:[%s3122_s12 + $0xa8] sm:$0xf0] }
  0x53   : > { %1455 = vmatpush.bf16.msra.mxu3 %v2694_v3  ;;  %v2231_v3 = vld [vmem:[%s4314_s1 + $0x48] sm:$0xf0]  ;;  %v3499_v8 = vor.u32 %v2791_v62, %v2151_v63  ;;  %v3561_v49 = vor.u32 %v2790_v44, %v2143_v45  ;;  %v2851_v44 = vld [vmem:[%s4314_s1 + $0x174] sm:$0xf]  ;;  %v2383_v45 = vld [vmem:[%s4314_s1 + $0x178] sm:$0xf0] }
  0x54   : > { %v2234_v10 = vor.u32 %v2813_v2, %v2231_v3  ;;  %v2311_v63 = vld [vmem:[%s4314_s1 + $0xe8] sm:$0xf0]  ;;  %v2831_v3 = vld [vmem:[%s4314_s1 + $0xd4] sm:$0xf] }
  0x55   : > { %v2314_v2 = vor.u32 %v2833_v54, %v2311_v63  ;;  %v2271_v54 = vld [vmem:[%s4314_s1 + $0x98] sm:$0xf0]  ;;  %v258_v63 = vld [vmem:[%s3122_s12 + $0x108] sm:$0xff] }
  0x56   : > { %1423 = vmatpush.bf16.msra.mxu2 %v2622_v13  ;;  %1489 = vmatpush.bf16.msra.mxu0 %v2242_v53  ;;  %v2661_v13 = vld [vmem:[%s4314_s1 + $0x3a0] sm:$0xf]  ;;  %v2199_v53 = vld [vmem:[%s4314_s1 + $0x8] sm:$0xf0] }
  0x57   : > { %1456 = vmatpush.bf16.msra.mxu3 %v2686_v14  ;;  %v2598_v14 = vor.u32 %v2906_v12, %v2597_v11  ;;  %v2662_v18 = vor.u32 %v2922_v15, %v2661_v13  ;;  %v2202_v62 = vor.u32 %v2805_v52, %v2199_v53  ;;  %v2581_v11 = vld [vmem:[%s4314_s1 + $0x300] sm:$0xf]  ;;  %v2902_v12 = vld [vmem:[%s4314_s1 + $0x304] sm:$0xf0]  ;;  %1521 = vmatpush.bf16.msra.mxu1 %v2314_v2  ;;  %v2823_v53 = vld [vmem:[%s4314_s1 + $0x94] sm:$0xf] }
  0x58   : > { %v2645_v13 = vld [vmem:[%s4314_s1 + $0x380] sm:$0xf]  ;;  %v2450_v52 = vor.u32 %v2867_v50, %v2447_v51  ;;  %v2821_v2 = vld [vmem:[%s4314_s1 + $0x84] sm:$0xf] }
  0x5a   : > { %1424 = vmatpush.bf16.msra.mxu2 %v2614_v17  ;;  %1490 = vmatpush.bf16.msra.mxu0 %v2234_v10  ;;  %v2223_v17 = vld [vmem:[%s4314_s1 + $0x38] sm:$0xf0] }
  0x5b   : > { %1457 = vmatpush.bf16.msra.mxu3 %v2678_v34  ;;  %v2226_v19 = vor.u32 %v2811_v16, %v2223_v17  ;;  %v2653_v34 = vld [vmem:[%s4314_s1 + $0x390] sm:$0xf]  ;;  %v2303_v10 = vld [vmem:[%s4314_s1 + $0xd8] sm:$0xf0]  ;;  %v2582_v16 = vor.u32 %v2902_v12, %v2581_v11  ;;  %v2375_v12 = vld [vmem:[%s4314_s1 + $0x168] sm:$0xf0] }
  0x5c   : > { %v2654_v39 = vor.u32 %v2920_v35, %v2653_v34  ;;  %v2306_v15 = vor.u32 %v2831_v3, %v2303_v10  ;;  %v2175_v34 = vld [vmem:[%s3122_s12 + $0xe8] sm:$0xf0]  ;;  %v2849_v10 = vld [vmem:[%s4314_s1 + $0x164] sm:$0xf] }
  0x5d   : > { %1297 = vmatmul.bf16.vlgmr.msrb.gmra.mxu2 %v3427_v26  ;;  %1368 = vmatmul.bf16.gmra.mxu0 %v3429_v27  ;;  %v2263_v3 = vld [vmem:[%s4314_s1 + $0x88] sm:$0xf0] }
  0x5e   : > { %1425 = vmatpush.bf16.msra.mxu2 %v2606_v41  ;;  %1491 = vmatpush.bf16.msra.mxu0 %v2226_v19  ;;  %v2794_v41 = vld [vmem:[%s3122_s12 + $0xa4] sm:$0xf0]  ;;  %v2295_v19 = vld [vmem:[%s4314_s1 + $0xc8] sm:$0xf0]  ;;  %v2266_v11 = vor.u32 %v2821_v2, %v2263_v3  ;;  %v2511_v2 = vld [vmem:[%s4314_s1 + $0x278] sm:$0xf0] }
  0x5f   : > { %1458 = vmatpush.bf16.msra.mxu3 %v2670_v46  ;;  %v2210_v46 = vor.u32 %v2807_v36, %v2207_v37  ;;  %v3557_v47 = vor.u32 %v2794_v41, %v2141_v40  ;;  %1522 = vmatpush.bf16.msra.mxu1 %v2306_v15  ;;  %v3620_v37 = vpack.c.b16 %v499_v22, %v499_v22  ;;  %v2825_v40 = vld [vmem:[%s4314_s1 + $0xa4] sm:$0xf]  ;;  %v2279_v41 = vld [vmem:[%s4314_s1 + $0xa8] sm:$0xf0]  ;;  %v498_v15 = vunpack.c.h.b16 %v258_v63  ;;  %v2367_v22 = vld [vmem:[%s4314_s1 + $0x158] sm:$0xf0] }
  0x60   : > { %1330 = vmatmul.bf16.vlgmr.msrb.gmra.mxu3 %v3431_v28  ;;  %1401 = vmatmul.bf16.gmra.mxu1 %v3437_v31  ;;  %v2282_v43 = vor.u32 %v2825_v40, %v2279_v41 }
  0x62   : > { %1426 = vmatpush.bf16.msra.mxu2 %v2598_v14  ;;  %1492 = vmatpush.bf16.msra.mxu0 %v2218_v32  ;;  %v2918_v14 = vld [vmem:[%s4314_s1 + $0x384] sm:$0xf0] }
  0x63   : > { %1459 = vmatpush.bf16.msra.mxu3 %v2662_v18  ;;  %v2646_v17 = vor.u32 %v2918_v14, %v2645_v13  ;;  %v2829_v18 = vld [vmem:[%s4314_s1 + $0xc4] sm:$0xf]  ;;  %v2802_v32 = vld [vmem:[%s3122_s12 + $0xe4] sm:$0xf0]  ;;  %v497_v13 = vunpack.c.l.b16 %v258_v63  ;;  %v2378_v14 = vor.u32 %v2849_v10, %v2375_v12 }
  0x64   : > { %v2298_v21 = vor.u32 %v2829_v18, %v2295_v19  ;;  %v3618_v36 = vor.u32 %v2802_v32, %v2173_v30  ;;  %v2865_v18 = vld [vmem:[%s4314_s1 + $0x1e4] sm:$0xf]  ;;  %v2439_v19 = vld [vmem:[%s4314_s1 + $0x1e8] sm:$0xf0]  ;;  %v2093_v32 = vld [vmem:[%s3122_s12 + $0x18] sm:$0xf] }
  0x65   : > { %v2442_v20 = vor.u32 %v2865_v18, %v2439_v19  ;;  %v2881_v18 = vld [vmem:[%s4314_s1 + $0x264] sm:$0xf] }
  0x66   : > { %1427 = vmatpush.bf16.msra.mxu2 %v2590_v29  ;;  %1493 = vmatpush.bf16.msra.mxu0 %v2210_v46  ;;  %v2287_v29 = vld [vmem:[%s4314_s1 + $0xb8] sm:$0xf0]  ;;  %v2386_v46 = vor.u32 %v2851_v44, %v2383_v45  ;;  %v2845_v45 = vld [vmem:[%s4314_s1 + $0x144] sm:$0xf] }
  0x67   : > { %1460 = vmatpush.bf16.msra.mxu3 %v2654_v39  ;;  %1523 = vmatpush.bf16.msra.mxu1 %v2298_v21  ;;  %v2290_v35 = vor.u32 %v2827_v25, %v2287_v29  ;;  %v3622_v39 = vor.u32 %v2798_v33, %v2175_v34  ;;  %v2847_v21 = vld [vmem:[%s4314_s1 + $0x154] sm:$0xf]  ;;  %v3698_v33 = vld [vmem:[%s4315_s2] sm:$0x3]  ;;  %v2776_v34 = vld [vmem:[%s3122_s12 + $0x1c] sm:$0xf] }
  0x68   : > { %v2863_v25 = vld [vmem:[%s4314_s1 + $0x1d4] sm:$0xf]  ;;  %v2370_v29 = vor.u32 %v2847_v21, %v2367_v22  ;;  %v3705_v40 = vperm.slane %v3698_v33, 0  ;;  %v2415_v22 = vld [vmem:[%s4314_s1 + $0x1b8] sm:$0xf0] }
  0x69   : > { %v2859_v21 = vld [vmem:[%s4314_s1 + $0x1b4] sm:$0xf] }
  0x6a   : > { %1494 = vmatpush.bf16.msra.mxu0 %v2202_v62  ;;  %1428 = vmatpush.bf16.msra.mxu2 %v2582_v16  ;;  %v2274_v62 = vor.u32 %v2823_v53, %v2271_v54  ;;  %v3667_v16 = vpack.c.b16 %v497_v13, %v497_v13  ;;  %v2423_v53 = vld [vmem:[%s4314_s1 + $0x1c8] sm:$0xf0] }
  0x6b   : > { %1461 = vmatpush.bf16.msra.mxu3 %v2646_v17  ;;  %1524 = vmatpush.bf16.msra.mxu1 %v2290_v35  ;;  %v3669_v17 = vpack.c.b16 %v498_v15, %v498_v15  ;;  %v2095_v35 = vld [vmem:[%s3122_s12 + $0x38] sm:$0xf0]  ;;  %v2843_v15 = vld [vmem:[%s4314_s1 + $0x134] sm:$0xf] }
  0x6c   : > { %v3707_v41 = vor.u32 %v2776_v34, %v2095_v35  ;;  %v2127_v34 = vld [vmem:[%s3122_s12 + $0x78] sm:$0xf0] }
  0x6d   : > { %1302 = vmatmul.bf16.gmra.mxu2 %v3483_v56  ;;  %1373 = vmatmul.bf16.gmra.mxu0 %v3485_v57 }
  0x6e   : > { %1553 = vmatpush.bf16.msrb.mxu2 %v2386_v46  ;;  %v2359_v46 = vld [vmem:[%s4314_s1 + $0x148] sm:$0xf0] }
  0x6f   : > { %1525 = vmatpush.bf16.msra.mxu1 %v2282_v43  ;;  %1586 = vmatpush.bf16.msrb.mxu3 %v2450_v52  ;;  %v2362_v50 = vor.u32 %v2845_v45, %v2359_v46  ;;  %v2861_v52 = vld [vmem:[%s4314_s1 + $0x1c4] sm:$0xf]  ;;  %v2495_v45 = vld [vmem:[%s4314_s1 + $0x258] sm:$0xf0] }
  0x70   : > { %1335 = vmatmul.bf16.gmra.mxu3 %v3487_v58  ;;  %1406 = vmatmul.bf16.gmra.mxu1 %v3499_v8 }
  0x72   : > { %1554 = vmatpush.bf16.msrb.mxu2 %v2378_v14 }
  0x73   : > { %1526 = vmatpush.bf16.msra.mxu1 %v2274_v62  ;;  %1587 = vmatpush.bf16.msrb.mxu3 %v2442_v20  ;;  %v2426_v62 = vor.u32 %v2861_v52, %v2423_v53  ;;  %v2503_v20 = vld [vmem:[%s4314_s1 + $0x268] sm:$0xf0] }
  0x76   : > { %1555 = vmatpush.bf16.msrb.mxu2 %v2370_v29  ;;  %v2418_v29 = vor.u32 %v2859_v21, %v2415_v22 }
  0x77   : > { %1527 = vmatpush.bf16.msra.mxu1 %v2266_v11 }
  0x7a   : > { %1556 = vmatpush.bf16.msrb.mxu2 %v2362_v50 }
  0x7d   : > { %1307 = vmatmul.bf16.gmra.mxu2 %v3557_v47  ;;  %1378 = vmatmul.bf16.gmra.mxu0 %v3559_v48 }
  0x80   : > { %1340 = vmatmul.bf16.gmra.mxu3 %v3561_v49  ;;  %1411 = vmatmul.bf16.gmra.mxu1 %v3576_v55 }
  0x8d   : > { %1312 = vmatmul.bf16.gmra.mxu2 %v3618_v36  ;;  %1383 = vmatmul.bf16.gmra.mxu0 %v3620_v37 }
  0x90   : > { %1345 = vmatmul.bf16.gmra.mxu3 %v3622_v39  ;;  %1416 = vmatmul.bf16.gmra.mxu1 %v3632_v42 }
  0x9d   : > { %1317 = vmatmul.bf16.gmra.mxu2 %v3667_v16  ;;  %1495 = vmatmul.bf16.vlgmr.msra.gmra.mxu0 %v3171_v5  ;;  %v2431_v5 = vld [vmem:[%s4314_s1 + $0x1d8] sm:$0xf0] }
  0x9e   : > { %v2434_v30 = vor.u32 %v2863_v25, %v2431_v5  ;;  %v2506_v25 = vor.u32 %v2881_v18, %v2503_v20  ;;  %v2125_v5 = vld [vmem:[%s3122_s12 + $0x58] sm:$0xf] }
  0xa0   : > { %1350 = vmatmul.bf16.gmra.mxu3 %v3669_v17  ;;  %1528 = vmatmul.bf16.vlgmr.msra.gmra.mxu1 %v3209_v23  ;;  %v2780_v23 = vld [vmem:[%s3122_s12 + $0x34] sm:$0xf0] }
  0xa1   : > { %1588 = vmatpush.bf16.msrb.mxu3 %v2434_v30  ;;  %v3702_v38 = vor.u32 %v2780_v23, %v2093_v32  ;;  %v2788_v30 = vld [vmem:[%s3122_s12 + $0x74] sm:$0xf0]  ;;  %v2784_v23 = vld [vmem:[%s3122_s12 + $0x5c] sm:$0xf] }
  0xa2   : > { %v3771_v53 = vor.u32 %v2784_v23, %v2127_v34  ;;  %v2471_v34 = vld [vmem:[%s4314_s1 + $0x228] sm:$0xf0] }
  0xa5   : > { %1589 = vmatpush.bf16.msrb.mxu3 %v2426_v62 }
  0xa9   : > { %1590 = vmatpush.bf16.msrb.mxu3 %v2418_v29 }
  0xaa   : > { %v1232_v43 = vpop.f32.mrf.mxu0 }
  0xab   : > { %v1233_v44 = vadd.f32 %v1232_v43, %v3705_v40 }
  0xad   : > { %1429 = vmatmul.bf16.vlgmr.msra.gmra.mxu2 %v3702_v38  ;;  %1500 = vmatmul.bf16.gmra.mxu0 %v3287_v1  ;;  %v1265_v51 = vpop.f32.mrf.mxu1  ;;  %v2883_v1 = vld [vmem:[%s4314_s1 + $0x274] sm:$0xf] }
  0xae   : > { %v3725_v54 = vadd.f32 %v1265_v51, %v1233_v44  ;;  %v2514_v11 = vor.u32 %v2883_v1, %v2511_v2  ;;  %v2879_v44 = vld [vmem:[%s4314_s1 + $0x254] sm:$0xf]  ;;  %v3769_v51 = vor.u32 %v2788_v30, %v2125_v5  ;;  %v2877_v2 = vld [vmem:[%s4314_s1 + $0x244] sm:$0xf] }
  0xaf   : > { %v2498_v52 = vor.u32 %v2879_v44, %v2495_v45  ;;  %v2857_v30 = vld [vmem:[%s4314_s1 + $0x1a4] sm:$0xf]  ;;  %v2157_v44 = vld [vmem:[%s3122_s12 + $0x98] sm:$0xf] }
  0xb0   : > { %1462 = vmatmul.bf16.vlgmr.msra.gmra.mxu3 %v3707_v41  ;;  %v1242_v63 = vpop.f32.mrf.mxu2  ;;  %1533 = vmatmul.bf16.gmra.mxu1 %v3328_v24  ;;  %v2351_v24 = vld [vmem:[%s4314_s1 + $0x138] sm:$0xf0]  ;;  %v2796_v45 = vld [vmem:[%s3122_s12 + $0xb4] sm:$0xf0] }
  0xb1   : > { %v1243_v3 = vadd.f32 %v1242_v63, %v3705_v40  ;;  %1619 = vmatpush.bf16.msrb.mxu0 %v2514_v11  ;;  %v2354_v19 = vor.u32 %v2843_v15, %v2351_v24 }
  0xb2   : > { %v1234_v12 = vpop.f32.mrf.mxu0 }
  0xb3   : > { %v1275_v10 = vpop.f32.mrf.mxu3  ;;  %v1235_v14 = vadd.f32 %v1234_v12, %v3705_v40  ;;  %1557 = vmatpush.bf16.msrb.mxu2 %v2354_v19  ;;  %v2841_v12 = vld [vmem:[%s4314_s1 + $0x124] sm:$0xf]  ;;  %v2479_v19 = vld [vmem:[%s4314_s1 + $0x238] sm:$0xf0] }
  0xb4   : > { %v3735_v13 = vadd.f32 %v1275_v10, %v1243_v3  ;;  %v2487_v3 = vld [vmem:[%s4314_s1 + $0x248] sm:$0xf0] }
  0xb5   : > { %v1267_v32 = vpop.f32.mrf.mxu1  ;;  %1620 = vmatpush.bf16.msrb.mxu0 %v2506_v25  ;;  %v2490_v10 = vor.u32 %v2877_v2, %v2487_v3  ;;  %v2871_v2 = vld [vmem:[%s4314_s1 + $0x214] sm:$0xf]  ;;  %v2463_v3 = vld [vmem:[%s4314_s1 + $0x218] sm:$0xf0] }
  0xb6   : > { %v3760_v35 = vadd.f32 %v1267_v32, %v1235_v14  ;;  %v2343_v14 = vld [vmem:[%s4314_s1 + $0x128] sm:$0xf0] }
  0xb7   : > { %v2346_v24 = vor.u32 %v2841_v12, %v2343_v14  ;;  %v2407_v32 = vld [vmem:[%s4314_s1 + $0x1a8] sm:$0xf0]  ;;  %v3832_v14 = vor.u32 %v2796_v45, %v2157_v44  ;;  %v2897_v44 = vld [vmem:[%s4314_s1 + $0x2e4] sm:$0xf] }
  0xb8   : > { %v1244_v43 = vpop.f32.mrf.mxu2  ;;  %v2410_v23 = vor.u32 %v2857_v30, %v2407_v32  ;;  %v2399_v32 = vld [vmem:[%s4314_s1 + $0x198] sm:$0xf0]  ;;  %v2567_v45 = vld [vmem:[%s4314_s1 + $0x2e8] sm:$0xf0] }
  0xb9   : > { %v1245_v46 = vadd.f32 %v1244_v43, %v3705_v40  ;;  %1621 = vmatpush.bf16.msrb.mxu0 %v2498_v52  ;;  %1558 = vmatpush.bf16.msrb.mxu2 %v2346_v24  ;;  %v2159_v52 = vld [vmem:[%s3122_s12 + $0xb8] sm:$0xf0]  ;;  %v2466_v24 = vor.u32 %v2871_v2, %v2463_v3 }
  0xba   : > { %v1237_v62 = vpop.f32.mrf.mxu0  ;;  %1591 = vmatpush.bf16.msrb.mxu3 %v2410_v23  ;;  %v2869_v23 = vld [vmem:[%s4314_s1 + $0x204] sm:$0xf] }
  0xbb   : > { %v1277_v50 = vpop.f32.mrf.mxu3  ;;  %v1238_v1 = vadd.f32 %v1237_v62, %v3705_v40 }
  0xbc   : > { %v3773_v63 = vadd.f32 %v1277_v50, %v1245_v46  ;;  %v2792_v50 = vld [vmem:[%s3122_s12 + $0x9c] sm:$0xf] }
  0xbd   : > { %1434 = vmatmul.bf16.gmra.mxu2 %v3769_v51  ;;  %1505 = vmatmul.bf16.gmra.mxu0 %v3169_v4  ;;  %v1270_v11 = vpop.f32.mrf.mxu1  ;;  %v2875_v4 = vld [vmem:[%s4314_s1 + $0x234] sm:$0xf] }
  0xbe   : > { %v3791_v15 = vadd.f32 %v1270_v11, %v1238_v1  ;;  %1622 = vmatpush.bf16.msrb.mxu0 %v2490_v10  ;;  %v2482_v22 = vor.u32 %v2875_v4, %v2479_v19  ;;  %v2899_v10 = vld [vmem:[%s4314_s1 + $0x2f4] sm:$0xf]  ;;  %v3837_v4 = vor.u32 %v2792_v50, %v2159_v52  ;;  %v2570_v50 = vor.u32 %v2897_v44, %v2567_v45 }
  0xbf   : > { %v2891_v45 = vld [vmem:[%s4314_s1 + $0x2b4] sm:$0xf] }
  0xc0   : > { %1467 = vmatmul.bf16.gmra.mxu3 %v3771_v53  ;;  %v1247_v18 = vpop.f32.mrf.mxu2  ;;  %1538 = vmatmul.bf16.gmra.mxu1 %v3182_v9  ;;  %v2873_v9 = vld [vmem:[%s4314_s1 + $0x224] sm:$0xf] }
  0xc1   : > { %v1248_v20 = vadd.f32 %v1247_v18, %v3705_v40  ;;  %v2474_v43 = vor.u32 %v2873_v9, %v2471_v34  ;;  %v2575_v18 = vld [vmem:[%s4314_s1 + $0x2f8] sm:$0xf0]  ;;  %v2455_v9 = vld [vmem:[%s4314_s1 + $0x208] sm:$0xf0] }
  0xc2   : > { %v1239_v25 = vpop.f32.mrf.mxu0  ;;  %1623 = vmatpush.bf16.msrb.mxu0 %v2482_v22  ;;  %v2839_v22 = vld [vmem:[%s4314_s1 + $0x114] sm:$0xf] }
  0xc3   : > { %v1280_v21 = vpop.f32.mrf.mxu3  ;;  %v1240_v5 = vadd.f32 %v1239_v25, %v3705_v40  ;;  %v2335_v25 = vld [vmem:[%s4314_s1 + $0x118] sm:$0xf0] }
  0xc4   : > { %v3801_v29 = vadd.f32 %v1280_v21, %v1248_v20  ;;  %v2578_v20 = vor.u32 %v2899_v10, %v2575_v18  ;;  %v2338_v30 = vor.u32 %v2839_v22, %v2335_v25  ;;  %v2853_v18 = vld [vmem:[%s4314_s1 + $0x184] sm:$0xf]  ;;  %v2551_v25 = vld [vmem:[%s4314_s1 + $0x2c8] sm:$0xf0] }
  0xc5   : > { %v1272_v46 = vpop.f32.mrf.mxu1  ;;  %v2893_v22 = vld [vmem:[%s4314_s1 + $0x2c4] sm:$0xf] }
  0xc6   : > { %v3820_v62 = vadd.f32 %v1272_v46, %v1240_v5  ;;  %1624 = vmatpush.bf16.msrb.mxu0 %v2474_v43  ;;  %v2855_v5 = vld [vmem:[%s4314_s1 + $0x194] sm:$0xf]  ;;  %1652 = vmatpush.bf16.msrb.mxu1 %v2578_v20  ;;  %v2458_v43 = vor.u32 %v2869_v23, %v2455_v9  ;;  %v2391_v20 = vld [vmem:[%s4314_s1 + $0x188] sm:$0xf0]  ;;  %v2804_v23 = vld [vmem:[%s3122_s12 + $0xf4] sm:$0xf0] }
  0xc7   : > { %v2402_v34 = vor.u32 %v2855_v5, %v2399_v32  ;;  %1559 = vmatpush.bf16.msrb.mxu2 %v2338_v30  ;;  %v2394_v5 = vor.u32 %v2853_v18, %v2391_v20  ;;  %v2554_v30 = vor.u32 %v2893_v22, %v2551_v25  ;;  %v2189_v32 = vld [vmem:[%s3122_s12 + $0xd8] sm:$0xf]  ;;  %v2639_v20 = vld [vmem:[%s4314_s1 + $0x378] sm:$0xf0]  ;;  %v2931_v25 = vld [vmem:[%s4314_s1 + $0x3f4] sm:$0xf] }
  0xc8   : > { %v1249_v1 = vpop.f32.mrf.mxu2 }
  0xc9   : > { %v1250_v11 = vadd.f32 %v1249_v1, %v3705_v40  ;;  %1592 = vmatpush.bf16.msrb.mxu3 %v2402_v34  ;;  %v2559_v1 = vld [vmem:[%s4314_s1 + $0x2d8] sm:$0xf0] }
  0xca   : > { %v3839_v19 = vpop.f32.mrf.mxu0  ;;  %1625 = vmatpush.bf16.msrb.mxu0 %v2466_v24  ;;  %1653 = vmatpush.bf16.msrb.mxu1 %v2570_v50  ;;  %v2837_v24 = vld [vmem:[%s4314_s1 + $0x104] sm:$0xf]  ;;  %v2800_v34 = vld [vmem:[%s3122_s12 + $0xdc] sm:$0xf] }
  0xcb   : > { %v1282_v12 = vpop.f32.mrf.mxu3  ;;  %v2543_v50 = vld [vmem:[%s4314_s1 + $0x2b8] sm:$0xf0] }
  0xcc   : > { %v3841_v21 = vadd.f32 %v1282_v12, %v1250_v11 }
  0xcd   : > { %1439 = vmatmul.bf16.gmra.mxu2 %v3832_v14  ;;  %1510 = vmatmul.bf16.gmra.mxu0 %v3285_v0  ;;  %v3870_v46 = vpop.f32.mrf.mxu1  ;;  %v2895_v0 = vld [vmem:[%s4314_s1 + $0x2d4] sm:$0xf] }
  0xce   : > { %1626 = vmatpush.bf16.msrb.mxu0 %v2458_v43  ;;  %v2562_v10 = vor.u32 %v2895_v0, %v2559_v1  ;;  %v2191_v43 = vld [vmem:[%s3122_s12 + $0xf8] sm:$0xf0]  ;;  %1593 = vmatpush.bf16.msrb.mxu3 %v2394_v5  ;;  %v3914_v0 = vor.u32 %v2804_v23, %v2189_v32  ;;  %v2546_v1 = vor.u32 %v2891_v45, %v2543_v50  ;;  %v2887_v32 = vld [vmem:[%s4314_s1 + $0x294] sm:$0xf] }
  0xcf   : > { %v2527_v23 = vld [vmem:[%s4314_s1 + $0x298] sm:$0xf0] }
  0xd0   : > { %1472 = vmatmul.bf16.gmra.mxu3 %v3837_v4  ;;  %v1252_v52 = vpop.f32.mrf.mxu2  ;;  %1543 = vmatmul.bf16.gmra.mxu1 %v3298_v7  ;;  %v260_v50 = vld [vmem:[%s3122_s12 + $0x118] sm:$0xff] }
  0xd1   : > { %v1253_v2 = vadd.f32 %v1252_v52, %v3705_v40  ;;  %v2327_v40 = vld [vmem:[%s4314_s1 + $0x108] sm:$0xf0]  ;;  %1654 = vmatpush.bf16.msrb.mxu1 %v2562_v10  ;;  %v2889_v10 = vld [vmem:[%s4314_s1 + $0x2a4] sm:$0xf] }
  0xd2   : > { %v3880_v11 = vpop.f32.mrf.mxu0  ;;  %v2330_v7 = vor.u32 %v2837_v24, %v2327_v40  ;;  %v2535_v24 = vld [vmem:[%s4314_s1 + $0x2a8] sm:$0xf0] }
  0xd3   : > { %v1285_v3 = vpop.f32.mrf.mxu3  ;;  %v2538_v40 = vor.u32 %v2889_v10, %v2535_v24  ;;  %v2519_v10 = vld [vmem:[%s4314_s1 + $0x288] sm:$0xf0]  ;;  %v501_v24 = vunpack.c.l.b16 %v260_v50 }
  0xd4   : > { %v3882_v12 = vadd.f32 %v1285_v3, %v1253_v2  ;;  %1560 = vmatpush.bf16.msrb.mxu2 %v2330_v7  ;;  %v3916_v2 = vor.u32 %v2800_v34, %v2191_v43  ;;  %v2915_v7 = vld [vmem:[%s4314_s1 + $0x374] sm:$0xf] }
  0xd5   : > { %v3904_v9 = vpop.f32.mrf.mxu1  ;;  %1655 = vmatpush.bf16.msrb.mxu1 %v2554_v30  ;;  %v2642_v22 = vor.u32 %v2915_v7, %v2639_v20 }
  0xd8   : > { %v1254_v44 = vpop.f32.mrf.mxu2  ;;  %1685 = vmatpush.bf16.msra.mxu2 %v2642_v22  ;;  %v2913_v22 = vld [vmem:[%s4314_s1 + $0x364] sm:$0xf] }
  0xd9   : > { %1656 = vmatpush.bf16.msrb.mxu1 %v2546_v1  ;;  %v2530_v44 = vor.u32 %v2887_v32, %v2527_v23  ;;  %v2885_v1 = vld [vmem:[%s4314_s1 + $0x284] sm:$0xf]  ;;  %v3969_v32 = vpack.c.b16 %v501_v24, %v501_v24 }
  0xda   : > { %v3918_v3 = vpop.f32.mrf.mxu0 }
  0xdb   : > { %v1287_v52 = vpop.f32.mrf.mxu3 }
  0xdd   : > { %1444 = vmatmul.bf16.gmra.mxu2 %v3914_v0  ;;  %1515 = vmatmul.bf16.gmra.mxu0 %v3389_v59  ;;  %v3929_v18 = vpop.f32.mrf.mxu1  ;;  %v2703_v59 = vld [vmem:[%s4314_s1 + $0x3f8] sm:$0xf0] }
  0xde   : > { %1657 = vmatpush.bf16.msrb.mxu1 %v2538_v40  ;;  %v2706_v30 = vor.u32 %v2931_v25, %v2703_v59  ;;  %v2522_v40 = vor.u32 %v2885_v1, %v2519_v10  ;;  %v2631_v25 = vld [vmem:[%s4314_s1 + $0x368] sm:$0xf0] }
  0xe0   : > { %1477 = vmatmul.bf16.gmra.mxu3 %v3916_v2  ;;  %v1298_v5 = vpop.f32.mrf.mxu2  ;;  %1548 = vmatmul.bf16.gmra.mxu1 %v3393_v61  ;;  %v502_v61 = vunpack.c.h.b16 %v260_v50 }
  0xe1   : > { %v1299_v34 = vadd.f32 %v1298_v5, %v3725_v54  ;;  %1718 = vmatpush.bf16.msra.mxu3 %v2706_v30  ;;  %v2634_v5 = vor.u32 %v2913_v22, %v2631_v25 }
  0xe2   : > { %v1371_v45 = vpop.f32.mrf.mxu0  ;;  %1658 = vmatpush.bf16.msrb.mxu1 %v2530_v44  ;;  %v3971_v23 = vpack.c.b16 %v502_v61, %v502_v61  ;;  %v2695_v44 = vld [vmem:[%s4314_s1 + $0x3e8] sm:$0xf0] }
  0xe3   : > { %v1331_v43 = vpop.f32.mrf.mxu3  ;;  %1686 = vmatpush.bf16.msra.mxu2 %v2634_v5 }
  0xe4   : > { %v1332_v52 = vadd.f32 %v1331_v43, %v1299_v34  ;;  %v2929_v43 = vld [vmem:[%s4314_s1 + $0x3e4] sm:$0xf] }
  0xe5   : > { %v1404_v7 = vpop.f32.mrf.mxu1  ;;  %v2698_v50 = vor.u32 %v2929_v43, %v2695_v44 }
  0xe6   : > { %v1365_v54 = vadd.f32 %v3839_v19, %v1332_v52  ;;  %1659 = vmatpush.bf16.msrb.mxu1 %v2522_v40 }
  0xe7   : > { %1719 = vmatpush.bf16.msra.mxu3 %v2698_v50  ;;  %v2909_v50 = vld [vmem:[%s4314_s1 + $0x344] sm:$0xf] }
  0xe8   : > { %v3960_v20 = vadd.f32 %v3870_v46, %v1365_v54  ;;  %v1300_v59 = vpop.f32.mrf.mxu2 }
  0xe9   : > { %v1301_v19 = vadd.f32 %v1300_v59, %v3760_v35 }
  0xea   : > { %v1374_v46 = vpop.f32.mrf.mxu0 }
  0xeb   : > { %v1333_v30 = vpop.f32.mrf.mxu3 }
  0xec   : > { %v1334_v34 = vadd.f32 %v1333_v30, %v1301_v19 }
  0xed   : > { %1449 = vmatmul.bf16.gmra.mxu2 %v3969_v32  ;;  %1627 = vmatmul.bf16.vlgmr.msrb.gmra.mxu0 %v3391_v60  ;;  %v1407_v52 = vpop.f32.mrf.mxu1  ;;  %v2623_v60 = vld [vmem:[%s4314_s1 + $0x358] sm:$0xf0] }
  0xee   : > { %v1367_v35 = vadd.f32 %v3880_v11, %v1334_v34  ;;  %v2911_v11 = vld [vmem:[%s4314_s1 + $0x354] sm:$0xf] }
  0xef   : > { %v2626_v22 = vor.u32 %v2911_v11, %v2623_v60 }
  0xf0   : > { %1482 = vmatmul.bf16.gmra.mxu3 %v3971_v23  ;;  %v3984_v1 = vadd.f32 %v3904_v9, %v1367_v35  ;;  %v1303_v10 = vpop.f32.mrf.mxu2  ;;  %1660 = vmatmul.bf16.vlgmr.msrb.gmra.mxu1 %v3399_v6  ;;  %v2927_v9 = vld [vmem:[%s4314_s1 + $0x3d4] sm:$0xf] }
  0xf1   : > { %v1304_v54 = vadd.f32 %v1303_v10, %v3791_v15  ;;  %v2687_v15 = vld [vmem:[%s4314_s1 + $0x3d8] sm:$0xf0]  ;;  %1687 = vmatpush.bf16.msra.mxu2 %v2626_v22  ;;  %v2925_v10 = vld [vmem:[%s4314_s1 + $0x3c4] sm:$0xf] }
  0xf2   : > { %v1376_v40 = vpop.f32.mrf.mxu0  ;;  %v2690_v25 = vor.u32 %v2927_v9, %v2687_v15  ;;  %v2607_v9 = vld [vmem:[%s4314_s1 + $0x338] sm:$0xf0] }
  0xf3   : > { %v1336_v24 = vpop.f32.mrf.mxu3 }
  0xf4   : > { %v1337_v61 = vadd.f32 %v1336_v24, %v1304_v54  ;;  %1720 = vmatpush.bf16.msra.mxu3 %v2690_v25  ;;  %v2679_v54 = vld [vmem:[%s4314_s1 + $0x3c8] sm:$0xf0]  ;;  %v2923_v25 = vld [vmem:[%s4314_s1 + $0x3b4] sm:$0xf] }
  0xf5   : > { %v1409_v59 = vpop.f32.mrf.mxu1 }
  0xf6   : > { %v1370_v6 = vadd.f32 %v3918_v3, %v1337_v61  ;;  %v2615_v3 = vld [vmem:[%s4314_s1 + $0x348] sm:$0xf0]  ;;  %v2682_v61 = vor.u32 %v2925_v10, %v2679_v54  ;;  %v2905_v10 = vld [vmem:[%s4314_s1 + $0x324] sm:$0xf] }
  0xf7   : > { %v2618_v35 = vor.u32 %v2909_v50, %v2615_v3  ;;  %v2938_v50 = vld [vmem:[%s4316_s3 + $0x28] sm:$0xff] }
  0xf8   : > { %v4002_v5 = vadd.f32 %v3929_v18, %v1370_v6  ;;  %v1305_v19 = vpop.f32.mrf.mxu2  ;;  %1721 = vmatpush.bf16.msra.mxu3 %v2682_v61  ;;  %v2599_v54 = vld [vmem:[%s4314_s1 + $0x328] sm:$0xf0] }
  0xf9   : > { %v1306_v30 = vadd.f32 %v1305_v19, %v3820_v62  ;;  %1688 = vmatpush.bf16.msra.mxu2 %v2618_v35  ;;  %v2671_v19 = vld [vmem:[%s4314_s1 + $0x3b8] sm:$0xf0] }
  0xfa   : > { %v4005_v43 = vpop.f32.mrf.mxu0 }
  0xfb   : > { %v1338_v34 = vpop.f32.mrf.mxu3 }
  0xfc   : > { %v1339_v44 = vadd.f32 %v1338_v34, %v1306_v30 }
  0xfd   : > { %1561 = vmatmul.bf16.vlgmr.msrb.gmra.mxu2 %v3427_v26  ;;  %1632 = vmatmul.bf16.gmra.mxu0 %v3429_v27  ;;  %v1412_v62 = vpop.f32.mrf.mxu1  ;;  %v2940_v27 = vld [vmem:[%s4316_s3 + $0x38] sm:$0xff] }
  0xfe   : > { %v1372_v18 = vadd.f32 %v1371_v45, %v1339_v44  ;;  %1911 = vmatpush.bf16.msra.mxu0 %v2940_v27 }
 0x100   : > { %1594 = vmatmul.bf16.vlgmr.msrb.gmra.mxu3 %v3431_v28  ;;  %v4022_v24 = vadd.f32 %v1404_v7, %v1372_v18  ;;  %v1308_v11 = vpop.f32.mrf.mxu2  ;;  %1665 = vmatmul.bf16.gmra.mxu1 %v3437_v31  ;;  %v2907_v7 = vld [vmem:[%s4314_s1 + $0x334] sm:$0xf]  ;;  %v2937_v18 = vld [vmem:[%s4316_s3 + $0x20] sm:$0xff] }
 0x101   : > { %v1309_v26 = vadd.f32 %v1308_v11, %v3735_v13  ;;  %v2610_v13 = vor.u32 %v2907_v7, %v2607_v9  ;;  %v2939_v31 = vld [vmem:[%s4316_s3 + $0x30] sm:$0xff] }
 0x102   : > { %v1381_v28 = vpop.f32.mrf.mxu0  ;;  %1912 = vmatpush.bf16.msra.mxu0 %v2939_v31 }
 0x103   : > { %v1341_v45 = vpop.f32.mrf.mxu3  ;;  %1689 = vmatpush.bf16.msra.mxu2 %v2610_v13  ;;  %v4086_v13 = vperm.slane %v3698_v33, 1  ;;  %v2933_v33 = vld [vmem:[%s4316_s3] sm:$0xff] }
 0x104   : > { %v1342_v60 = vadd.f32 %v1341_v45, %v1309_v26 }
 0x105   : > { %v4038_v15 = vpop.f32.mrf.mxu1 }
 0x106   : > { %v1375_v22 = vadd.f32 %v1374_v46, %v1342_v60  ;;  %v2674_v46 = vor.u32 %v2923_v25, %v2671_v19  ;;  %1913 = vmatpush.bf16.msra.mxu0 %v2938_v50  ;;  %v2934_v25 = vld [vmem:[%s4316_s3 + $0x8] sm:$0xff] }
 0x108   : > { %v4040_v6 = vadd.f32 %v1407_v52, %v1375_v22  ;;  %v1310_v30 = vpop.f32.mrf.mxu2  ;;  %1722 = vmatpush.bf16.msra.mxu3 %v2674_v46 }
 0x109   : > { %v1311_v34 = vadd.f32 %v1310_v30, %v3773_v63 }
 0x10a   : > { %v4052_v52 = vpop.f32.mrf.mxu0  ;;  %1914 = vmatpush.bf16.msra.mxu0 %v2937_v18 }
 0x10b   : > { %v1343_v44 = vpop.f32.mrf.mxu3 }
 0x10c   : > { %v1344_v3 = vadd.f32 %v1343_v44, %v1311_v34  ;;  %v2903_v44 = vld [vmem:[%s4314_s1 + $0x314] sm:$0xf] }
 0x10d   : > { %1566 = vmatmul.bf16.gmra.mxu2 %v3483_v56  ;;  %1637 = vmatmul.bf16.gmra.mxu0 %v3485_v57  ;;  %v1417_v63 = vpop.f32.mrf.mxu1  ;;  %v2602_v56 = vor.u32 %v2905_v10, %v2599_v54 }
 0x10e   : > { %v1377_v35 = vadd.f32 %v1376_v40, %v1344_v3 }
 0x10f   : > { %1690 = vmatpush.bf16.msra.mxu2 %v2602_v56 }
 0x110   : > { %1599 = vmatmul.bf16.gmra.mxu3 %v3487_v58  ;;  %v4066_v61 = vadd.f32 %v1409_v59, %v1377_v35  ;;  %v1313_v57 = vpop.f32.mrf.mxu2  ;;  %1670 = vmatmul.bf16.gmra.mxu1 %v3499_v8  ;;  %v2936_v58 = vld [vmem:[%s4316_s3 + $0x18] sm:$0xff]  ;;  %v2921_v59 = vld [vmem:[%s4314_s1 + $0x3a4] sm:$0xf]  ;;  %v2935_v8 = vld [vmem:[%s4316_s3 + $0x10] sm:$0xff] }
 0x111   : > { %v1314_v40 = vadd.f32 %v1313_v57, %v3801_v29  ;;  %1915 = vmatpush.bf16.msra.mxu0 %v2936_v58  ;;  %v2663_v29 = vld [vmem:[%s4314_s1 + $0x3a8] sm:$0xf0]  ;;  %v2901_v57 = vld [vmem:[%s4314_s1 + $0x304] sm:$0xf] }
 0x112   : > { %v1386_v26 = vpop.f32.mrf.mxu0  ;;  %v2666_v7 = vor.u32 %v2921_v59, %v2663_v29  ;;  %v2647_v58 = vld [vmem:[%s4314_s1 + $0x388] sm:$0xf0] }
 0x113   : > { %v1346_v11 = vpop.f32.mrf.mxu3 }
 0x114   : > { %v1347_v45 = vadd.f32 %v1346_v11, %v1314_v40  ;;  %1723 = vmatpush.bf16.msra.mxu3 %v2666_v7  ;;  %v2583_v40 = vld [vmem:[%s4314_s1 + $0x308] sm:$0xf0] }
 0x115   : > { %v1419_v60 = vpop.f32.mrf.mxu1  ;;  %1916 = vmatpush.bf16.msra.mxu0 %v2935_v8  ;;  %v2586_v11 = vor.u32 %v2901_v57, %v2583_v40 }
 0x116   : > { %v1380_v27 = vadd.f32 %v4005_v43, %v1347_v45 }
 0x118   : > { %v4083_v9 = vadd.f32 %v1412_v62, %v1380_v27  ;;  %v1315_v43 = vpop.f32.mrf.mxu2 }
 0x119   : > { %v1316_v22 = vadd.f32 %v1315_v43, %v3841_v21  ;;  %1917 = vmatpush.bf16.msra.mxu0 %v2934_v25 }
 0x11a   : > { %v1496_v19 = vpop.f32.mrf.mxu0 }
 0x11b   : > { %v1348_v31 = vpop.f32.mrf.mxu3  ;;  %v1497_v46 = vadd.f32 %v1496_v19, %v4086_v13 }
 0x11c   : > { %v1349_v30 = vadd.f32 %v1348_v31, %v1316_v22 }
 0x11d   : > { %1571 = vmatmul.bf16.gmra.mxu2 %v3557_v47  ;;  %1642 = vmatmul.bf16.gmra.mxu0 %v3559_v48  ;;  %v1529_v21 = vpop.f32.mrf.mxu1  ;;  %v2591_v47 = vld [vmem:[%s4314_s1 + $0x318] sm:$0xf0]  ;;  %v2919_v48 = vld [vmem:[%s4314_s1 + $0x394] sm:$0xf] }
 0x11e   : > { %v4094_v62 = vadd.f32 %v1381_v28, %v1349_v30  ;;  %v4101_v34 = vadd.f32 %v1529_v21, %v1497_v46  ;;  %1918 = vmatpush.bf16.msra.mxu0 %v2933_v33  ;;  %v2594_v50 = vor.u32 %v2903_v44, %v2591_v47 }
 0x120   : > { %1604 = vmatmul.bf16.gmra.mxu3 %v3561_v49  ;;  %v1318_v28 = vpop.f32.mrf.mxu2  ;;  %v2655_v49 = vld [vmem:[%s4314_s1 + $0x398] sm:$0xf0]  ;;  %1675 = vmatmul.bf16.gmra.mxu1 %v3576_v55  ;;  %v2917_v55 = vld [vmem:[%s4314_s1 + $0x384] sm:$0xf] }
 0x121   : > { %v1319_v3 = vadd.f32 %v1318_v28, %v3882_v12  ;;  %v2658_v18 = vor.u32 %v2919_v48, %v2655_v49  ;;  %1691 = vmatpush.bf16.msra.mxu2 %v2594_v50  ;;  %v2650_v26 = vor.u32 %v2917_v55, %v2647_v58 }
 0x122   : > { %v4117_v10 = vpop.f32.mrf.mxu0 }
 0x123   : > { %v1351_v35 = vpop.f32.mrf.mxu3  ;;  %1724 = vmatpush.bf16.msra.mxu3 %v2658_v18 }
 0x124   : > { %v1352_v54 = vadd.f32 %v1351_v35, %v1319_v3 }
 0x125   : > { %v4129_v12 = vpop.f32.mrf.mxu1  ;;  %1692 = vmatpush.bf16.msra.mxu2 %v2586_v11 }
 0x126   : > { %v1385_v56 = vadd.f32 %v4052_v52, %v1352_v54 }
 0x127   : > { %1725 = vmatpush.bf16.msra.mxu3 %v2650_v26 }
 0x128   : > { %v4134_v52 = vadd.f32 %v1417_v63, %v1385_v56  ;;  %v1320_v45 = vpop.f32.mrf.mxu2 }
 0x12a   : > { %v1501_v59 = vpop.f32.mrf.mxu0 }
 0x12b   : > { %v1353_v27 = vpop.f32.mrf.mxu3  ;;  %v1502_v29 = vadd.f32 %v1501_v59, %v4086_v13 }
 0x12d   : > { %1576 = vmatmul.bf16.gmra.mxu2 %v3618_v36  ;;  %1647 = vmatmul.bf16.gmra.mxu0 %v3620_v37  ;;  %v1534_v8 = vpop.f32.mrf.mxu1 }
 0x12e   : > { %v4140_v60 = vadd.f32 %v1534_v8, %v1502_v29 }
 0x130   : > { %1609 = vmatmul.bf16.gmra.mxu3 %v3622_v39  ;;  %v1430_v7 = vpop.f32.mrf.mxu2  ;;  %1680 = vmatmul.bf16.gmra.mxu1 %v3632_v42 }
 0x131   : > { %v1431_v22 = vadd.f32 %v1430_v7, %v3960_v20 }
 0x132   : > { %v4143_v43 = vpop.f32.mrf.mxu0 }
 0x133   : > { %v1463_v63 = vpop.f32.mrf.mxu3 }
 0x134   : > { %v1464_v19 = vadd.f32 %v1463_v63, %v1431_v22 }
 0x135   : > { %v4146_v31 = vpop.f32.mrf.mxu1 }
 0x136   : > { %v1751_v33 = vmax.f32 %v1464_v19, 0.0 }
 0x138   : > { %v1432_v25 = vpop.f32.mrf.mxu2 }
 0x139   : > { %v1433_v36 = vadd.f32 %v1432_v25, %v3984_v1 }
 0x13a   : > { %v1506_v30 = vpop.f32.mrf.mxu0 }
 0x13b   : > { %v1465_v37 = vpop.f32.mrf.mxu3  ;;  %v1507_v46 = vadd.f32 %v1506_v30, %v4086_v13 }
 0x13c   : > { %v1466_v39 = vadd.f32 %v1465_v37, %v1433_v36 }
 0x13d   : > { %1581 = vmatmul.bf16.gmra.mxu2 %v3667_v16  ;;  %v1539_v42 = vpop.f32.mrf.mxu1 }
 0x13e   : > { %v1753_v21 = vmax.f32 %v1466_v39, 0.0  ;;  %v4152_v20 = vadd.f32 %v1539_v42, %v1507_v46 }
 0x140   : > { %1614 = vmatmul.bf16.gmra.mxu3 %v3669_v17  ;;  %v1769_v44 = vpack.c.bf16 %v1753_v21, %v1751_v33  ;;  %v1435_v47 = vpop.f32.mrf.mxu2  ;;  %v1415_v21 = vadd.f32 %v4038_v15, %v4094_v62  ;;  %v2948_v62 = vld [vmem:[%s4316_s3 + $0x78] sm:$0xff] }
 0x141   : > { %v1436_v1 = vadd.f32 %v1435_v47, %v4002_v5  ;;  %1944 = vmatpush.bf16.msra.mxu1 %v2948_v62 }
 0x142   : > { %1919 = vmatmul.bf16.vlgmr.msra.gmra.mxu0 %v1769_v44  ;;  %v4154_v28 = vpop.f32.mrf.mxu0 }
 0x143   : > { %v1468_v48 = vpop.f32.mrf.mxu3 }
 0x144   : > { %v1469_v3 = vadd.f32 %v1468_v48, %v1436_v1 }
 0x145   : > { %v4157_v50 = vpop.f32.mrf.mxu1 }
 0x146   : > { %v1755_v56 = vmax.f32 %v1469_v3, 0.0 }
 0x148   : > { %v1437_v49 = vpop.f32.mrf.mxu2 }
 0x149   : > { %v1438_v35 = vadd.f32 %v1437_v49, %v4022_v24 }
 0x14a   : > { %v1511_v18 = vpop.f32.mrf.mxu0 }
 0x14b   : > { %v1470_v16 = vpop.f32.mrf.mxu3  ;;  %v1512_v54 = vadd.f32 %v1511_v18, %v4086_v13 }
 0x14c   : > { %v1471_v17 = vadd.f32 %v1470_v16, %v1438_v35 }
 0x14d   : > { %1693 = vmatmul.bf16.vlgmr.msra.gmra.mxu2 %v3702_v38  ;;  %v1544_v40 = vpop.f32.mrf.mxu1 }
 0x14e   : > { %v1757_v57 = vmax.f32 %v1471_v17, 0.0  ;;  %v4163_v5 = vadd.f32 %v1544_v40, %v1512_v54 }
 0x150   : > { %1726 = vmatmul.bf16.vlgmr.msra.gmra.mxu3 %v3707_v41  ;;  %v1771_v55 = vpack.c.bf16 %v1757_v57, %v1755_v56  ;;  %v1440_v11 = vpop.f32.mrf.mxu2 }
 0x151   : > { %v1441_v45 = vadd.f32 %v1440_v11, %v4040_v6 }
 0x152   : > { %1924 = vmatmul.bf16.gmra.mxu0 %v1771_v55  ;;  %v1513_v26 = vpop.f32.mrf.mxu0 }
 0x153   : > { %v1473_v58 = vpop.f32.mrf.mxu3  ;;  %v1514_v24 = vadd.f32 %v1513_v26, %v4086_v13 }
 0x154   : > { %v1474_v8 = vadd.f32 %v1473_v58, %v1441_v45  ;;  %v1499_v45 = vadd.f32 %v4117_v10, %v4086_v13 }
 0x155   : > { %v1546_v27 = vpop.f32.mrf.mxu1 }
 0x156   : > { %v4167_v59 = vadd.f32 %v1546_v27, %v1514_v24  ;;  %v1759_v25 = vmax.f32 %v1474_v8, 0.0 }
 0x158   : > { %v1442_v29 = vpop.f32.mrf.mxu2 }
 0x159   : > { %v1443_v38 = vadd.f32 %v1442_v29, %v4066_v61  ;;  %v2946_v29 = vld [vmem:[%s4316_s3 + $0x68] sm:$0xff] }
 0x15a   : > { %v1516_v7 = vpop.f32.mrf.mxu0 }
 0x15b   : > { %v1475_v41 = vpop.f32.mrf.mxu3  ;;  %v1517_v22 = vadd.f32 %v1516_v7, %v4086_v13 }
 0x15c   : > { %v1476_v63 = vadd.f32 %v1475_v41, %v1443_v38 }
 0x15d   : > { %1698 = vmatmul.bf16.gmra.mxu2 %v3769_v51  ;;  %v1549_v36 = vpop.f32.mrf.mxu1 }
 0x15e   : > { %v1761_v19 = vmax.f32 %v1476_v63, 0.0  ;;  %v4173_v37 = vadd.f32 %v1549_v36, %v1517_v22  ;;  %v2945_v36 = vld [vmem:[%s4316_s3 + $0x60] sm:$0xff] }
 0x160   : > { %1731 = vmatmul.bf16.gmra.mxu3 %v3771_v53  ;;  %v1773_v6 = vpack.c.bf16 %v1761_v19, %v1759_v25  ;;  %v1445_v30 = vpop.f32.mrf.mxu2 }
 0x161   : > { %v1446_v61 = vadd.f32 %v1445_v30, %v4083_v9 }
 0x162   : > { %1929 = vmatmul.bf16.gmra.mxu0 %v1773_v6  ;;  %v1518_v46 = vpop.f32.mrf.mxu0 }
 0x163   : > { %v1478_v39 = vpop.f32.mrf.mxu3  ;;  %v1504_v46 = vadd.f32 %v4143_v43, %v4086_v13 }
 0x164   : > { %v1479_v44 = vadd.f32 %v1478_v39, %v1446_v61 }
 0x165   : > { %v1551_v33 = vpop.f32.mrf.mxu1 }
 0x166   : > { %v1763_v1 = vmax.f32 %v1479_v44, 0.0 }
 0x168   : > { %v1447_v42 = vpop.f32.mrf.mxu2 }
 0x169   : > { %v1448_v47 = vadd.f32 %v1447_v42, %v1415_v21 }
 0x16a   : > { %v1628_v48 = vpop.f32.mrf.mxu0 }
 0x16b   : > { %v1480_v51 = vpop.f32.mrf.mxu3 }
 0x16c   : > { %v1481_v53 = vadd.f32 %v1480_v51, %v1448_v47 }
 0x16d   : > { %1703 = vmatmul.bf16.gmra.mxu2 %v3832_v14  ;;  %v1661_v3 = vpop.f32.mrf.mxu1 }
 0x16e   : > { %v1765_v49 = vmax.f32 %v1481_v53, 0.0 }
 0x170   : > { %1736 = vmatmul.bf16.gmra.mxu3 %v3837_v4  ;;  %v1775_v35 = vpack.c.bf16 %v1765_v49, %v1763_v1  ;;  %v1450_v16 = vpop.f32.mrf.mxu2  ;;  %v2947_v4 = vld [vmem:[%s4316_s3 + $0x70] sm:$0xff] }
 0x171   : > { %v1451_v15 = vadd.f32 %v1450_v16, %v4134_v52  ;;  %1945 = vmatpush.bf16.msra.mxu1 %v2947_v4  ;;  %v1509_v16 = vadd.f32 %v4154_v28, %v4086_v13 }
 0x172   : > { %1934 = vmatmul.bf16.gmra.mxu0 %v1775_v35  ;;  %v1630_v18 = vpop.f32.mrf.mxu0 }
 0x173   : > { %v1483_v9 = vpop.f32.mrf.mxu3 }
 0x174   : > { %v1484_v54 = vadd.f32 %v1483_v9, %v1451_v15 }
 0x175   : > { %v1663_v17 = vpop.f32.mrf.mxu1  ;;  %1946 = vmatpush.bf16.msra.mxu1 %v2946_v29  ;;  %v2941_v29 = vld [vmem:[%s4316_s3 + $0x40] sm:$0xff] }
 0x176   : > { %v1767_v40 = vmax.f32 %v1484_v54, 0.0 }
 0x178   : > { %v1452_v56 = vpop.f32.mrf.mxu2  ;;  %v1777_v55 = vpack.c.bf16 %v1767_v40, %v1767_v40 }
 0x179   : > { %1947 = vmatpush.bf16.msra.mxu1 %v2945_v36 }
 0x17a   : > { %v1633_v14 = vpop.f32.mrf.mxu0 }
 0x17b   : > { %v1485_v57 = vpop.f32.mrf.mxu3 }
 0x17d   : > { %1708 = vmatmul.bf16.gmra.mxu2 %v3914_v0  ;;  %v1666_v52 = vpop.f32.mrf.mxu1 }
 0x180   : > { %1741 = vmatmul.bf16.gmra.mxu3 %v3916_v2  ;;  %v1562_v11 = vpop.f32.mrf.mxu2  ;;  %v1532_v2 = vadd.f32 %v4129_v12, %v1499_v45 }
 0x181   : > { %v1563_v58 = vadd.f32 %v1562_v11, %v4101_v34 }
 0x182   : > { %1939 = vmatmul.bf16.gmra.mxu0 %v1777_v55  ;;  %v1635_v24 = vpop.f32.mrf.mxu0 }
 0x183   : > { %v1595_v26 = vpop.f32.mrf.mxu3 }
 0x184   : > { %v1596_v27 = vadd.f32 %v1595_v26, %v1563_v58 }
 0x185   : > { %v1668_v8 = vpop.f32.mrf.mxu1 }
 0x186   : > { %v1629_v0 = vadd.f32 %v1628_v48, %v1596_v27 }
 0x188   : > { %v4196_v38 = vadd.f32 %v1661_v3, %v1629_v0  ;;  %v1564_v41 = vpop.f32.mrf.mxu2 }
 0x189   : > { %v1565_v34 = vadd.f32 %v1564_v41, %v1532_v2 }
 0x18a   : > { %v1638_v63 = vpop.f32.mrf.mxu0 }
 0x18b   : > { %v1597_v7 = vpop.f32.mrf.mxu3 }
 0x18c   : > { %v1598_v22 = vadd.f32 %v1597_v7, %v1565_v34 }
 0x18d   : > { %1713 = vmatmul.bf16.gmra.mxu2 %v3969_v32  ;;  %v1671_v25 = vpop.f32.mrf.mxu1 }
 0x18e   : > { %v1631_v10 = vadd.f32 %v1630_v18, %v1598_v22  ;;  %v2943_v18 = vld [vmem:[%s4316_s3 + $0x50] sm:$0xff] }
 0x190   : > { %1746 = vmatmul.bf16.gmra.mxu3 %v3971_v23  ;;  %v4200_v19 = vadd.f32 %v1663_v17, %v1631_v10  ;;  %v1567_v12 = vpop.f32.mrf.mxu2  ;;  %v1537_v23 = vadd.f32 %v4146_v31, %v1504_v46  ;;  %v1542_v17 = vadd.f32 %v4157_v50, %v1509_v16 }
 0x191   : > { %v1568_v6 = vadd.f32 %v1567_v12, %v4140_v60  ;;  %v2944_v60 = vld [vmem:[%s4316_s3 + $0x58] sm:$0xff] }
 0x192   : > { %v1640_v39 = vpop.f32.mrf.mxu0  ;;  %1948 = vmatpush.bf16.msra.mxu1 %v2944_v60 }
 0x193   : > { %v1600_v30 = vpop.f32.mrf.mxu3 }
 0x194   : > { %v1601_v32 = vadd.f32 %v1600_v30, %v1568_v6 }
 0x195   : > { %v1673_v33 = vpop.f32.mrf.mxu1 }
 0x196   : > { %v1634_v61 = vadd.f32 %v1633_v14, %v1601_v32  ;;  %1949 = vmatpush.bf16.msra.mxu1 %v2943_v18  ;;  %v2942_v14 = vld [vmem:[%s4316_s3 + $0x48] sm:$0xff] }
 0x198   : > { %v4209_v21 = vadd.f32 %v1666_v52, %v1634_v61  ;;  %v1569_v42 = vpop.f32.mrf.mxu2 }
 0x199   : > { %v1570_v44 = vadd.f32 %v1569_v42, %v1537_v23 }
 0x19a   : > { %v1643_v51 = vpop.f32.mrf.mxu0  ;;  %1950 = vmatpush.bf16.msra.mxu1 %v2942_v14 }
 0x19b   : > { %v1602_v47 = vpop.f32.mrf.mxu3 }
 0x19c   : > { %v1603_v48 = vadd.f32 %v1602_v47, %v1570_v44 }
 0x19d   : > { %v1676_v1 = vpop.f32.mrf.mxu1 }
 0x19e   : > { %v1636_v53 = vadd.f32 %v1635_v24, %v1603_v48  ;;  %1951 = vmatpush.bf16.msra.mxu1 %v2941_v29 }
 0x1a0   : > { %v4214_v43 = vadd.f32 %v1668_v8, %v1636_v53  ;;  %v1572_v49 = vpop.f32.mrf.mxu2 }
 0x1a1   : > { %v1573_v3 = vadd.f32 %v1572_v49, %v4152_v20 }
 0x1a2   : > { %v1645_v35 = vpop.f32.mrf.mxu0 }
 0x1a3   : > { %v1605_v31 = vpop.f32.mrf.mxu3 }
 0x1a4   : > { %v1606_v9 = vadd.f32 %v1605_v31, %v1573_v3 }
 0x1a5   : > { %v1678_v62 = vpop.f32.mrf.mxu1 }
 0x1a6   : > { %v1639_v15 = vadd.f32 %v1638_v63, %v1606_v9 }
 0x1a8   : > { %v4223_v54 = vadd.f32 %v1671_v25, %v1639_v15  ;;  %v1574_v56 = vpop.f32.mrf.mxu2 }
 0x1a9   : > { %v1575_v57 = vadd.f32 %v1574_v56, %v1542_v17 }
 0x1aa   : > { %v1648_v13 = vpop.f32.mrf.mxu0 }
 0x1ab   : > { %v1607_v20 = vpop.f32.mrf.mxu3 }
 0x1ac   : > { %v1608_v28 = vadd.f32 %v1607_v20, %v1575_v57 }
 0x1ad   : > { %v1681_v4 = vpop.f32.mrf.mxu1 }
 0x1ae   : > { %v1641_v40 = vadd.f32 %v1640_v39, %v1608_v28 }
 0x1b0   : > { %v1674_v52 = vadd.f32 %v1673_v33, %v1641_v40  ;;  %v1577_v55 = vpop.f32.mrf.mxu2 }
 0x1b1   : > { %v1578_v11 = vadd.f32 %v1577_v55, %v4163_v5 }
 0x1b2   : > { %v1650_v50 = vpop.f32.mrf.mxu0 }
 0x1b3   : > { %v1610_v58 = vpop.f32.mrf.mxu3 }
 0x1b4   : > { %v1611_v26 = vadd.f32 %v1610_v58, %v1578_v11 }
 0x1b5   : > { %v1683_v45 = vpop.f32.mrf.mxu1 }
 0x1b6   : > { %v1644_v24 = vadd.f32 %v1643_v51, %v1611_v26 }
 0x1b8   : > { %v4229_v27 = vadd.f32 %v1676_v1, %v1644_v24  ;;  %v1579_v0 = vpop.f32.mrf.mxu2 }
 0x1b9   : > { %v1580_v8 = vadd.f32 %v1579_v0, %v4167_v59 }
 0x1bb   : > { %v1612_v2 = vpop.f32.mrf.mxu3 }
 0x1bc   : > { %v1613_v41 = vadd.f32 %v1612_v2, %v1580_v8 }
 0x1be   : > { %v1646_v34 = vadd.f32 %v1645_v35, %v1613_v41 }
 0x1bf   : > { %v4235_v7 = vpop.f32.mrf.mxu0 }
 0x1c0   : > { %v1679_v5 = vadd.f32 %v1678_v62, %v1646_v34  ;;  %v1582_v63 = vpop.f32.mrf.mxu2 }
 0x1c1   : > { %v1583_v22 = vadd.f32 %v1582_v63, %v4173_v37 }
 0x1c3   : > { %v1615_v10 = vpop.f32.mrf.mxu3 }
 0x1c4   : > { %v1616_v25 = vadd.f32 %v1615_v10, %v1583_v22 }
 0x1c6   : > { %v1649_v36 = vadd.f32 %v1648_v13, %v1616_v25 }
 0x1c7   : > { %v4238_v12 = vpop.f32.mrf.mxu0 }
 0x1c8   : > { %v4240_v6 = vadd.f32 %v1681_v4, %v1649_v36  ;;  %v1584_v30 = vpop.f32.mrf.mxu2 }
 0x1cb   : > { %v1617_v39 = vpop.f32.mrf.mxu3 }
 0x1cf   : > { %v4242_v59 = vpop.f32.mrf.mxu0 }
 0x1d0   : > { %v1694_v46 = vpop.f32.mrf.mxu2 }
 0x1d1   : > { %v1695_v61 = vadd.f32 %v1694_v46, %v4196_v38 }
 0x1d3   : > { %v1727_v32 = vpop.f32.mrf.mxu3 }
 0x1d4   : > { %v1728_v42 = vadd.f32 %v1727_v32, %v1695_v61 }
 0x1d6   : > { %v1752_v51 = vmax.f32 %v1728_v42, 0.0 }
 0x1d7   : > { %v4245_v33 = vpop.f32.mrf.mxu0 }
 0x1d8   : > { %v1696_v23 = vpop.f32.mrf.mxu2 }
 0x1d9   : > { %v1697_v37 = vadd.f32 %v1696_v23, %v4200_v19 }
 0x1db   : > { %v1729_v44 = vpop.f32.mrf.mxu3 }
 0x1dc   : > { %v1730_v47 = vadd.f32 %v1729_v44, %v1697_v37 }
 0x1de   : > { %v1754_v48 = vmax.f32 %v1730_v47, 0.0 }
 0x1df   : > { %v4248_v60 = vpop.f32.mrf.mxu0 }
 0x1e0   : > { %v1770_v53 = vpack.c.bf16 %v1754_v48, %v1752_v51  ;;  %v1699_v1 = vpop.f32.mrf.mxu2 }
 0x1e1   : > { %v1700_v3 = vadd.f32 %v1699_v1, %v4209_v21 }
 0x1e2   : > { %1952 = vmatmul.bf16.vlgmr.msra.gmra.mxu1 %v1770_v53 }
 0x1e3   : > { %v1732_v49 = vpop.f32.mrf.mxu3 }
 0x1e4   : > { %v1733_v35 = vadd.f32 %v1732_v49, %v1700_v3 }
 0x1e6   : > { %v1756_v18 = vmax.f32 %v1733_v35, 0.0 }
 0x1e7   : > { %v4251_v31 = vpop.f32.mrf.mxu0 }
 0x1e8   : > { %v1701_v38 = vpop.f32.mrf.mxu2 }
 0x1e9   : > { %v1702_v16 = vadd.f32 %v1701_v38, %v4214_v43  ;;  %v4262_v43 = vld [vmem:[%s4317_s4] ss:$0 sm:$0xff] }
 0x1ea   : > { %v1923_v37 = vadd.f32 %v4262_v43, %v4238_v12  ;;  %v1926_v48 = vadd.f32 %v4262_v43, %v4242_v59  ;;  %v1928_v12 = vadd.f32 %v4262_v43, %v4245_v33  ;;  %v1931_v59 = vadd.f32 %v4262_v43, %v4248_v60 }
 0x1eb   : > { %v1734_v9 = vpop.f32.mrf.mxu3  ;;  %v1933_v33 = vadd.f32 %v4262_v43, %v4251_v31 }
 0x1ec   : > { %v1735_v19 = vadd.f32 %v1734_v9, %v1702_v16 }
 0x1ee   : > { %v1758_v15 = vmax.f32 %v1735_v19, 0.0 }
 0x1ef   : > { %v4254_v62 = vpop.f32.mrf.mxu0 }
 0x1f0   : > { %v1772_v17 = vpack.c.bf16 %v1758_v15, %v1756_v18  ;;  %v1704_v56 = vpop.f32.mrf.mxu2  ;;  %v1936_v60 = vadd.f32 %v4262_v43, %v4254_v62 }
 0x1f1   : > { %v1705_v20 = vadd.f32 %v1704_v56, %v4223_v54 }
 0x1f2   : > { %1957 = vmatmul.bf16.gmra.mxu1 %v1772_v17 }
 0x1f3   : > { %v1737_v57 = vpop.f32.mrf.mxu3 }
 0x1f4   : > { %v1738_v13 = vadd.f32 %v1737_v57, %v1705_v20 }
 0x1f6   : > { %v1760_v55 = vmax.f32 %v1738_v13, 0.0 }
 0x1f7   : > { %v4257_v14 = vpop.f32.mrf.mxu0 }
 0x1f8   : > { %v1706_v21 = vpop.f32.mrf.mxu2  ;;  %v1938_v31 = vadd.f32 %v4262_v43, %v4257_v14 }
 0x1f9   : > { %v1707_v28 = vadd.f32 %v1706_v21, %v1674_v52 }
 0x1fb   : > { %v1739_v40 = vpop.f32.mrf.mxu3 }
 0x1fc   : > { %v1740_v4 = vadd.f32 %v1739_v40, %v1707_v28 }
 0x1fe   : > { %v1762_v11 = vmax.f32 %v1740_v4, 0.0 }
 0x1ff   : > { %v1940_v58 = vpop.f32.mrf.mxu0 }
 0x200   : > { %v1774_v50 = vpack.c.bf16 %v1762_v11, %v1760_v55  ;;  %v4265_v26 = vadd.f32 %v4262_v43, %v1940_v58  ;;  %v1709_v54 = vpop.f32.mrf.mxu2 }
 0x201   : > { %v1710_v45 = vadd.f32 %v1709_v54, %v4229_v27 }
 0x202   : > { %1962 = vmatmul.bf16.gmra.mxu1 %v1774_v50 }
 0x203   : > { %v1742_v24 = vpop.f32.mrf.mxu3 }
 0x204   : > { %v1743_v0 = vadd.f32 %v1742_v24, %v1710_v45 }
 0x206   : > { %v1764_v34 = vmax.f32 %v1743_v0, 0.0 }
 0x207   : > { %v1942_v52 = vpop.f32.mrf.mxu0 }
 0x208   : > { %v1711_v29 = vpop.f32.mrf.mxu2 }
 0x209   : > { %v1712_v8 = vadd.f32 %v1711_v29, %v1679_v5  ;;  %v1921_v5 = vadd.f32 %v4262_v43, %v4235_v7 }
 0x20b   : > { %v1744_v2 = vpop.f32.mrf.mxu3 }
 0x20c   : > { %v1745_v41 = vadd.f32 %v1744_v2, %v1712_v8 }
 0x20e   : > { %v1766_v63 = vmax.f32 %v1745_v41, 0.0 }
 0x210   : > { %v1776_v22 = vpack.c.bf16 %v1766_v63, %v1764_v34  ;;  %v1714_v10 = vpop.f32.mrf.mxu2 }
 0x211   : > { %v1715_v36 = vadd.f32 %v1714_v10, %v4240_v6 }
 0x212   : > { %1967 = vmatmul.bf16.gmra.mxu1 %v1776_v22 }
 0x213   : > { %v1747_v25 = vpop.f32.mrf.mxu3 }
 0x214   : > { %v1748_v30 = vadd.f32 %v1747_v25, %v1715_v36 }
 0x216   : > { %v1768_v32 = vmax.f32 %v1748_v30, 0.0 }
 0x218   : > { %v1716_v39 = vpop.f32.mrf.mxu2  ;;  %v1778_v27 = vpack.c.bf16 %v1768_v32, %v1768_v32 }
 0x21b   : > { %v1749_v46 = vpop.f32.mrf.mxu3 }
 0x222   : > { %1972 = vmatmul.bf16.gmra.mxu1 %v1778_v27 }
 0x25f   : > { %v1953_v61 = vpop.f32.mrf.mxu1 }
 0x260   : > { %v1954_v23 = vadd.f32 %v1953_v61, %v1921_v5 }
 0x262   : > { %v1977_v42 = vmax.f32 %v1954_v23, 0.0 }
 0x264   : > { %v1986_v6 = vpack.c.bf16 %v1977_v42, %v1977_v42 }
 0x266   : > { %1996 = vst.msk [vmem:[%s4275_s15] sm:$0xf] %vm1995_vm0, %v1986_v6 }
 0x267   : > { %v1955_v7 = vpop.f32.mrf.mxu1 }
 0x268   : > { %v1956_v44 = vadd.f32 %v1955_v7, %v1923_v37 }
 0x26a   : > { %v1978_v47 = vmax.f32 %v1956_v44, 0.0 }
 0x26c   : > { %v1987_v51 = vpack.c.bf16 %v1978_v47, %v1978_v47 }
 0x26e   : > { %1997 = vst.msk [vmem:[%s4275_s15 + $0x4] sm:$0xf] %vm1995_vm0, %v1987_v51 }
 0x26f   : > { %v1958_v53 = vpop.f32.mrf.mxu1 }
 0x270   : > { %v1959_v1 = vadd.f32 %v1958_v53, %v1926_v48 }
 0x272   : > { %v1979_v49 = vmax.f32 %v1959_v1, 0.0 }
 0x274   : > { %v1988_v3 = vpack.c.bf16 %v1979_v49, %v1979_v49 }
 0x276   : > { %1998 = vst.msk [vmem:[%s4275_s15 + $0x8] sm:$0xf] %vm1995_vm0, %v1988_v3 }
 0x277   : > { %v1960_v38 = vpop.f32.mrf.mxu1 }
 0x278   : > { %v1961_v35 = vadd.f32 %v1960_v38, %v1928_v12 }
 0x27a   : > { %v1980_v16 = vmax.f32 %v1961_v35, 0.0 }
 0x27c   : > { %v1989_v9 = vpack.c.bf16 %v1980_v16, %v1980_v16 }
 0x27e   : > { %1999 = vst.msk [vmem:[%s4275_s15 + $0xc] sm:$0xf] %vm1995_vm0, %v1989_v9 }
 0x27f   : > { %v1963_v19 = vpop.f32.mrf.mxu1 }
 0x280   : > { %v1964_v18 = vadd.f32 %v1963_v19, %v1931_v59 }
 0x282   : > { %v1981_v15 = vmax.f32 %v1964_v18, 0.0 }
 0x284   : > { %v1990_v17 = vpack.c.bf16 %v1981_v15, %v1981_v15 }
 0x286   : > { %2000 = vst.msk [vmem:[%s4275_s15 + $0x10] sm:$0xf] %vm1995_vm0, %v1990_v17 }
 0x287   : > { %v1965_v56 = vpop.f32.mrf.mxu1 }
 0x288   : > { %v1966_v57 = vadd.f32 %v1965_v56, %v1933_v33 }
 0x28a   : > { %v1982_v20 = vmax.f32 %v1966_v57, 0.0 }
 0x28c   : > { %v1991_v21 = vpack.c.bf16 %v1982_v20, %v1982_v20 }
 0x28e   : > { %2001 = vst.msk [vmem:[%s4275_s15 + $0x14] sm:$0xf] %vm1995_vm0, %v1991_v21 }
 0x28f   : > { %v1968_v13 = vpop.f32.mrf.mxu1 }
 0x290   : > { %v1969_v28 = vadd.f32 %v1968_v13, %v1936_v60 }
 0x292   : > { %v1983_v40 = vmax.f32 %v1969_v28, 0.0 }
 0x294   : > { %v1992_v4 = vpack.c.bf16 %v1983_v40, %v1983_v40 }
 0x296   : > { %2002 = vst.msk [vmem:[%s4275_s15 + $0x18] sm:$0xf] %vm1995_vm0, %v1992_v4 }
 0x297   : > { %v1970_v55 = vpop.f32.mrf.mxu1 }
 0x298   : > { %v1971_v11 = vadd.f32 %v1970_v55, %v1938_v31 }
 0x29a   : > { %v1984_v58 = vmax.f32 %v1971_v11, 0.0 }
 0x29c   : > { %v1993_v50 = vpack.c.bf16 %v1984_v58, %v1984_v58 }
 0x29e   : > { %2003 = vst.msk [vmem:[%s4275_s15 + $0x1c] sm:$0xf] %vm1995_vm0, %v1993_v50 }
 0x29f   : > { %v1973_v54 = vpop.f32.mrf.mxu1 }
 0x2a0   : > { %v1974_v62 = vadd.f32 %v1973_v54, %v4265_v26 }
 0x2a2   : > { %v1985_v24 = vmax.f32 %v1974_v62, 0.0 }
 0x2a4   : > { %v1994_v45 = vpack.c.bf16 %v1985_v24, %v1985_v24 }
 0x2a6   : > { %2004 = vst.msk [vmem:[%s4275_s15 + $0x20] sm:$0xf] %vm1995_vm0, %v1994_v45 }
 0x2a7   : > { %v1975_v52 = vpop.f32.mrf.mxu1 }
 0x2a8 PF: > { %s15_s18 = sadd.s32 1, %s2982_s18  }
 0x2a9   : > { %p12_p4 = scmp.ge.s32.totalorder %s15_s18, 4  }
 0x2ab   :  { %14 = sbr.rel (!%p12_p4) target bundleno = 1 (0x1), region = 70 }

// kernel: dqn_forward.3
= control target key start
LH: loop header
LB: loop body
LE: loop exit
PB: predicated region body
PF: predicated region fallthrough
CT: control target
= control target key end

     0   :  { %s5917_s0 = inlined_call_operand.vmem [shape: bf16[2,2304], index: 0, kind: input, shape index: {}]   ;;  %s5918_s1 = inlined_call_operand.vmem [shape: bf16[2304,256], index: 1, kind: input, shape index: {}]   ;;  %s5919_s2 = inlined_call_operand.vmem [shape: f32[1,256], index: 2, kind: input, shape index: {}]   ;;  %s5920_s3 = inlined_call_operand.vmem [shape: bf16[256,128], index: 3, kind: input, shape index: {}]   ;;  %s5921_s4 = inlined_call_operand.vmem [shape: f32[1,128], index: 4, kind: input, shape index: {}]   ;;  %s5922_s5 = inlined_call_operand.hbm [shape: f32[2,128], index: 5, kind: output, shape index: {}]  }
   0x1   :  { %v2505_v0 = vld [vmem:[%s5918_s1 + $0x70] sm:$0xf]  ;;  %v3678_v1 = vld [vmem:[%s5918_s1 + $0x74] sm:$0xf0]  ;;  %v2497_v11 = vld [vmem:[%s5918_s1 + $0x60] sm:$0xf] }
   0x2   :  { %v2569_v2 = vld [vmem:[%s5918_s1 + $0xf0] sm:$0xf]  ;;  %v2506_v3 = vor.u32 %v3678_v1, %v2505_v0  ;;  %v3694_v4 = vld [vmem:[%s5918_s1 + $0xf4] sm:$0xf0]  ;;  %v3676_v13 = vld [vmem:[%s5918_s1 + $0x64] sm:$0xf0] }
   0x3   :  { %v2633_v5 = vld [vmem:[%s5918_s1 + $0x170] sm:$0xf]  ;;  %v3710_v6 = vld [vmem:[%s5918_s1 + $0x174] sm:$0xf0]  ;;  %v2570_v7 = vor.u32 %v3694_v4, %v2569_v2  ;;  %v2561_v14 = vld [vmem:[%s5918_s1 + $0xe0] sm:$0xf]  ;;  %v2498_v16 = vor.u32 %v3676_v13, %v2497_v11 }
   0x4   :  { %v2634_v8 = vor.u32 %v3710_v6, %v2633_v5  ;;  %v2697_v9 = vld [vmem:[%s5918_s1 + $0x1f0] sm:$0xf]  ;;  %v3726_v10 = vld [vmem:[%s5918_s1 + $0x1f4] sm:$0xf0]  ;;  %1800 = vmatpush.bf16.msra.mxu0 %v2506_v3  ;;  %v3692_v15 = vld [vmem:[%s5918_s1 + $0xe4] sm:$0xf0] }
   0x5   :  { %v2698_v12 = vor.u32 %v3726_v10, %v2697_v9  ;;  %1813 = vmatpush.bf16.msra.mxu1 %v2570_v7  ;;  %v2562_v17 = vor.u32 %v3692_v15, %v2561_v14  ;;  %v2625_v18 = vld [vmem:[%s5918_s1 + $0x160] sm:$0xf]  ;;  %v3708_v19 = vld [vmem:[%s5918_s1 + $0x164] sm:$0xf0]  ;;  %v2489_v23 = vld [vmem:[%s5918_s1 + $0x50] sm:$0xf] }
   0x6   :  { %1826 = vmatpush.bf16.msra.mxu2 %v2634_v8  ;;  %v2689_v20 = vld [vmem:[%s5918_s1 + $0x1e0] sm:$0xf]  ;;  %v2626_v21 = vor.u32 %v3708_v19, %v2625_v18  ;;  %v3724_v22 = vld [vmem:[%s5918_s1 + $0x1e4] sm:$0xf0]  ;;  %v3674_v24 = vld [vmem:[%s5918_s1 + $0x54] sm:$0xf0] }
   0x7   :  { %1839 = vmatpush.bf16.msra.mxu3 %v2698_v12  ;;  %v2690_v25 = vor.u32 %v3724_v22, %v2689_v20  ;;  %v2553_v26 = vld [vmem:[%s5918_s1 + $0xd0] sm:$0xf]  ;;  %v3690_v27 = vld [vmem:[%s5918_s1 + $0xd4] sm:$0xf0]  ;;  %v2490_v29 = vor.u32 %v3674_v24, %v2489_v23  ;;  %v2481_v35 = vld [vmem:[%s5918_s1 + $0x40] sm:$0xf] }
   0x8   :  { %v2617_v28 = vld [vmem:[%s5918_s1 + $0x150] sm:$0xf]  ;;  %1801 = vmatpush.bf16.msra.mxu0 %v2498_v16  ;;  %v3706_v30 = vld [vmem:[%s5918_s1 + $0x154] sm:$0xf0]  ;;  %v2554_v33 = vor.u32 %v3690_v27, %v2553_v26  ;;  %v3672_v36 = vld [vmem:[%s5918_s1 + $0x44] sm:$0xf0] }
   0x9   :  { %v2681_v31 = vld [vmem:[%s5918_s1 + $0x1d0] sm:$0xf]  ;;  %v3722_v32 = vld [vmem:[%s5918_s1 + $0x1d4] sm:$0xf0]  ;;  %1814 = vmatpush.bf16.msra.mxu1 %v2562_v17  ;;  %v2618_v34 = vor.u32 %v3706_v30, %v2617_v28  ;;  %v2545_v37 = vld [vmem:[%s5918_s1 + $0xc0] sm:$0xf]  ;;  %v2482_v44 = vor.u32 %v3672_v36, %v2481_v35 }
   0xa   :  { %1827 = vmatpush.bf16.msra.mxu2 %v2626_v21  ;;  %v2682_v38 = vor.u32 %v3722_v32, %v2681_v31  ;;  %v3688_v39 = vld [vmem:[%s5918_s1 + $0xc4] sm:$0xf0]  ;;  %v2609_v40 = vld [vmem:[%s5918_s1 + $0x140] sm:$0xf]  ;;  %v2473_v47 = vld [vmem:[%s5918_s1 + $0x30] sm:$0xf] }
   0xb   :  { %1840 = vmatpush.bf16.msra.mxu3 %v2690_v25  ;;  %v3704_v41 = vld [vmem:[%s5918_s1 + $0x144] sm:$0xf0]  ;;  %v2673_v42 = vld [vmem:[%s5918_s1 + $0x1c0] sm:$0xf]  ;;  %v2546_v45 = vor.u32 %v3688_v39, %v2545_v37  ;;  %v3670_v48 = vld [vmem:[%s5918_s1 + $0x34] sm:$0xf0] }
   0xc   :  { %v3720_v43 = vld [vmem:[%s5918_s1 + $0x1c4] sm:$0xf0]  ;;  %1802 = vmatpush.bf16.msra.mxu0 %v2490_v29  ;;  %v2610_v46 = vor.u32 %v3704_v41, %v2609_v40  ;;  %v2537_v49 = vld [vmem:[%s5918_s1 + $0xb0] sm:$0xf]  ;;  %v3686_v51 = vld [vmem:[%s5918_s1 + $0xb4] sm:$0xf0]  ;;  %v2474_v56 = vor.u32 %v3670_v48, %v2473_v47 }
   0xd   :  { %1815 = vmatpush.bf16.msra.mxu1 %v2554_v33  ;;  %v2674_v50 = vor.u32 %v3720_v43, %v2673_v42  ;;  %v2601_v52 = vld [vmem:[%s5918_s1 + $0x130] sm:$0xf]  ;;  %v3702_v53 = vld [vmem:[%s5918_s1 + $0x134] sm:$0xf0]  ;;  %v2538_v57 = vor.u32 %v3686_v51, %v2537_v49  ;;  %v2465_v59 = vld [vmem:[%s5918_s1 + $0x20] sm:$0xf] }
   0xe   :  { %1828 = vmatpush.bf16.msra.mxu2 %v2618_v34  ;;  %v2665_v54 = vld [vmem:[%s5918_s1 + $0x1b0] sm:$0xf]  ;;  %v3718_v55 = vld [vmem:[%s5918_s1 + $0x1b4] sm:$0xf0]  ;;  %v2602_v58 = vor.u32 %v3702_v53, %v2601_v52  ;;  %v3668_v60 = vld [vmem:[%s5918_s1 + $0x24] sm:$0xf0] }
   0xf   :  { %1841 = vmatpush.bf16.msra.mxu3 %v2682_v38  ;;  %v2529_v61 = vld [vmem:[%s5918_s1 + $0xa0] sm:$0xf]  ;;  %v2666_v62 = vor.u32 %v3718_v55, %v2665_v54  ;;  %v3684_v63 = vld [vmem:[%s5918_s1 + $0xa4] sm:$0xf0]  ;;  %v2466_v4 = vor.u32 %v3668_v60, %v2465_v59  ;;  %v2457_v7 = vld [vmem:[%s5918_s1 + $0x10] sm:$0xf] }
  0x10   :  { %1803 = vmatpush.bf16.msra.mxu0 %v2482_v44  ;;  %v2593_v0 = vld [vmem:[%s5918_s1 + $0x120] sm:$0xf]  ;;  %v3700_v1 = vld [vmem:[%s5918_s1 + $0x124] sm:$0xf0]  ;;  %v2530_v5 = vor.u32 %v3684_v63, %v2529_v61  ;;  %v3666_v8 = vld [vmem:[%s5918_s1 + $0x14] sm:$0xf0] }
  0x11   :  { %1816 = vmatpush.bf16.msra.mxu1 %v2546_v45  ;;  %v2657_v2 = vld [vmem:[%s5918_s1 + $0x1a0] sm:$0xf]  ;;  %v3716_v3 = vld [vmem:[%s5918_s1 + $0x1a4] sm:$0xf0]  ;;  %v2594_v6 = vor.u32 %v3700_v1, %v2593_v0  ;;  %v2521_v9 = vld [vmem:[%s5918_s1 + $0x90] sm:$0xf]  ;;  %v2458_v16 = vor.u32 %v3666_v8, %v2457_v7 }
  0x12   :  { %1829 = vmatpush.bf16.msra.mxu2 %v2610_v46  ;;  %v2658_v10 = vor.u32 %v3716_v3, %v2657_v2  ;;  %v3682_v11 = vld [vmem:[%s5918_s1 + $0x94] sm:$0xf0]  ;;  %v2585_v12 = vld [vmem:[%s5918_s1 + $0x110] sm:$0xf]  ;;  %v2449_v17 = vld [vmem:[%s5918_s1] sm:$0xf] }
  0x13   :  { %1842 = vmatpush.bf16.msra.mxu3 %v2674_v50  ;;  %v3698_v13 = vld [vmem:[%s5918_s1 + $0x114] sm:$0xf0]  ;;  %v2649_v14 = vld [vmem:[%s5918_s1 + $0x190] sm:$0xf]  ;;  %v3664_v18 = vld [vmem:[%s5918_s1 + $0x4] sm:$0xf0]  ;;  %v2522_v19 = vor.u32 %v3682_v11, %v2521_v9 }
  0x14   :  { %1804 = vmatpush.bf16.msra.mxu0 %v2474_v56  ;;  %v3714_v15 = vld [vmem:[%s5918_s1 + $0x194] sm:$0xf0]  ;;  %v2586_v20 = vor.u32 %v3698_v13, %v2585_v12  ;;  %v2513_v21 = vld [vmem:[%s5918_s1 + $0x80] sm:$0xf]  ;;  %v3680_v22 = vld [vmem:[%s5918_s1 + $0x84] sm:$0xf0]  ;;  %v2450_v31 = vor.u32 %v3664_v18, %v2449_v17 }
  0x15   :  { %1817 = vmatpush.bf16.msra.mxu1 %v2538_v57  ;;  %v2577_v23 = vld [vmem:[%s5918_s1 + $0x100] sm:$0xf]  ;;  %v2650_v24 = vor.u32 %v3714_v15, %v2649_v14  ;;  %v3696_v25 = vld [vmem:[%s5918_s1 + $0x104] sm:$0xf0]  ;;  %v2761_v28 = vld [vmem:[%s5918_s1 + $0x270] sm:$0xf]  ;;  %v2514_v35 = vor.u32 %v3680_v22, %v2513_v21 }
  0x16   :  { %1830 = vmatpush.bf16.msra.mxu2 %v2602_v58  ;;  %v2641_v26 = vld [vmem:[%s5918_s1 + $0x180] sm:$0xf]  ;;  %v3712_v27 = vld [vmem:[%s5918_s1 + $0x184] sm:$0xf0]  ;;  %v3742_v29 = vld [vmem:[%s5918_s1 + $0x274] sm:$0xf0]  ;;  %v2578_v36 = vor.u32 %v3696_v25, %v2577_v23 }
  0x17   :  { %1843 = vmatpush.bf16.msra.mxu3 %v2666_v62  ;;  %v2825_v30 = vld [vmem:[%s5918_s1 + $0x2f0] sm:$0xf]  ;;  %v3758_v32 = vld [vmem:[%s5918_s1 + $0x2f4] sm:$0xf0]  ;;  %v2642_v39 = vor.u32 %v3712_v27, %v2641_v26  ;;  %v2762_v40 = vor.u32 %v3742_v29, %v2761_v28  ;;  %v2753_v43 = vld [vmem:[%s5918_s1 + $0x260] sm:$0xf] }
  0x18   :  { %1805 = vmatpush.bf16.msra.mxu0 %v2466_v4  ;;  %v2889_v33 = vld [vmem:[%s5918_s1 + $0x370] sm:$0xf]  ;;  %v3774_v34 = vld [vmem:[%s5918_s1 + $0x374] sm:$0xf0]  ;;  %v2826_v41 = vor.u32 %v3758_v32, %v2825_v30  ;;  %v3740_v44 = vld [vmem:[%s5918_s1 + $0x264] sm:$0xf0] }
  0x19   :  { %1818 = vmatpush.bf16.msra.mxu1 %v2530_v5  ;;  %v2953_v37 = vld [vmem:[%s5918_s1 + $0x3f0] sm:$0xf]  ;;  %v3790_v38 = vld [vmem:[%s5918_s1 + $0x3f4] sm:$0xf0]  ;;  %v2890_v42 = vor.u32 %v3774_v34, %v2889_v33  ;;  %v2817_v45 = vld [vmem:[%s5918_s1 + $0x2e0] sm:$0xf]  ;;  %v2754_v52 = vor.u32 %v3740_v44, %v2753_v43 }
  0x1a   :  { %1831 = vmatpush.bf16.msra.mxu2 %v2594_v6  ;;  %v2954_v46 = vor.u32 %v3790_v38, %v2953_v37  ;;  %v3756_v47 = vld [vmem:[%s5918_s1 + $0x2e4] sm:$0xf0]  ;;  %v2881_v48 = vld [vmem:[%s5918_s1 + $0x360] sm:$0xf]  ;;  %v2745_v55 = vld [vmem:[%s5918_s1 + $0x250] sm:$0xf] }
  0x1b   :  { %1844 = vmatpush.bf16.msra.mxu3 %v2658_v10  ;;  %v3772_v49 = vld [vmem:[%s5918_s1 + $0x364] sm:$0xf0]  ;;  %v2945_v50 = vld [vmem:[%s5918_s1 + $0x3e0] sm:$0xf]  ;;  %v2818_v53 = vor.u32 %v3756_v47, %v2817_v45  ;;  %v3738_v56 = vld [vmem:[%s5918_s1 + $0x254] sm:$0xf0] }
  0x1c   :  { %1806 = vmatpush.bf16.msra.mxu0 %v2458_v16  ;;  %v3788_v51 = vld [vmem:[%s5918_s1 + $0x3e4] sm:$0xf0]  ;;  %v2882_v54 = vor.u32 %v3772_v49, %v2881_v48  ;;  %v2809_v57 = vld [vmem:[%s5918_s1 + $0x2d0] sm:$0xf]  ;;  %v3754_v59 = vld [vmem:[%s5918_s1 + $0x2d4] sm:$0xf0]  ;;  %v2746_v0 = vor.u32 %v3738_v56, %v2745_v55 }
  0x1d   :  { %1819 = vmatpush.bf16.msra.mxu1 %v2522_v19  ;;  %v2946_v58 = vor.u32 %v3788_v51, %v2945_v50  ;;  %v2873_v60 = vld [vmem:[%s5918_s1 + $0x350] sm:$0xf]  ;;  %v3770_v61 = vld [vmem:[%s5918_s1 + $0x354] sm:$0xf0]  ;;  %v2737_v1 = vld [vmem:[%s5918_s1 + $0x240] sm:$0xf]  ;;  %v2810_v3 = vor.u32 %v3754_v59, %v2809_v57 }
  0x1e   :  { %1832 = vmatpush.bf16.msra.mxu2 %v2586_v20  ;;  %v2937_v62 = vld [vmem:[%s5918_s1 + $0x3d0] sm:$0xf]  ;;  %v3786_v63 = vld [vmem:[%s5918_s1 + $0x3d4] sm:$0xf0]  ;;  %v21_v2 = vld [vmem:[%s5917_s0] sm:$0xff]  ;;  %v2874_v4 = vor.u32 %v3770_v61, %v2873_v60 }
  0x1f   :  { %1845 = vmatpush.bf16.msra.mxu3 %v2650_v24  ;;  %v3736_v5 = vld [vmem:[%s5918_s1 + $0x244] sm:$0xf0]  ;;  %v2801_v6 = vld [vmem:[%s5918_s1 + $0x2c0] sm:$0xf]  ;;  %319 = vst [vmem:[#allocation1] ss:$9 sm:$0xff] %v21_v2  ;;  %v2938_v7 = vor.u32 %v3786_v63, %v2937_v62 }
  0x20   :  { %1807 = vmatpush.bf16.msra.mxu0 %v2450_v31  ;;  %v3752_v8 = vld [vmem:[%s5918_s1 + $0x2c4] sm:$0xf0]  ;;  %v2865_v9 = vld [vmem:[%s5918_s1 + $0x340] sm:$0xf]  ;;  %v2738_v13 = vor.u32 %v3736_v5, %v2737_v1  ;;  %v2729_v16 = vld [vmem:[%s5918_s1 + $0x230] sm:$0xf] }
  0x21   :  { %1820 = vmatpush.bf16.msra.mxu1 %v2514_v35  ;;  %v3768_v10 = vld [vmem:[%s5918_s1 + $0x344] sm:$0xf0]  ;;  %v2929_v11 = vld [vmem:[%s5918_s1 + $0x3c0] sm:$0xf]  ;;  %v2802_v14 = vor.u32 %v3752_v8, %v2801_v6  ;;  %v3734_v17 = vld [vmem:[%s5918_s1 + $0x234] sm:$0xf0] }
  0x22   :  { %1833 = vmatpush.bf16.msra.mxu2 %v2578_v36  ;;  %v3784_v12 = vld [vmem:[%s5918_s1 + $0x3c4] sm:$0xf0]  ;;  %v2866_v15 = vor.u32 %v3768_v10, %v2865_v9  ;;  %v2793_v18 = vld [vmem:[%s5918_s1 + $0x2b0] sm:$0xf]  ;;  %v3750_v20 = vld [vmem:[%s5918_s1 + $0x2b4] sm:$0xf0]  ;;  %v2730_v26 = vor.u32 %v3734_v17, %v2729_v16 }
  0x23   :  { %1846 = vmatpush.bf16.msra.mxu3 %v2642_v39  ;;  %v2930_v19 = vor.u32 %v3784_v12, %v2929_v11  ;;  %v2857_v21 = vld [vmem:[%s5918_s1 + $0x330] sm:$0xf]  ;;  %v3766_v22 = vld [vmem:[%s5918_s1 + $0x334] sm:$0xf0]  ;;  %v2721_v25 = vld [vmem:[%s5918_s1 + $0x220] sm:$0xf]  ;;  %v2794_v30 = vor.u32 %v3750_v20, %v2793_v18 }
  0x24   :  { %1852 = vmatpush.bf16.msrb.mxu0 %v2762_v40  ;;  %v2921_v23 = vld [vmem:[%s5918_s1 + $0x3b0] sm:$0xf]  ;;  %v3782_v24 = vld [vmem:[%s5918_s1 + $0x3b4] sm:$0xf0]  ;;  %v2858_v31 = vor.u32 %v3766_v22, %v2857_v21  ;;  %v3732_v32 = vld [vmem:[%s5918_s1 + $0x224] sm:$0xf0] }
  0x25   :  { %1865 = vmatpush.bf16.msrb.mxu1 %v2826_v41  ;;  %v2785_v33 = vld [vmem:[%s5918_s1 + $0x2a0] sm:$0xf]  ;;  %v2922_v35 = vor.u32 %v3782_v24, %v2921_v23  ;;  %v3748_v36 = vld [vmem:[%s5918_s1 + $0x2a4] sm:$0xf0]  ;;  %v2722_v41 = vor.u32 %v3732_v32, %v2721_v25  ;;  %v3730_v45 = vld [vmem:[%s5918_s1 + $0x214] sm:$0xf0] }
  0x26   :  { %1878 = vmatpush.bf16.msrb.mxu2 %v2890_v42  ;;  %v4346_v27 = vld [vmem:[#allocation1 + $0x12] sm:$0xff]  ;;  %v4348_v28 = vld [vmem:[#allocation1] sm:$0xff]  ;;  %v4358_v34 = vld [vmem:[#allocation1 + $0x9] sm:$0xff]  ;;  %v2786_v43 = vor.u32 %v3748_v36, %v2785_v33 }
  0x27   :  { %1891 = vmatpush.bf16.msrb.mxu3 %v2954_v46  ;;  %v4350_v29 = vld [vmem:[#allocation1 + $0x1b] sm:$0xff]  ;;  %v3764_v38 = vld [vmem:[%s5918_s1 + $0x324] sm:$0xf0]  ;;  %1834 = vmatmul.bf16.vlgmr.msra.gmra.mxu2 %v4346_v27  ;;  %v2713_v42 = vld [vmem:[%s5918_s1 + $0x210] sm:$0xf] }
  0x28   :  { %1853 = vmatpush.bf16.msrb.mxu0 %v2754_v52  ;;  %v2849_v37 = vld [vmem:[%s5918_s1 + $0x320] sm:$0xf]  ;;  %v3780_v40 = vld [vmem:[%s5918_s1 + $0x3a4] sm:$0xf0]  ;;  %1847 = vmatmul.bf16.vlgmr.msra.gmra.mxu3 %v4350_v29  ;;  %v2777_v46 = vld [vmem:[%s5918_s1 + $0x290] sm:$0xf]  ;;  %v2714_v55 = vor.u32 %v3730_v45, %v2713_v42 }
  0x29   :  { %1866 = vmatpush.bf16.msrb.mxu1 %v2818_v53  ;;  %v2913_v39 = vld [vmem:[%s5918_s1 + $0x3a0] sm:$0xf]  ;;  %1808 = vmatmul.bf16.vlgmr.msra.gmra.mxu0 %v4348_v28  ;;  %v2850_v44 = vor.u32 %v3764_v38, %v2849_v37  ;;  %v3746_v47 = vld [vmem:[%s5918_s1 + $0x294] sm:$0xf0]  ;;  %v2841_v49 = vld [vmem:[%s5918_s1 + $0x310] sm:$0xf] }
  0x2a   :  { %1879 = vmatpush.bf16.msrb.mxu2 %v2882_v54  ;;  %1821 = vmatmul.bf16.vlgmr.msra.gmra.mxu1 %v4358_v34  ;;  %v2914_v48 = vor.u32 %v3780_v40, %v2913_v39  ;;  %v3762_v50 = vld [vmem:[%s5918_s1 + $0x314] sm:$0xf0]  ;;  %v2905_v51 = vld [vmem:[%s5918_s1 + $0x390] sm:$0xf]  ;;  %v2705_v53 = vld [vmem:[%s5918_s1 + $0x200] sm:$0xf]  ;;  %v2778_v62 = vor.u32 %v3746_v47, %v2777_v46 }
  0x2b   :  { %1892 = vmatpush.bf16.msrb.mxu3 %v2946_v58  ;;  %v3778_v52 = vld [vmem:[%s5918_s1 + $0x394] sm:$0xf0]  ;;  %v3728_v54 = vld [vmem:[%s5918_s1 + $0x204] sm:$0xf0]  ;;  %v2769_v56 = vld [vmem:[%s5918_s1 + $0x280] sm:$0xf]  ;;  %v2842_v63 = vor.u32 %v3762_v50, %v2841_v49 }
  0x2c   :  { %1854 = vmatpush.bf16.msrb.mxu0 %v2746_v0  ;;  %v3744_v57 = vld [vmem:[%s5918_s1 + $0x284] sm:$0xf0]  ;;  %v2833_v58 = vld [vmem:[%s5918_s1 + $0x300] sm:$0xf]  ;;  %v4421_v60 = vld [vmem:[#allocation1 + $0x36] sm:$0xff]  ;;  %v2706_v9 = vor.u32 %v3728_v54, %v2705_v53 }
  0x2d   :  { %1867 = vmatpush.bf16.msrb.mxu1 %v2810_v3  ;;  %v3760_v59 = vld [vmem:[%s5918_s1 + $0x304] sm:$0xf0]  ;;  %v4428_v1 = vld [vmem:[#allocation1 + $0x3f] sm:$0xff]  ;;  %v4430_v2 = vld [vmem:[#allocation1 + $0x2d] sm:$0xff]  ;;  %v2906_v3 = vor.u32 %v3778_v52, %v2905_v51 }
  0x2e   :  { %1880 = vmatpush.bf16.msrb.mxu2 %v2874_v4  ;;  %v22_v61 = vld [vmem:[%s5917_s0 + $0x8] sm:$0xff]  ;;  %v2897_v4 = vld [vmem:[%s5918_s1 + $0x380] sm:$0xf]  ;;  %v3017_v6 = vld [vmem:[%s5918_s1 + $0x470] sm:$0xf] }
  0x2f   :  { %1893 = vmatpush.bf16.msrb.mxu3 %v2938_v7  ;;  %v4426_v0 = vld [vmem:[#allocation1 + $0x24] sm:$0xff]  ;;  %v3806_v7 = vld [vmem:[%s5918_s1 + $0x474] sm:$0xf0]  ;;  %v3081_v8 = vld [vmem:[%s5918_s1 + $0x4f0] sm:$0xf] }
  0x30   :  { %1855 = vmatpush.bf16.msrb.mxu0 %v2738_v13  ;;  %v3776_v5 = vld [vmem:[%s5918_s1 + $0x384] sm:$0xf0]  ;;  %329 = vst [vmem:[#allocation1] ss:$9 sm:$0xff] %v22_v61  ;;  %v3822_v10 = vld [vmem:[%s5918_s1 + $0x4f4] sm:$0xf0]  ;;  %v2770_v13 = vor.u32 %v3744_v57, %v2769_v56  ;;  %v3018_v18 = vor.u32 %v3806_v7, %v3017_v6 }
  0x31   :  { %1868 = vmatpush.bf16.msrb.mxu1 %v2802_v14  ;;  %v3145_v11 = vld [vmem:[%s5918_s1 + $0x570] sm:$0xf]  ;;  %v3838_v12 = vld [vmem:[%s5918_s1 + $0x574] sm:$0xf0]  ;;  %v2834_v14 = vor.u32 %v3760_v59, %v2833_v58  ;;  %v2898_v17 = vor.u32 %v3776_v5, %v2897_v4  ;;  %v3009_v21 = vld [vmem:[%s5918_s1 + $0x460] sm:$0xf] }
  0x32   :  { %1881 = vmatpush.bf16.msrb.mxu2 %v2866_v15  ;;  %v3209_v15 = vld [vmem:[%s5918_s1 + $0x5f0] sm:$0xf]  ;;  %v3854_v16 = vld [vmem:[%s5918_s1 + $0x5f4] sm:$0xf0]  ;;  %v3146_v20 = vor.u32 %v3838_v12, %v3145_v11  ;;  %v3804_v22 = vld [vmem:[%s5918_s1 + $0x464] sm:$0xf0] }
  0x33   :  { %1894 = vmatpush.bf16.msrb.mxu3 %v2930_v19  ;;  %v3082_v19 = vor.u32 %v3822_v10, %v3081_v8  ;;  %v3073_v23 = vld [vmem:[%s5918_s1 + $0x4e0] sm:$0xf]  ;;  %v3210_v24 = vor.u32 %v3854_v16, %v3209_v15  ;;  %v3820_v25 = vld [vmem:[%s5918_s1 + $0x4e4] sm:$0xf0]  ;;  %v3010_v33 = vor.u32 %v3804_v22, %v3009_v21  ;;  %v3001_v37 = vld [vmem:[%s5918_s1 + $0x450] sm:$0xf] }
  0x34   :  { %1856 = vmatpush.bf16.msrb.mxu0 %v2730_v26  ;;  %v3137_v26 = vld [vmem:[%s5918_s1 + $0x560] sm:$0xf]  ;;  %v3852_v32 = vld [vmem:[%s5918_s1 + $0x5e4] sm:$0xf0]  ;;  %v3802_v38 = vld [vmem:[%s5918_s1 + $0x454] sm:$0xf0] }
  0x35   :  { %1869 = vmatpush.bf16.msrb.mxu1 %v2794_v30  ;;  %v3836_v30 = vld [vmem:[%s5918_s1 + $0x564] sm:$0xf0]  ;;  %v3065_v39 = vld [vmem:[%s5918_s1 + $0x4d0] sm:$0xf]  ;;  %v3850_v45 = vld [vmem:[%s5918_s1 + $0x5d4] sm:$0xf0]  ;;  %v3002_v46 = vor.u32 %v3802_v38, %v3001_v37 }
  0x36   :  { %1882 = vmatpush.bf16.msrb.mxu2 %v2858_v31  ;;  %v3201_v31 = vld [vmem:[%s5918_s1 + $0x5e0] sm:$0xf]  ;;  %v3138_v36 = vor.u32 %v3836_v30, %v3137_v26  ;;  %v3129_v42 = vld [vmem:[%s5918_s1 + $0x550] sm:$0xf]  ;;  %v3800_v50 = vld [vmem:[%s5918_s1 + $0x444] sm:$0xf0] }
  0x37   :  { %1895 = vmatpush.bf16.msrb.mxu3 %v2922_v35  ;;  %v3074_v35 = vor.u32 %v3820_v25, %v3073_v23  ;;  %v3202_v40 = vor.u32 %v3852_v32, %v3201_v31  ;;  %v2993_v49 = vld [vmem:[%s5918_s1 + $0x440] sm:$0xf]  ;;  %v3816_v53 = vld [vmem:[%s5918_s1 + $0x4c4] sm:$0xf0]  ;;  %v3814_v5 = vld [vmem:[%s5918_s1 + $0x4b4] sm:$0xf0] }
  0x38   :  { %1857 = vmatpush.bf16.msrb.mxu0 %v2722_v41  ;;  %v3818_v41 = vld [vmem:[%s5918_s1 + $0x4d4] sm:$0xf0]  ;;  %v3057_v51 = vld [vmem:[%s5918_s1 + $0x4c0] sm:$0xf]  ;;  %v3848_v57 = vld [vmem:[%s5918_s1 + $0x5c4] sm:$0xf0]  ;;  %v2994_v58 = vor.u32 %v3800_v50, %v2993_v49 }
  0x39   :  { %1870 = vmatpush.bf16.msrb.mxu1 %v2786_v43  ;;  %v3834_v43 = vld [vmem:[%s5918_s1 + $0x554] sm:$0xf0]  ;;  %v3066_v47 = vor.u32 %v3818_v41, %v3065_v39  ;;  %v3121_v54 = vld [vmem:[%s5918_s1 + $0x540] sm:$0xf]  ;;  %v3058_v59 = vor.u32 %v3816_v53, %v3057_v51  ;;  %v3113_v6 = vld [vmem:[%s5918_s1 + $0x530] sm:$0xf] }
  0x3a   :  { %1883 = vmatpush.bf16.msrb.mxu2 %v2850_v44  ;;  %v3193_v44 = vld [vmem:[%s5918_s1 + $0x5d0] sm:$0xf]  ;;  %v3185_v56 = vld [vmem:[%s5918_s1 + $0x5c0] sm:$0xf]  ;;  %v3830_v7 = vld [vmem:[%s5918_s1 + $0x534] sm:$0xf0] }
  0x3b   :  { %1896 = vmatpush.bf16.msrb.mxu3 %v2914_v48  ;;  %v3130_v48 = vor.u32 %v3834_v43, %v3129_v42  ;;  %v3194_v52 = vor.u32 %v3850_v45, %v3193_v44  ;;  %v3186_v4 = vor.u32 %v3848_v57, %v3185_v56  ;;  %v3177_v8 = vld [vmem:[%s5918_s1 + $0x5b0] sm:$0xf]  ;;  %v3114_v12 = vor.u32 %v3830_v7, %v3113_v6  ;;  %v3041_v15 = vld [vmem:[%s5918_s1 + $0x4a0] sm:$0xf]  ;;  %v3844_v21 = vld [vmem:[%s5918_s1 + $0x5a4] sm:$0xf0] }
  0x3c   :  { %1858 = vmatpush.bf16.msrb.mxu0 %v2714_v55  ;;  %v3832_v55 = vld [vmem:[%s5918_s1 + $0x544] sm:$0xf0]  ;;  %v2969_v25 = vld [vmem:[%s5918_s1 + $0x410] sm:$0xf]  ;;  %v3794_v26 = vld [vmem:[%s5918_s1 + $0x414] sm:$0xf0] }
  0x3d   :  { %1871 = vmatpush.bf16.msrb.mxu1 %v2778_v62  ;;  %v3122_v61 = vor.u32 %v3832_v55, %v3121_v54  ;;  %v2985_v62 = vld [vmem:[%s5918_s1 + $0x430] sm:$0xf]  ;;  %v3810_v32 = vld [vmem:[%s5918_s1 + $0x494] sm:$0xf0]  ;;  %v2970_v38 = vor.u32 %v3794_v26, %v2969_v25  ;;  %v2961_v39 = vld [vmem:[%s5918_s1 + $0x400] sm:$0xf] }
  0x3e   :  { %1884 = vmatpush.bf16.msrb.mxu2 %v2842_v63  ;;  %v3798_v63 = vld [vmem:[%s5918_s1 + $0x434] sm:$0xf0]  ;;  %v3033_v30 = vld [vmem:[%s5918_s1 + $0x490] sm:$0xf]  ;;  %v3025_v43 = vld [vmem:[%s5918_s1 + $0x480] sm:$0xf] }
  0x3f   :  { %1897 = vmatpush.bf16.msrb.mxu3 %v2906_v3  ;;  %v3049_v3 = vld [vmem:[%s5918_s1 + $0x4b0] sm:$0xf]  ;;  %v2986_v10 = vor.u32 %v3798_v63, %v2985_v62  ;;  %v3842_v37 = vld [vmem:[%s5918_s1 + $0x594] sm:$0xf0]  ;;  %v3034_v41 = vor.u32 %v3810_v32, %v3033_v30  ;;  %v3808_v44 = vld [vmem:[%s5918_s1 + $0x484] sm:$0xf0] }
  0x40   :  { %1859 = vmatpush.bf16.msrb.mxu0 %v2706_v9  ;;  %v3846_v9 = vld [vmem:[%s5918_s1 + $0x5b4] sm:$0xf0]  ;;  %v3050_v11 = vor.u32 %v3814_v5, %v3049_v3  ;;  %v3089_v45 = vld [vmem:[%s5918_s1 + $0x500] sm:$0xf]  ;;  %v3840_v49 = vld [vmem:[%s5918_s1 + $0x584] sm:$0xf0]  ;;  %v3026_v57 = vor.u32 %v3808_v44, %v3025_v43 }
  0x41   :  { %1872 = vmatpush.bf16.msrb.mxu1 %v2770_v13  ;;  %v2977_v13 = vld [vmem:[%s5918_s1 + $0x420] sm:$0xf]  ;;  %v3178_v16 = vor.u32 %v3846_v9, %v3177_v8  ;;  %v3273_v50 = vld [vmem:[%s5918_s1 + $0x670] sm:$0xf]  ;;  %v3870_v51 = vld [vmem:[%s5918_s1 + $0x674] sm:$0xf0] }
  0x42   :  { %1885 = vmatpush.bf16.msrb.mxu2 %v2834_v14  ;;  %v3796_v14 = vld [vmem:[%s5918_s1 + $0x424] sm:$0xf0]  ;;  %v3886_v54 = vld [vmem:[%s5918_s1 + $0x6f4] sm:$0xf0]  ;;  %v3401_v55 = vld [vmem:[%s5918_s1 + $0x770] sm:$0xf]  ;;  %v3274_v63 = vor.u32 %v3870_v51, %v3273_v50 }
  0x43   :  { %1898 = vmatpush.bf16.msrb.mxu3 %v2898_v17  ;;  %1860 = vmatmul.bf16.vlgmr.msrb.gmra.mxu0 %v4426_v0  ;;  %v3812_v17 = vld [vmem:[%s5918_s1 + $0x4a4] sm:$0xf0]  ;;  %v2978_v22 = vor.u32 %v3796_v14, %v2977_v13  ;;  %v3902_v56 = vld [vmem:[%s5918_s1 + $0x774] sm:$0xf0]  ;;  %v3265_v5 = vld [vmem:[%s5918_s1 + $0x660] sm:$0xf] }
  0x44   :  { %1904 = vmatpush.bf16.msra.mxu0 %v3018_v18  ;;  %1873 = vmatmul.bf16.vlgmr.msrb.gmra.mxu1 %v4430_v2  ;;  %v3105_v18 = vld [vmem:[%s5918_s1 + $0x520] sm:$0xf]  ;;  %v3042_v23 = vor.u32 %v3812_v17, %v3041_v15  ;;  %v3868_v6 = vld [vmem:[%s5918_s1 + $0x664] sm:$0xf0]  ;;  %v4684_v15 = vld [vmem:[#allocation1 + $0x12] sm:$0xff] }
  0x45   :  { %1917 = vmatpush.bf16.msra.mxu1 %v3082_v19  ;;  %1886 = vmatmul.bf16.vlgmr.msrb.gmra.mxu2 %v4421_v60  ;;  %v3828_v19 = vld [vmem:[%s5918_s1 + $0x524] sm:$0xf0]  ;;  %v3329_v7 = vld [vmem:[%s5918_s1 + $0x6e0] sm:$0xf]  ;;  %v3882_v25 = vld [vmem:[%s5918_s1 + $0x6d4] sm:$0xf0] }
  0x46   :  { %1930 = vmatpush.bf16.msra.mxu2 %v3146_v20  ;;  %1899 = vmatmul.bf16.vlgmr.msrb.gmra.mxu3 %v4428_v1  ;;  %v3169_v20 = vld [vmem:[%s5918_s1 + $0x5a0] sm:$0xf]  ;;  %v3884_v9 = vld [vmem:[%s5918_s1 + $0x6e4] sm:$0xf0]  ;;  %v3385_v26 = vld [vmem:[%s5918_s1 + $0x750] sm:$0xf] }
  0x47   :  { %1943 = vmatpush.bf16.msra.mxu3 %v3210_v24  ;;  %v3106_v24 = vor.u32 %v3828_v19, %v3105_v18  ;;  %v3170_v31 = vor.u32 %v3844_v21, %v3169_v20  ;;  %v3457_v13 = vld [vmem:[%s5918_s1 + $0x7e0] sm:$0xf]  ;;  %v3916_v14 = vld [vmem:[%s5918_s1 + $0x7e4] sm:$0xf0]  ;;  %v3266_v18 = vor.u32 %v3868_v6, %v3265_v5  ;;  %v3330_v19 = vor.u32 %v3884_v9, %v3329_v7  ;;  %v3257_v21 = vld [vmem:[%s5918_s1 + $0x650] sm:$0xf] }
  0x48   :  { %1905 = vmatpush.bf16.msra.mxu0 %v3010_v33  ;;  %v3097_v33 = vld [vmem:[%s5918_s1 + $0x510] sm:$0xf]  ;;  %v4688_v17 = vld [vmem:[#allocation1 + $0x1b] sm:$0xff]  ;;  %v3896_v43 = vld [vmem:[%s5918_s1 + $0x744] sm:$0xf0] }
  0x49   :  { %1918 = vmatpush.bf16.msra.mxu1 %v3074_v35  ;;  %v3826_v35 = vld [vmem:[%s5918_s1 + $0x514] sm:$0xf0]  ;;  %v3441_v44 = vld [vmem:[%s5918_s1 + $0x7c0] sm:$0xf] }
  0x4a   :  { %1931 = vmatpush.bf16.msra.mxu2 %v3138_v36  ;;  %v3161_v36 = vld [vmem:[%s5918_s1 + $0x590] sm:$0xf]  ;;  %v3098_v42 = vor.u32 %v3826_v35, %v3097_v33  ;;  %v3898_v30 = vld [vmem:[%s5918_s1 + $0x754] sm:$0xf0]  ;;  %v3249_v35 = vld [vmem:[%s5918_s1 + $0x640] sm:$0xf] }
  0x4b   :  { %1944 = vmatpush.bf16.msra.mxu3 %v3202_v40  ;;  %v3792_v40 = vld [vmem:[%s5918_s1 + $0x404] sm:$0xf0]  ;;  %v3914_v32 = vld [vmem:[%s5918_s1 + $0x7d4] sm:$0xf0] }
  0x4c   :  { %1906 = vmatpush.bf16.msra.mxu0 %v3002_v46  ;;  %v3162_v46 = vor.u32 %v3842_v37, %v3161_v36  ;;  %v2962_v53 = vor.u32 %v3792_v40, %v2961_v39  ;;  %v3386_v37 = vor.u32 %v3898_v30, %v3385_v26  ;;  %v3313_v39 = vld [vmem:[%s5918_s1 + $0x6c0] sm:$0xf]  ;;  %v3880_v40 = vld [vmem:[%s5918_s1 + $0x6c4] sm:$0xf0] }
  0x4d   :  { %1919 = vmatpush.bf16.msra.mxu1 %v3066_v47  ;;  %v3824_v47 = vld [vmem:[%s5918_s1 + $0x504] sm:$0xf0] }
  0x4e   :  { %1932 = vmatpush.bf16.msra.mxu2 %v3130_v48  ;;  %v3153_v48 = vld [vmem:[%s5918_s1 + $0x580] sm:$0xf] }
  0x4f   :  { %1945 = vmatpush.bf16.msra.mxu3 %v3194_v52  ;;  %v3337_v52 = vld [vmem:[%s5918_s1 + $0x6f0] sm:$0xf]  ;;  %v3154_v62 = vor.u32 %v3840_v49, %v3153_v48 }
  0x50   :  { %1907 = vmatpush.bf16.msra.mxu0 %v2994_v58  ;;  %v3090_v58 = vor.u32 %v3824_v47, %v3089_v45  ;;  %v3338_v3 = vor.u32 %v3886_v54, %v3337_v52  ;;  %v3912_v45 = vld [vmem:[%s5918_s1 + $0x7c4] sm:$0xf0] }
  0x51   :  { %1920 = vmatpush.bf16.msra.mxu1 %v3058_v59  ;;  %v3465_v59 = vld [vmem:[%s5918_s1 + $0x7f0] sm:$0xf] }
  0x52   :  { %1933 = vmatpush.bf16.msra.mxu2 %v3122_v61  ;;  %v3918_v61 = vld [vmem:[%s5918_s1 + $0x7f4] sm:$0xf0] }
  0x53   :  { %1946 = vmatpush.bf16.msra.mxu3 %v3186_v4  ;;  %v3402_v4 = vor.u32 %v3902_v56, %v3401_v55  ;;  %v3466_v8 = vor.u32 %v3918_v61, %v3465_v59 }
  0x54   :  { %1908 = vmatpush.bf16.msra.mxu0 %v2986_v10  ;;  %v3393_v10 = vld [vmem:[%s5918_s1 + $0x760] sm:$0xf] }
  0x55   :  { %1921 = vmatpush.bf16.msra.mxu1 %v3050_v11  ;;  %v3900_v11 = vld [vmem:[%s5918_s1 + $0x764] sm:$0xf0] }
  0x56   :  { %1934 = vmatpush.bf16.msra.mxu2 %v3114_v12  ;;  %v4676_v12 = vld [vmem:[#allocation1] sm:$0xff]  ;;  %v3394_v20 = vor.u32 %v3900_v11, %v3393_v10 }
  0x57   :  { %1947 = vmatpush.bf16.msra.mxu3 %v3178_v16  ;;  %v4686_v16 = vld [vmem:[#allocation1 + $0x9] sm:$0xff] }
  0x58   :  { %1909 = vmatpush.bf16.msra.mxu0 %v2978_v22  ;;  %v3866_v22 = vld [vmem:[%s5918_s1 + $0x654] sm:$0xf0] }
  0x59   :  { %1922 = vmatpush.bf16.msra.mxu1 %v3042_v23  ;;  %v3321_v23 = vld [vmem:[%s5918_s1 + $0x6d0] sm:$0xf]  ;;  %v3258_v33 = vor.u32 %v3866_v22, %v3257_v21 }
  0x5a   :  { %1935 = vmatpush.bf16.msra.mxu2 %v3106_v24  ;;  %v3458_v24 = vor.u32 %v3916_v14, %v3457_v13  ;;  %v3322_v36 = vor.u32 %v3882_v25, %v3321_v23 }
  0x5b   :  { %1948 = vmatpush.bf16.msra.mxu3 %v3170_v31  ;;  %v3449_v31 = vld [vmem:[%s5918_s1 + $0x7d0] sm:$0xf] }
  0x5c   :  { %1910 = vmatpush.bf16.msra.mxu0 %v2970_v38  ;;  %v3864_v38 = vld [vmem:[%s5918_s1 + $0x644] sm:$0xf0] }
  0x5d   :  { %1923 = vmatpush.bf16.msra.mxu1 %v3034_v41  ;;  %v3450_v41 = vor.u32 %v3914_v32, %v3449_v31 }
  0x5e   :  { %1936 = vmatpush.bf16.msra.mxu2 %v3098_v42  ;;  %v3377_v42 = vld [vmem:[%s5918_s1 + $0x740] sm:$0xf] }
  0x5f   :  { %1949 = vmatpush.bf16.msra.mxu3 %v3162_v46 }
  0x60   :  { %1911 = vmatpush.bf16.msra.mxu0 %v2962_v53 }
  0x61   :  { %1924 = vmatpush.bf16.msra.mxu1 %v3026_v57 }
  0x62   :  { %1937 = vmatpush.bf16.msra.mxu2 %v3090_v58 }
  0x63   :  { %1950 = vmatpush.bf16.msra.mxu3 %v3154_v62  ;;  %1912 = vmatmul.bf16.vlgmr.msra.gmra.mxu0 %v4676_v12 }
  0x64   :  { %1956 = vmatpush.bf16.msrb.mxu0 %v3274_v63  ;;  %1925 = vmatmul.bf16.vlgmr.msra.gmra.mxu1 %v4686_v16 }
  0x65   :  { %1969 = vmatpush.bf16.msrb.mxu1 %v3338_v3  ;;  %1938 = vmatmul.bf16.vlgmr.msra.gmra.mxu2 %v4684_v15 }
  0x66   :  { %1982 = vmatpush.bf16.msrb.mxu2 %v3402_v4  ;;  %1951 = vmatmul.bf16.vlgmr.msra.gmra.mxu3 %v4688_v17 }
  0x67   :  { %1995 = vmatpush.bf16.msrb.mxu3 %v3466_v8 }
  0x68   :  { %1957 = vmatpush.bf16.msrb.mxu0 %v3266_v18 }
  0x69   :  { %1970 = vmatpush.bf16.msrb.mxu1 %v3330_v19 }
  0x6a   :  { %1983 = vmatpush.bf16.msrb.mxu2 %v3394_v20 }
  0x6b   :  { %1996 = vmatpush.bf16.msrb.mxu3 %v3458_v24 }
  0x6c   :  { %10 = vsyncpa [#allocation3], 0  ;;  %1958 = vmatpush.bf16.msrb.mxu0 %v3258_v33  ;;  %v3250_v46 = vor.u32 %v3864_v38, %v3249_v35  ;;  %v3314_v47 = vor.u32 %v3880_v40, %v3313_v39  ;;  %v3378_v48 = vor.u32 %v3896_v43, %v3377_v42  ;;  %v3241_v49 = vld [vmem:[%s5918_s1 + $0x630] sm:$0xf]  ;;  %v3862_v50 = vld [vmem:[%s5918_s1 + $0x634] sm:$0xf0]  ;;  %v3442_v52 = vor.u32 %v3912_v45, %v3441_v44 }
  0x6d   :  { %1971 = vmatpush.bf16.msrb.mxu1 %v3322_v36  ;;  %v3305_v51 = vld [vmem:[%s5918_s1 + $0x6b0] sm:$0xf]  ;;  %v3878_v53 = vld [vmem:[%s5918_s1 + $0x6b4] sm:$0xf0]  ;;  %v3242_v58 = vor.u32 %v3862_v50, %v3241_v49  ;;  %v3233_v62 = vld [vmem:[%s5918_s1 + $0x620] sm:$0xf] }
  0x6e   :  { %1984 = vmatpush.bf16.msrb.mxu2 %v3386_v37  ;;  %v3369_v54 = vld [vmem:[%s5918_s1 + $0x730] sm:$0xf]  ;;  %v3894_v55 = vld [vmem:[%s5918_s1 + $0x734] sm:$0xf0]  ;;  %v3306_v59 = vor.u32 %v3878_v53, %v3305_v51  ;;  %v3860_v63 = vld [vmem:[%s5918_s1 + $0x624] sm:$0xf0] }
  0x6f   :  { %1997 = vmatpush.bf16.msrb.mxu3 %v3450_v41  ;;  %v3433_v56 = vld [vmem:[%s5918_s1 + $0x7b0] sm:$0xf]  ;;  %v3910_v57 = vld [vmem:[%s5918_s1 + $0x7b4] sm:$0xf0]  ;;  %v3370_v61 = vor.u32 %v3894_v55, %v3369_v54  ;;  %v3297_v3 = vld [vmem:[%s5918_s1 + $0x6a0] sm:$0xf]  ;;  %v3234_v10 = vor.u32 %v3860_v63, %v3233_v62 }
  0x70   :  { %1959 = vmatpush.bf16.msrb.mxu0 %v3250_v46  ;;  %v3434_v4 = vor.u32 %v3910_v57, %v3433_v56  ;;  %v3876_v5 = vld [vmem:[%s5918_s1 + $0x6a4] sm:$0xf0]  ;;  %v3361_v6 = vld [vmem:[%s5918_s1 + $0x720] sm:$0xf]  ;;  %v3225_v11 = vld [vmem:[%s5918_s1 + $0x610] sm:$0xf] }
  0x71   :  { %1972 = vmatpush.bf16.msrb.mxu1 %v3314_v47  ;;  %v3892_v7 = vld [vmem:[%s5918_s1 + $0x724] sm:$0xf0]  ;;  %v3425_v8 = vld [vmem:[%s5918_s1 + $0x7a0] sm:$0xf]  ;;  %v3298_v13 = vor.u32 %v3876_v5, %v3297_v3  ;;  %v3858_v18 = vld [vmem:[%s5918_s1 + $0x614] sm:$0xf0] }
  0x72   :  { %1985 = vmatpush.bf16.msrb.mxu2 %v3378_v48  ;;  %v3908_v9 = vld [vmem:[%s5918_s1 + $0x7a4] sm:$0xf0]  ;;  %v3362_v14 = vor.u32 %v3892_v7, %v3361_v6  ;;  %v3289_v19 = vld [vmem:[%s5918_s1 + $0x690] sm:$0xf]  ;;  %v3874_v20 = vld [vmem:[%s5918_s1 + $0x694] sm:$0xf0]  ;;  %v3226_v31 = vor.u32 %v3858_v18, %v3225_v11 }
  0x73   :  { %1998 = vmatpush.bf16.msrb.mxu3 %v3442_v52  ;;  %v3426_v21 = vor.u32 %v3908_v9, %v3425_v8  ;;  %v3353_v22 = vld [vmem:[%s5918_s1 + $0x710] sm:$0xf]  ;;  %v3890_v23 = vld [vmem:[%s5918_s1 + $0x714] sm:$0xf0]  ;;  %v3217_v26 = vld [vmem:[%s5918_s1 + $0x600] sm:$0xf]  ;;  %v3290_v37 = vor.u32 %v3874_v20, %v3289_v19 }
  0x74   :  { %1960 = vmatpush.bf16.msrb.mxu0 %v3242_v58  ;;  %v3417_v24 = vld [vmem:[%s5918_s1 + $0x790] sm:$0xf]  ;;  %v3906_v25 = vld [vmem:[%s5918_s1 + $0x794] sm:$0xf0]  ;;  %v3856_v30 = vld [vmem:[%s5918_s1 + $0x604] sm:$0xf0]  ;;  %v3354_v38 = vor.u32 %v3890_v23, %v3353_v22 }
  0x75   :  { %1973 = vmatpush.bf16.msrb.mxu1 %v3306_v59  ;;  %v3281_v32 = vld [vmem:[%s5918_s1 + $0x680] sm:$0xf]  ;;  %v3872_v33 = vld [vmem:[%s5918_s1 + $0x684] sm:$0xf0]  ;;  %v3529_v41 = vld [vmem:[%s5918_s1 + $0x870] sm:$0xf]  ;;  %v3418_v43 = vor.u32 %v3906_v25, %v3417_v24  ;;  %v3218_v51 = vor.u32 %v3856_v30, %v3217_v26 }
  0x76   :  { %1986 = vmatpush.bf16.msrb.mxu2 %v3370_v61  ;;  %v3345_v35 = vld [vmem:[%s5918_s1 + $0x700] sm:$0xf]  ;;  %v3888_v36 = vld [vmem:[%s5918_s1 + $0x704] sm:$0xf0]  ;;  %v3934_v42 = vld [vmem:[%s5918_s1 + $0x874] sm:$0xf0]  ;;  %v3282_v54 = vor.u32 %v3872_v33, %v3281_v32 }
  0x77   :  { %1999 = vmatpush.bf16.msrb.mxu3 %v3434_v4  ;;  %v3409_v39 = vld [vmem:[%s5918_s1 + $0x780] sm:$0xf]  ;;  %v3904_v40 = vld [vmem:[%s5918_s1 + $0x784] sm:$0xf0]  ;;  %v3593_v44 = vld [vmem:[%s5918_s1 + $0x8f0] sm:$0xf]  ;;  %v3346_v55 = vor.u32 %v3888_v36, %v3345_v35  ;;  %v3530_v59 = vor.u32 %v3934_v42, %v3529_v41 }
  0x78   :  { %1961 = vmatpush.bf16.msrb.mxu0 %v3234_v10  ;;  %v3950_v45 = vld [vmem:[%s5918_s1 + $0x8f4] sm:$0xf0]  ;;  %v4850_v46 = vld [vmem:[#allocation1 + $0x24] sm:$0xff]  ;;  %v4854_v48 = vld [vmem:[#allocation1 + $0x2d] sm:$0xff]  ;;  %v3410_v58 = vor.u32 %v3904_v40, %v3409_v39  ;;  %s3997_s17 = smov [#allocation2]   ;;  %s2438_s21 = sshll.u32 %s5922_s5, 4  ;;  %s2439_s21 = int_to_ptr.hbm [resolvable:$true] %s2438_s21 }
  0x79   :  { %1974 = vmatpush.bf16.msrb.mxu1 %v3298_v13  ;;  %v4852_v47 = vld [vmem:[#allocation1 + $0x36] sm:$0xff]  ;;  %v4856_v49 = vld [vmem:[#allocation1 + $0x3f] sm:$0xff]  ;;  %v23_v50 = vld [vmem:[%s5917_s0 + $0x10] sm:$0x3]  ;;  %v3594_v61 = vor.u32 %v3950_v45, %v3593_v44  ;;  %s2436_s18 = sshll.u32 %s3997_s17, 4  ;;  %s2437_s18 = int_to_ptr.vmem [resolvable:$true] %s2436_s18 }
  0x7a   :  { %1987 = vmatpush.bf16.msrb.mxu2 %v3362_v14  ;;  %v3677_v52 = vld [vmem:[%s5918_s1 + $0x74] sm:$0xf]  ;;  %v2507_v53 = vld [vmem:[%s5918_s1 + $0x78] sm:$0xf0]  ;;  %339 = vst [vmem:[#allocation1] ss:$9 sm:$0xff] %v23_v50 }
  0x7b   :  { %2000 = vmatpush.bf16.msrb.mxu3 %v3426_v21  ;;  %v3693_v56 = vld [vmem:[%s5918_s1 + $0xf4] sm:$0xf]  ;;  %v2571_v57 = vld [vmem:[%s5918_s1 + $0xf8] sm:$0xf0]  ;;  %v2510_v62 = vor.u32 %v3677_v52, %v2507_v53  ;;  %v3521_v63 = vld [vmem:[%s5918_s1 + $0x860] sm:$0xf] }
  0x7c   :  { %1962 = vmatpush.bf16.msrb.mxu0 %v3226_v31  ;;  %v3932_v3 = vld [vmem:[%s5918_s1 + $0x864] sm:$0xf0]  ;;  %v3585_v4 = vld [vmem:[%s5918_s1 + $0x8e0] sm:$0xf]  ;;  %v2574_v5 = vor.u32 %v3693_v56, %v2571_v57  ;;  %v3675_v7 = vld [vmem:[%s5918_s1 + $0x64] sm:$0xf] }
  0x7d   :  { %1975 = vmatpush.bf16.msrb.mxu1 %v3290_v37  ;;  %v3948_v6 = vld [vmem:[%s5918_s1 + $0x8e4] sm:$0xf0]  ;;  %v2499_v8 = vld [vmem:[%s5918_s1 + $0x68] sm:$0xf0]  ;;  %v3691_v9 = vld [vmem:[%s5918_s1 + $0xe4] sm:$0xf]  ;;  %v3522_v11 = vor.u32 %v3932_v3, %v3521_v63 }
  0x7e   :  { %1988 = vmatpush.bf16.msrb.mxu2 %v3354_v38  ;;  %v2563_v10 = vld [vmem:[%s5918_s1 + $0xe8] sm:$0xf0]  ;;  %v3586_v13 = vor.u32 %v3948_v6, %v3585_v4  ;;  %v2502_v14 = vor.u32 %v3675_v7, %v2499_v8  ;;  %v3513_v18 = vld [vmem:[%s5918_s1 + $0x850] sm:$0xf]  ;;  %v3930_v19 = vld [vmem:[%s5918_s1 + $0x854] sm:$0xf0] }
  0x7f   :  { %2001 = vmatpush.bf16.msrb.mxu3 %v3418_v43  ;;  %v3577_v20 = vld [vmem:[%s5918_s1 + $0x8d0] sm:$0xf]  ;;  %v2566_v21 = vor.u32 %v3691_v9, %v2563_v10  ;;  %v3946_v22 = vld [vmem:[%s5918_s1 + $0x8d4] sm:$0xf0]  ;;  %v3673_v23 = vld [vmem:[%s5918_s1 + $0x54] sm:$0xf]  ;;  %v3514_v30 = vor.u32 %v3930_v19, %v3513_v18 }
  0x80   :  { %1963 = vmatpush.bf16.msrb.mxu0 %v3218_v51  ;;  %v2491_v24 = vld [vmem:[%s5918_s1 + $0x58] sm:$0xf0]  ;;  %v3689_v25 = vld [vmem:[%s5918_s1 + $0xd4] sm:$0xf]  ;;  %v3578_v31 = vor.u32 %v3946_v22, %v3577_v20  ;;  %v3505_v33 = vld [vmem:[%s5918_s1 + $0x840] sm:$0xf] }
  0x81   :  { %1976 = vmatpush.bf16.msrb.mxu1 %v3282_v54  ;;  %v2555_v26 = vld [vmem:[%s5918_s1 + $0xd8] sm:$0xf0]  ;;  %v2494_v32 = vor.u32 %v3673_v23, %v2491_v24  ;;  %v3928_v35 = vld [vmem:[%s5918_s1 + $0x844] sm:$0xf0]  ;;  %v3569_v36 = vld [vmem:[%s5918_s1 + $0x8c0] sm:$0xf] }
  0x82   :  { %1989 = vmatpush.bf16.msrb.mxu2 %v3346_v55  ;;  %v2558_v37 = vor.u32 %v3689_v25, %v2555_v26  ;;  %v3944_v38 = vld [vmem:[%s5918_s1 + $0x8c4] sm:$0xf0]  ;;  %v3671_v39 = vld [vmem:[%s5918_s1 + $0x44] sm:$0xf]  ;;  %v2483_v40 = vld [vmem:[%s5918_s1 + $0x48] sm:$0xf0]  ;;  %v3506_v43 = vor.u32 %v3928_v35, %v3505_v33 }
  0x83   :  { %2002 = vmatpush.bf16.msrb.mxu3 %v3410_v58  ;;  %1964 = vmatmul.bf16.vlgmr.msrb.gmra.mxu0 %v4850_v46  ;;  %v3687_v41 = vld [vmem:[%s5918_s1 + $0xc4] sm:$0xf]  ;;  %v2547_v42 = vld [vmem:[%s5918_s1 + $0xc8] sm:$0xf0]  ;;  %v3570_v44 = vor.u32 %v3944_v38, %v3569_v36  ;;  %v2486_v45 = vor.u32 %v3671_v39, %v2483_v40  ;;  %v3497_v50 = vld [vmem:[%s5918_s1 + $0x830] sm:$0xf] }
  0x84   :  { %2008 = vmatpush.bf16.msra.mxu0 %v3530_v59  ;;  %1977 = vmatmul.bf16.vlgmr.msrb.gmra.mxu1 %v4854_v48  ;;  %v3926_v51 = vld [vmem:[%s5918_s1 + $0x834] sm:$0xf0]  ;;  %v3561_v52 = vld [vmem:[%s5918_s1 + $0x8b0] sm:$0xf]  ;;  %v2550_v53 = vor.u32 %v3687_v41, %v2547_v42  ;;  %v3669_v55 = vld [vmem:[%s5918_s1 + $0x34] sm:$0xf] }
  0x85   :  { %2021 = vmatpush.bf16.msra.mxu1 %v3594_v61  ;;  %1990 = vmatmul.bf16.vlgmr.msrb.gmra.mxu2 %v4852_v47  ;;  %v3942_v54 = vld [vmem:[%s5918_s1 + $0x8b4] sm:$0xf0]  ;;  %v2475_v56 = vld [vmem:[%s5918_s1 + $0x38] sm:$0xf0]  ;;  %v3685_v57 = vld [vmem:[%s5918_s1 + $0xb4] sm:$0xf]  ;;  %v3498_v59 = vor.u32 %v3926_v51, %v3497_v50 }
  0x86   :  { %2034 = vmatpush.bf16.msra.mxu2 %v2510_v62  ;;  %2003 = vmatmul.bf16.vlgmr.msrb.gmra.mxu3 %v4856_v49  ;;  %v2539_v58 = vld [vmem:[%s5918_s1 + $0xb8] sm:$0xf0]  ;;  %v3562_v61 = vor.u32 %v3942_v54, %v3561_v52  ;;  %v2478_v62 = vor.u32 %v3669_v55, %v2475_v56  ;;  %v3489_v63 = vld [vmem:[%s5918_s1 + $0x820] sm:$0xf]  ;;  %v3924_v3 = vld [vmem:[%s5918_s1 + $0x824] sm:$0xf0] }
  0x87   :  { %2047 = vmatpush.bf16.msra.mxu3 %v2574_v5  ;;  %v3553_v4 = vld [vmem:[%s5918_s1 + $0x8a0] sm:$0xf]  ;;  %v2542_v5 = vor.u32 %v3685_v57, %v2539_v58  ;;  %v3940_v6 = vld [vmem:[%s5918_s1 + $0x8a4] sm:$0xf0]  ;;  %v3667_v7 = vld [vmem:[%s5918_s1 + $0x24] sm:$0xf] }
  0x88   :  { %2009 = vmatpush.bf16.msra.mxu0 %v3522_v11  ;;  %v2467_v8 = vld [vmem:[%s5918_s1 + $0x28] sm:$0xf0]  ;;  %v3683_v9 = vld [vmem:[%s5918_s1 + $0xa4] sm:$0xf]  ;;  %v3490_v11 = vor.u32 %v3924_v3, %v3489_v63  ;;  %v3481_v18 = vld [vmem:[%s5918_s1 + $0x810] sm:$0xf] }
  0x89   :  { %2022 = vmatpush.bf16.msra.mxu1 %v3586_v13  ;;  %v2531_v10 = vld [vmem:[%s5918_s1 + $0xa8] sm:$0xf0]  ;;  %v3554_v13 = vor.u32 %v3940_v6, %v3553_v4  ;;  %v3922_v19 = vld [vmem:[%s5918_s1 + $0x814] sm:$0xf0]  ;;  %v3545_v20 = vld [vmem:[%s5918_s1 + $0x890] sm:$0xf] }
  0x8a   :  { %2035 = vmatpush.bf16.msra.mxu2 %v2502_v14  ;;  %v2470_v14 = vor.u32 %v3667_v7, %v2467_v8  ;;  %v3938_v22 = vld [vmem:[%s5918_s1 + $0x894] sm:$0xf0]  ;;  %v3665_v23 = vld [vmem:[%s5918_s1 + $0x14] sm:$0xf]  ;;  %v2459_v24 = vld [vmem:[%s5918_s1 + $0x18] sm:$0xf0] }
  0x8b   :  { %2048 = vmatpush.bf16.msra.mxu3 %v2566_v21  ;;  %v2534_v21 = vor.u32 %v3683_v9, %v2531_v10  ;;  %v3681_v25 = vld [vmem:[%s5918_s1 + $0x94] sm:$0xf]  ;;  %v2523_v26 = vld [vmem:[%s5918_s1 + $0x98] sm:$0xf0]  ;;  %v3546_v33 = vor.u32 %v3938_v22, %v3545_v20  ;;  %v2462_v35 = vor.u32 %v3665_v23, %v2459_v24  ;;  %v3537_v36 = vld [vmem:[%s5918_s1 + $0x880] sm:$0xf] }
  0x8c   :  { %2010 = vmatpush.bf16.msra.mxu0 %v3514_v30  ;;  %v3482_v30 = vor.u32 %v3922_v19, %v3481_v18  ;;  %v3663_v38 = vld [vmem:[%s5918_s1 + $0x4] sm:$0xf]  ;;  %v2526_v39 = vor.u32 %v3681_v25, %v2523_v26  ;;  %v2451_v40 = vld [vmem:[%s5918_s1 + $0x8] sm:$0xf0]  ;;  %v2699_v51 = vld [vmem:[%s5918_s1 + $0x1f8] sm:$0xf0] }
  0x8d   :  { %2023 = vmatpush.bf16.msra.mxu1 %v3578_v31  ;;  %v3473_v31 = vld [vmem:[%s5918_s1 + $0x800] sm:$0xf]  ;;  %v3679_v41 = vld [vmem:[%s5918_s1 + $0x84] sm:$0xf]  ;;  %v2515_v42 = vld [vmem:[%s5918_s1 + $0x88] sm:$0xf0]  ;;  %v2454_v55 = vor.u32 %v3663_v38, %v2451_v40 }
  0x8e   :  { %2036 = vmatpush.bf16.msra.mxu2 %v2494_v32  ;;  %v3920_v32 = vld [vmem:[%s5918_s1 + $0x804] sm:$0xf0]  ;;  %v3741_v52 = vld [vmem:[%s5918_s1 + $0x274] sm:$0xf]  ;;  %v2827_v57 = vld [vmem:[%s5918_s1 + $0x2f8] sm:$0xf0]  ;;  %v2518_v58 = vor.u32 %v3679_v41, %v2515_v42 }
  0x8f   :  { %2049 = vmatpush.bf16.msra.mxu3 %v2558_v37  ;;  %v3936_v37 = vld [vmem:[%s5918_s1 + $0x884] sm:$0xf0]  ;;  %v3474_v50 = vor.u32 %v3920_v32, %v3473_v31  ;;  %v3757_v56 = vld [vmem:[%s5918_s1 + $0x2f4] sm:$0xf]  ;;  %v3707_v63 = vld [vmem:[%s5918_s1 + $0x164] sm:$0xf] }
  0x90   :  { %2011 = vmatpush.bf16.msra.mxu0 %v3506_v43  ;;  %v3709_v43 = vld [vmem:[%s5918_s1 + $0x174] sm:$0xf]  ;;  %v3538_v54 = vor.u32 %v3936_v37, %v3537_v36  ;;  %v2627_v3 = vld [vmem:[%s5918_s1 + $0x168] sm:$0xf0]  ;;  %v3723_v4 = vld [vmem:[%s5918_s1 + $0x1e4] sm:$0xf] }
  0x91   :  { %2024 = vmatpush.bf16.msra.mxu1 %v3570_v44  ;;  %v2635_v44 = vld [vmem:[%s5918_s1 + $0x178] sm:$0xf0]  ;;  %v2691_v6 = vld [vmem:[%s5918_s1 + $0x1e8] sm:$0xf0]  ;;  %v3739_v7 = vld [vmem:[%s5918_s1 + $0x264] sm:$0xf] }
  0x92   :  { %2037 = vmatpush.bf16.msra.mxu2 %v2486_v45  ;;  %v3725_v45 = vld [vmem:[%s5918_s1 + $0x1f4] sm:$0xf]  ;;  %v2755_v8 = vld [vmem:[%s5918_s1 + $0x268] sm:$0xf0]  ;;  %v340_v9 = vld [vmem:[#allocation1] sm:$0xff]  ;;  %v2694_v18 = vor.u32 %v3723_v4, %v2691_v6 }
  0x93   :  { %2050 = vmatpush.bf16.msra.mxu3 %v2550_v53  ;;  %v2763_v53 = vld [vmem:[%s5918_s1 + $0x278] sm:$0xf0]  ;;  %v3755_v10 = vld [vmem:[%s5918_s1 + $0x2e4] sm:$0xf]  ;;  %v2758_v19 = vor.u32 %v3739_v7, %v2755_v8  ;;  %v3705_v20 = vld [vmem:[%s5918_s1 + $0x154] sm:$0xf] }
  0x94   :  { %2012 = vmatpush.bf16.msra.mxu0 %v3498_v59  ;;  %v2638_v59 = vor.u32 %v3709_v43, %v2635_v44  ;;  %v3721_v22 = vld [vmem:[%s5918_s1 + $0x1d4] sm:$0xf]  ;;  %v2683_v24 = vld [vmem:[%s5918_s1 + $0x1d8] sm:$0xf0]  ;;  %v3703_v36 = vld [vmem:[%s5918_s1 + $0x144] sm:$0xf] }
  0x95   :  { %2025 = vmatpush.bf16.msra.mxu1 %v3562_v61  ;;  %v2702_v61 = vor.u32 %v3725_v45, %v2699_v51  ;;  %v3737_v25 = vld [vmem:[%s5918_s1 + $0x254] sm:$0xf]  ;;  %v2747_v26 = vld [vmem:[%s5918_s1 + $0x258] sm:$0xf0]  ;;  %v2611_v37 = vld [vmem:[%s5918_s1 + $0x148] sm:$0xf0] }
  0x96   :  { %2038 = vmatpush.bf16.msra.mxu2 %v2478_v62  ;;  %v2766_v62 = vor.u32 %v3741_v52, %v2763_v53  ;;  %v2811_v31 = vld [vmem:[%s5918_s1 + $0x2d8] sm:$0xf0]  ;;  %v2739_v40 = vld [vmem:[%s5918_s1 + $0x248] sm:$0xf0]  ;;  %v3751_v41 = vld [vmem:[%s5918_s1 + $0x2c4] sm:$0xf]  ;;  %v2614_v43 = vor.u32 %v3703_v36, %v2611_v37 }
  0x97   :  { %2051 = vmatpush.bf16.msra.mxu3 %v2542_v5  ;;  %v2830_v5 = vor.u32 %v3757_v56, %v2827_v57  ;;  %v2803_v42 = vld [vmem:[%s5918_s1 + $0x2c8] sm:$0xf0]  ;;  %v2603_v51 = vld [vmem:[%s5918_s1 + $0x138] sm:$0xf0]  ;;  %v3717_v52 = vld [vmem:[%s5918_s1 + $0x1b4] sm:$0xf] }
  0x98   :  { %2013 = vmatpush.bf16.msra.mxu0 %v3490_v11  ;;  %v2819_v11 = vld [vmem:[%s5918_s1 + $0x2e8] sm:$0xf0]  ;;  %v2806_v53 = vor.u32 %v3751_v41, %v2803_v42  ;;  %v2731_v56 = vld [vmem:[%s5918_s1 + $0x238] sm:$0xf0]  ;;  %v3749_v57 = vld [vmem:[%s5918_s1 + $0x2b4] sm:$0xf] }
  0x99   :  { %2026 = vmatpush.bf16.msra.mxu1 %v3554_v13  ;;  %v341_v13 = vld [vmem:[#allocation1 + $0x9] sm:$0xff]  ;;  %v2822_v23 = vor.u32 %v3755_v10, %v2819_v11  ;;  %v3715_v4 = vld [vmem:[%s5918_s1 + $0x1a4] sm:$0xf] }
  0x9a   :  { %2039 = vmatpush.bf16.msra.mxu2 %v2470_v14  ;;  %v2630_v14 = vor.u32 %v3707_v63, %v2627_v3  ;;  %v2595_v3 = vld [vmem:[%s5918_s1 + $0x128] sm:$0xf0]  ;;  %v3731_v7 = vld [vmem:[%s5918_s1 + $0x224] sm:$0xf] }
  0x9b   :  { %2052 = vmatpush.bf16.msra.mxu3 %v2534_v21  ;;  %v2619_v21 = vld [vmem:[%s5918_s1 + $0x158] sm:$0xf0]  ;;  %v2723_v8 = vld [vmem:[%s5918_s1 + $0x228] sm:$0xf0]  ;;  %v3747_v10 = vld [vmem:[%s5918_s1 + $0x2a4] sm:$0xf] }
  0x9c   :  { %2014 = vmatpush.bf16.msra.mxu0 %v3482_v30  ;;  %v3753_v30 = vld [vmem:[%s5918_s1 + $0x2d4] sm:$0xf]  ;;  %v2622_v32 = vor.u32 %v3705_v20, %v2619_v21  ;;  %v2787_v11 = vld [vmem:[%s5918_s1 + $0x2a8] sm:$0xf0]  ;;  %v2587_v20 = vld [vmem:[%s5918_s1 + $0x118] sm:$0xf0] }
  0x9d   :  { %2027 = vmatpush.bf16.msra.mxu1 %v3546_v33  ;;  %v2686_v33 = vor.u32 %v3721_v22, %v2683_v24  ;;  %v2814_v38 = vor.u32 %v3753_v30, %v2811_v31  ;;  %v3713_v21 = vld [vmem:[%s5918_s1 + $0x194] sm:$0xf]  ;;  %v2651_v24 = vld [vmem:[%s5918_s1 + $0x198] sm:$0xf0] }
  0x9e   :  { %2040 = vmatpush.bf16.msra.mxu2 %v2462_v35  ;;  %v2750_v35 = vor.u32 %v3737_v25, %v2747_v26  ;;  %v3729_v25 = vld [vmem:[%s5918_s1 + $0x214] sm:$0xf]  ;;  %v2715_v26 = vld [vmem:[%s5918_s1 + $0x218] sm:$0xf0]  ;;  %v2654_v37 = vor.u32 %v3713_v21, %v2651_v24  ;;  %v3075_v24 = vld [vmem:[%s5918_s1 + $0x4e8] sm:$0xf0] }
  0x9f   :  { %2053 = vmatpush.bf16.msra.mxu3 %v2526_v39  ;;  %v3735_v39 = vld [vmem:[%s5918_s1 + $0x244] sm:$0xf]  ;;  %v3745_v30 = vld [vmem:[%s5918_s1 + $0x294] sm:$0xf]  ;;  %v2779_v31 = vld [vmem:[%s5918_s1 + $0x298] sm:$0xf0] }
  0xa0   :  { %2015 = vmatpush.bf16.msra.mxu0 %v3474_v50  ;;  %v2742_v45 = vor.u32 %v3735_v39, %v2739_v40  ;;  %v3701_v50 = vld [vmem:[%s5918_s1 + $0x134] sm:$0xf]  ;;  %v3727_v39 = vld [vmem:[%s5918_s1 + $0x204] sm:$0xf]  ;;  %v2782_v42 = vor.u32 %v3745_v30, %v2779_v31 }
  0xa1   :  { %2028 = vmatpush.bf16.msra.mxu1 %v3538_v54  ;;  %v2667_v54 = vld [vmem:[%s5918_s1 + $0x1b8] sm:$0xf0] }
  0xa2   :  { %2041 = vmatpush.bf16.msra.mxu2 %v2454_v55  ;;  %v3733_v55 = vld [vmem:[%s5918_s1 + $0x234] sm:$0xf] }
  0xa3   :  { %2054 = vmatpush.bf16.msra.mxu3 %v2518_v58  ;;  %2016 = vmatmul.bf16.vlgmr.msra.gmra.mxu0 %v340_v9  ;;  %v2795_v58 = vld [vmem:[%s5918_s1 + $0x2b8] sm:$0xf0]  ;;  %v2734_v63 = vor.u32 %v3733_v55, %v2731_v56  ;;  %v5188_v9 = vld [vmem:[%s5919_s2] sm:$0x3]  ;;  %v3805_v56 = vld [vmem:[%s5918_s1 + $0x474] sm:$0xf] }
  0xa4   :  { %2060 = vmatpush.bf16.msrb.mxu0 %v2638_v59  ;;  %2029 = vmatmul.bf16.vlgmr.msra.gmra.mxu1 %v341_v13  ;;  %v2606_v59 = vor.u32 %v3701_v50, %v2603_v51  ;;  %v2798_v6 = vor.u32 %v3749_v57, %v2795_v58  ;;  %v314_v22 = vperm.slane %v5188_v9, 0  ;;  %v3773_v50 = vld [vmem:[%s5918_s1 + $0x374] sm:$0xf]  ;;  %v2891_v51 = vld [vmem:[%s5918_s1 + $0x378] sm:$0xf0] }
  0xa5   :  { %2073 = vmatpush.bf16.msrb.mxu1 %v2702_v61  ;;  %2042 = vmatmul.bf16.vlgmr.msra.gmra.mxu2 %v4348_v28  ;;  %v3719_v28 = vld [vmem:[%s5918_s1 + $0x1c4] sm:$0xf]  ;;  %v2955_v55 = vld [vmem:[%s5918_s1 + $0x3f8] sm:$0xf0] }
  0xa6   :  { %2086 = vmatpush.bf16.msrb.mxu2 %v2766_v62  ;;  %2055 = vmatmul.bf16.vlgmr.msra.gmra.mxu3 %v4358_v34  ;;  %v2675_v34 = vld [vmem:[%s5918_s1 + $0x1c8] sm:$0xf0]  ;;  %v3699_v61 = vld [vmem:[%s5918_s1 + $0x124] sm:$0xf]  ;;  %v2670_v62 = vor.u32 %v3717_v52, %v2667_v54  ;;  %v1809_v36 = vpop.f32.mrf.mxu0  ;;  %v3789_v52 = vld [vmem:[%s5918_s1 + $0x3f4] sm:$0xf] }
  0xa7   :  { %2099 = vmatpush.bf16.msrb.mxu3 %v2830_v5  ;;  %v2678_v44 = vor.u32 %v3719_v28, %v2675_v34  ;;  %v2659_v5 = vld [vmem:[%s5918_s1 + $0x1a8] sm:$0xf0]  ;;  %v2598_v13 = vor.u32 %v3699_v61, %v2595_v3  ;;  %v2718_v28 = vor.u32 %v3729_v25, %v2715_v26  ;;  %v1810_v40 = vadd.f32 %v1809_v36, %v314_v22  ;;  %v1822_v41 = vpop.f32.mrf.mxu1  ;;  %v3019_v57 = vld [vmem:[%s5918_s1 + $0x478] sm:$0xf0]  ;;  %v3821_v61 = vld [vmem:[%s5918_s1 + $0x4f4] sm:$0xf] }
  0xa8   :  { %2061 = vmatpush.bf16.msrb.mxu0 %v2630_v14  ;;  %v3697_v14 = vld [vmem:[%s5918_s1 + $0x114] sm:$0xf]  ;;  %v2643_v34 = vld [vmem:[%s5918_s1 + $0x188] sm:$0xf0] }
  0xa9   :  { %2074 = vmatpush.bf16.msrb.mxu1 %v2694_v18  ;;  %v2662_v18 = vor.u32 %v3715_v4, %v2659_v5  ;;  %v2894_v4 = vor.u32 %v3773_v50, %v2891_v51  ;;  %v3799_v50 = vld [vmem:[%s5918_s1 + $0x444] sm:$0xf]  ;;  %v2995_v51 = vld [vmem:[%s5918_s1 + $0x448] sm:$0xf0] }
  0xaa   :  { %2087 = vmatpush.bf16.msrb.mxu2 %v2758_v19  ;;  %v2726_v19 = vor.u32 %v3731_v7, %v2723_v8  ;;  %v2958_v7 = vor.u32 %v3789_v52, %v2955_v55  ;;  %v3022_v8 = vor.u32 %v3805_v56, %v3019_v57  ;;  %v3815_v52 = vld [vmem:[%s5918_s1 + $0x4c4] sm:$0xf]  ;;  %v2998_v57 = vor.u32 %v3799_v50, %v2995_v51 }
  0xab   :  { %2100 = vmatpush.bf16.msrb.mxu3 %v2822_v23  ;;  %v2790_v23 = vor.u32 %v3747_v10, %v2787_v11  ;;  %v3771_v10 = vld [vmem:[%s5918_s1 + $0x364] sm:$0xf]  ;;  %v2883_v11 = vld [vmem:[%s5918_s1 + $0x368] sm:$0xf0] }
  0xac   :  { %2062 = vmatpush.bf16.msrb.mxu0 %v2622_v32  ;;  %v2590_v32 = vor.u32 %v3697_v14, %v2587_v20  ;;  %v3011_v20 = vld [vmem:[%s5918_s1 + $0x468] sm:$0xf0]  ;;  %v2886_v26 = vor.u32 %v3771_v10, %v2883_v11 }
  0xad   :  { %2075 = vmatpush.bf16.msrb.mxu1 %v2686_v33  ;;  %v3695_v33 = vld [vmem:[%s5918_s1 + $0x104] sm:$0xf] }
  0xae   :  { %2088 = vmatpush.bf16.msrb.mxu2 %v2750_v35  ;;  %v2579_v35 = vld [vmem:[%s5918_s1 + $0x108] sm:$0xf0]  ;;  %v1811_v22 = vpop.f32.mrf.mxu0 }
  0xaf   :  { %2101 = vmatpush.bf16.msrb.mxu3 %v2814_v38  ;;  %v3711_v38 = vld [vmem:[%s5918_s1 + $0x184] sm:$0xf]  ;;  %v2582_v54 = vor.u32 %v3695_v33, %v2579_v35  ;;  %v1824_v25 = vpop.f32.mrf.mxu1  ;;  %v2875_v33 = vld [vmem:[%s5918_s1 + $0x358] sm:$0xf0]  ;;  %v3785_v35 = vld [vmem:[%s5918_s1 + $0x3d4] sm:$0xf] }
  0xb0   :  { %2063 = vmatpush.bf16.msrb.mxu0 %v2614_v43  ;;  %v2707_v43 = vld [vmem:[%s5918_s1 + $0x208] sm:$0xf0]  ;;  %v2646_v58 = vor.u32 %v3711_v38, %v2643_v34  ;;  %v3003_v38 = vld [vmem:[%s5918_s1 + $0x458] sm:$0xf0]  ;;  %v3817_v34 = vld [vmem:[%s5918_s1 + $0x4d4] sm:$0xf] }
  0xb1   :  { %2076 = vmatpush.bf16.msrb.mxu1 %v2678_v44  ;;  %v3743_v44 = vld [vmem:[%s5918_s1 + $0x284] sm:$0xf]  ;;  %v2979_v25 = vld [vmem:[%s5918_s1 + $0x428] sm:$0xf0] }
  0xb2   :  { %2089 = vmatpush.bf16.msrb.mxu2 %v2742_v45  ;;  %v2771_v45 = vld [vmem:[%s5918_s1 + $0x288] sm:$0xf0] }
  0xb3   :  { %2102 = vmatpush.bf16.msrb.mxu3 %v2806_v53  ;;  %v1823_v53 = vadd.f32 %v1822_v41, %v1810_v40  ;;  %v2774_v3 = vor.u32 %v3743_v44, %v2771_v45  ;;  %v3767_v44 = vld [vmem:[%s5918_s1 + $0x344] sm:$0xf] }
  0xb4   :  { %2064 = vmatpush.bf16.msrb.mxu0 %v2606_v59  ;;  %v2710_v59 = vor.u32 %v3727_v39, %v2707_v43 }
  0xb5   :  { %2077 = vmatpush.bf16.msrb.mxu1 %v2670_v62  ;;  %v3083_v62 = vld [vmem:[%s5918_s1 + $0x4f8] sm:$0xf0] }
  0xb6   :  { %2090 = vmatpush.bf16.msrb.mxu2 %v2734_v63  ;;  %v1835_v63 = vpop.f32.mrf.mxu2  ;;  %v3086_v14 = vor.u32 %v3821_v61, %v3083_v62  ;;  %v3781_v61 = vld [vmem:[%s5918_s1 + $0x3b4] sm:$0xf] }
  0xb7   :  { %2103 = vmatpush.bf16.msrb.mxu3 %v2798_v6  ;;  %v1836_v5 = vadd.f32 %v1835_v63, %v1823_v53  ;;  %v1848_v6 = vpop.f32.mrf.mxu3  ;;  %v3059_v53 = vld [vmem:[%s5918_s1 + $0x4c8] sm:$0xf0] }
  0xb8   :  { %2065 = vmatpush.bf16.msrb.mxu0 %v2598_v13  ;;  %v3787_v13 = vld [vmem:[%s5918_s1 + $0x3e4] sm:$0xf] }
  0xb9   :  { %2078 = vmatpush.bf16.msrb.mxu1 %v2662_v18  ;;  %v2947_v18 = vld [vmem:[%s5918_s1 + $0x3e8] sm:$0xf0]  ;;  %v1849_v21 = vadd.f32 %v1848_v6, %v1836_v5  ;;  %v3797_v5 = vld [vmem:[%s5918_s1 + $0x434] sm:$0xf]  ;;  %v2987_v6 = vld [vmem:[%s5918_s1 + $0x438] sm:$0xf0] }
  0xba   :  { %2091 = vmatpush.bf16.msrb.mxu2 %v2726_v19  ;;  %v3803_v19 = vld [vmem:[%s5918_s1 + $0x464] sm:$0xf]  ;;  %v2950_v30 = vor.u32 %v3787_v13, %v2947_v18 }
  0xbb   :  { %2104 = vmatpush.bf16.msrb.mxu3 %v2790_v23  ;;  %v3819_v23 = vld [vmem:[%s5918_s1 + $0x4e4] sm:$0xf]  ;;  %v3014_v31 = vor.u32 %v3803_v19, %v3011_v20  ;;  %v2851_v19 = vld [vmem:[%s5918_s1 + $0x328] sm:$0xf0] }
  0xbc   :  { %2066 = vmatpush.bf16.msrb.mxu0 %v2590_v32  ;;  %v3769_v32 = vld [vmem:[%s5918_s1 + $0x354] sm:$0xf]  ;;  %v3078_v36 = vor.u32 %v3819_v23, %v3075_v24  ;;  %v3763_v18 = vld [vmem:[%s5918_s1 + $0x324] sm:$0xf]  ;;  %v2915_v23 = vld [vmem:[%s5918_s1 + $0x3a8] sm:$0xf0] }
  0xbd   :  { %2079 = vmatpush.bf16.msrb.mxu1 %v2654_v37  ;;  %v2939_v37 = vld [vmem:[%s5918_s1 + $0x3d8] sm:$0xf0]  ;;  %v2878_v40 = vor.u32 %v3769_v32, %v2875_v33  ;;  %v3779_v20 = vld [vmem:[%s5918_s1 + $0x3a4] sm:$0xf]  ;;  %v3043_v32 = vld [vmem:[%s5918_s1 + $0x4a8] sm:$0xf0]  ;;  %v2854_v33 = vor.u32 %v3763_v18, %v2851_v19 }
  0xbe   :  { %2092 = vmatpush.bf16.msrb.mxu2 %v2718_v28  ;;  %v3801_v28 = vld [vmem:[%s5918_s1 + $0x454] sm:$0xf]  ;;  %v1837_v39 = vpop.f32.mrf.mxu2  ;;  %v3795_v24 = vld [vmem:[%s5918_s1 + $0x424] sm:$0xf] }
  0xbf   :  { %2105 = vmatpush.bf16.msrb.mxu3 %v2782_v42  ;;  %v1850_v41 = vpop.f32.mrf.mxu3  ;;  %v2942_v42 = vor.u32 %v3785_v35, %v2939_v37  ;;  %v3006_v43 = vor.u32 %v3801_v28, %v3003_v38  ;;  %v2918_v37 = vor.u32 %v3779_v20, %v2915_v23  ;;  %v2982_v28 = vor.u32 %v3795_v24, %v2979_v25  ;;  %v3761_v38 = vld [vmem:[%s5918_s1 + $0x314] sm:$0xf]  ;;  %v3851_v23 = vld [vmem:[%s5918_s1 + $0x5e4] sm:$0xf]  ;;  %v3203_v25 = vld [vmem:[%s5918_s1 + $0x5e8] sm:$0xf0] }
  0xc0   :  { %2067 = vmatpush.bf16.msrb.mxu0 %v2582_v54  ;;  %v1861_v55 = vpop.f32.mrf.mxu0  ;;  %v2907_v41 = vld [vmem:[%s5918_s1 + $0x398] sm:$0xf0] }
  0xc1   :  { %2080 = vmatpush.bf16.msrb.mxu1 %v2646_v58  ;;  %v3765_v58 = vld [vmem:[%s5918_s1 + $0x334] sm:$0xf]  ;;  %v1862_v62 = vadd.f32 %v1861_v55, %v1849_v21  ;;  %v1874_v63 = vpop.f32.mrf.mxu1 }
  0xc2   :  { %2093 = vmatpush.bf16.msrb.mxu2 %v2710_v59  ;;  %v2859_v59 = vld [vmem:[%s5918_s1 + $0x338] sm:$0xf0] }
  0xc3   :  { %2106 = vmatpush.bf16.msrb.mxu3 %v2774_v3  ;;  %2068 = vmatmul.bf16.vlgmr.msrb.gmra.mxu0 %v4346_v27  ;;  %v2867_v27 = vld [vmem:[%s5918_s1 + $0x348] sm:$0xf0]  ;;  %v3062_v3 = vor.u32 %v3815_v52, %v3059_v53  ;;  %v1875_v10 = vadd.f32 %v1874_v63, %v1862_v62  ;;  %v2862_v11 = vor.u32 %v3765_v58, %v2859_v59  ;;  %v3775_v52 = vld [vmem:[%s5918_s1 + $0x384] sm:$0xf]  ;;  %v3837_v62 = vld [vmem:[%s5918_s1 + $0x574] sm:$0xf] }
  0xc4   :  { %2112 = vmatpush.bf16.msra.mxu0 %v2894_v4  ;;  %2081 = vmatmul.bf16.vlgmr.msrb.gmra.mxu1 %v4350_v29  ;;  %v2931_v29 = vld [vmem:[%s5918_s1 + $0x3c8] sm:$0xf0]  ;;  %v2870_v54 = vor.u32 %v3767_v44, %v2867_v27  ;;  %v2923_v4 = vld [vmem:[%s5918_s1 + $0x3b8] sm:$0xf0]  ;;  %v3809_v44 = vld [vmem:[%s5918_s1 + $0x494] sm:$0xf] }
  0xc5   :  { %2125 = vmatpush.bf16.msra.mxu1 %v2958_v7  ;;  %2094 = vmatmul.bf16.vlgmr.msrb.gmra.mxu2 %v4426_v0  ;;  %v3067_v0 = vld [vmem:[%s5918_s1 + $0x4d8] sm:$0xf0]  ;;  %v3813_v7 = vld [vmem:[%s5918_s1 + $0x4b4] sm:$0xf]  ;;  %v2926_v13 = vor.u32 %v3781_v61, %v2923_v4  ;;  %v2899_v53 = vld [vmem:[%s5918_s1 + $0x388] sm:$0xf0] }
  0xc6   :  { %2138 = vmatpush.bf16.msra.mxu2 %v3022_v8  ;;  %2107 = vmatmul.bf16.vlgmr.msrb.gmra.mxu3 %v4430_v2  ;;  %v3783_v2 = vld [vmem:[%s5918_s1 + $0x3c4] sm:$0xf]  ;;  %v3070_v45 = vor.u32 %v3817_v34, %v3067_v0  ;;  %v3051_v8 = vld [vmem:[%s5918_s1 + $0x4b8] sm:$0xf0]  ;;  %v3777_v0 = vld [vmem:[%s5918_s1 + $0x394] sm:$0xf] }
  0xc7   :  { %2151 = vmatpush.bf16.msra.mxu3 %v3086_v14  ;;  %v2934_v56 = vor.u32 %v3783_v2, %v2931_v29  ;;  %v2990_v14 = vor.u32 %v3797_v5, %v2987_v6  ;;  %v3054_v22 = vor.u32 %v3813_v7, %v3051_v8  ;;  %v2843_v34 = vld [vmem:[%s5918_s1 + $0x318] sm:$0xf0]  ;;  %v2835_v29 = vld [vmem:[%s5918_s1 + $0x308] sm:$0xf0]  ;;  %v2910_v50 = vor.u32 %v3777_v0, %v2907_v41  ;;  %v3807_v58 = vld [vmem:[%s5918_s1 + $0x484] sm:$0xf] }
  0xc8   :  { %2113 = vmatpush.bf16.msra.mxu0 %v2886_v26  ;;  %v1887_v21 = vpop.f32.mrf.mxu2  ;;  %v3035_v27 = vld [vmem:[%s5918_s1 + $0x498] sm:$0xf0]  ;;  %v2846_v2 = vor.u32 %v3761_v38, %v2843_v34  ;;  %v3027_v59 = vld [vmem:[%s5918_s1 + $0x488] sm:$0xf0]  ;;  %v3869_v6 = vld [vmem:[%s5918_s1 + $0x674] sm:$0xf]  ;;  %v2902_v8 = vor.u32 %v3775_v52, %v2899_v53 }
  0xc9   :  { %2126 = vmatpush.bf16.msra.mxu1 %v2950_v30  ;;  %v1888_v26 = vadd.f32 %v1887_v21, %v1875_v10  ;;  %v1900_v30 = vpop.f32.mrf.mxu3  ;;  %v1876_v39 = vpop.f32.mrf.mxu1  ;;  %v3147_v63 = vld [vmem:[%s5918_s1 + $0x578] sm:$0xf0]  ;;  %v3835_v21 = vld [vmem:[%s5918_s1 + $0x564] sm:$0xf]  ;;  %v3849_v34 = vld [vmem:[%s5918_s1 + $0x5d4] sm:$0xf] }
  0xca   :  { %2139 = vmatpush.bf16.msra.mxu2 %v3014_v31  ;;  %v3811_v31 = vld [vmem:[%s5918_s1 + $0x4a4] sm:$0xf]  ;;  %v3211_v5 = vld [vmem:[%s5918_s1 + $0x5f8] sm:$0xf0]  ;;  %v3150_v18 = vor.u32 %v3837_v62, %v3147_v63  ;;  %v3315_v53 = vld [vmem:[%s5918_s1 + $0x6c8] sm:$0xf0] }
  0xcb   :  { %2152 = vmatpush.bf16.msra.mxu3 %v3078_v36  ;;  %v5393_v35 = vadd.f32 %v1900_v30, %v1888_v26  ;;  %v1863_v36 = vpop.f32.mrf.mxu0  ;;  %v3275_v7 = vld [vmem:[%s5918_s1 + $0x678] sm:$0xf0]  ;;  %v3867_v26 = vld [vmem:[%s5918_s1 + $0x664] sm:$0xf]  ;;  %v3267_v30 = vld [vmem:[%s5918_s1 + $0x668] sm:$0xf0] }
  0xcc   :  { %2114 = vmatpush.bf16.msra.mxu0 %v2878_v40  ;;  %v3046_v40 = vor.u32 %v3811_v31, %v3043_v32  ;;  %v3278_v20 = vor.u32 %v3869_v6, %v3275_v7  ;;  %v3883_v31 = vld [vmem:[%s5918_s1 + $0x6e4] sm:$0xf]  ;;  %v3331_v32 = vld [vmem:[%s5918_s1 + $0x6e8] sm:$0xf0]  ;;  %v3206_v36 = vor.u32 %v3851_v23, %v3203_v25  ;;  %v3131_v38 = vld [vmem:[%s5918_s1 + $0x558] sm:$0xf0] }
  0xcd   :  { %2127 = vmatpush.bf16.msra.mxu1 %v2942_v42  ;;  %v3793_v42 = vld [vmem:[%s5918_s1 + $0x414] sm:$0xf]  ;;  %v3334_v0 = vor.u32 %v3883_v31, %v3331_v32  ;;  %v3195_v39 = vld [vmem:[%s5918_s1 + $0x5d8] sm:$0xf0]  ;;  %v3879_v52 = vld [vmem:[%s5918_s1 + $0x6c4] sm:$0xf] }
  0xce   :  { %2140 = vmatpush.bf16.msra.mxu2 %v3006_v43  ;;  %v2971_v43 = vld [vmem:[%s5918_s1 + $0x418] sm:$0xf0]  ;;  %v3318_v62 = vor.u32 %v3879_v52, %v3315_v53  ;;  %v3299_v25 = vld [vmem:[%s5918_s1 + $0x6a8] sm:$0xf0]  ;;  %v3901_v53 = vld [vmem:[%s5918_s1 + $0x774] sm:$0xf] }
  0xcf   :  { %2153 = vmatpush.bf16.msra.mxu3 %v3070_v45  ;;  %v3759_v45 = vld [vmem:[%s5918_s1 + $0x304] sm:$0xf]  ;;  %v2974_v51 = vor.u32 %v3793_v42, %v2971_v43  ;;  %v3259_v41 = vld [vmem:[%s5918_s1 + $0x658] sm:$0xf0] }
  0xd0   :  { %2115 = vmatpush.bf16.msra.mxu0 %v2870_v54  ;;  %v3791_v54 = vld [vmem:[%s5918_s1 + $0x404] sm:$0xf]  ;;  %v1889_v55 = vpop.f32.mrf.mxu2  ;;  %v2838_v4 = vor.u32 %v3759_v45, %v2835_v29  ;;  %v3323_v42 = vld [vmem:[%s5918_s1 + $0x6d8] sm:$0xf0]  ;;  %v3187_v45 = vld [vmem:[%s5918_s1 + $0x5c8] sm:$0xf0] }
  0xd1   :  { %2128 = vmatpush.bf16.msra.mxu1 %v2934_v56  ;;  %v3038_v56 = vor.u32 %v3809_v44, %v3035_v27  ;;  %v1902_v61 = vpop.f32.mrf.mxu3  ;;  %v3198_v44 = vor.u32 %v3849_v34, %v3195_v39  ;;  %v3863_v29 = vld [vmem:[%s5918_s1 + $0x644] sm:$0xf]  ;;  %v3179_v63 = vld [vmem:[%s5918_s1 + $0x5b8] sm:$0xf0] }
  0xd2   :  { %2141 = vmatpush.bf16.msra.mxu2 %v2998_v57  ;;  %v2963_v57 = vld [vmem:[%s5918_s1 + $0x408] sm:$0xf0]  ;;  %v3845_v61 = vld [vmem:[%s5918_s1 + $0x5b4] sm:$0xf]  ;;  %v3307_v6 = vld [vmem:[%s5918_s1 + $0x6b8] sm:$0xf0] }
  0xd3   :  { %2154 = vmatpush.bf16.msra.mxu3 %v3062_v3  ;;  %v3853_v3 = vld [vmem:[%s5918_s1 + $0x5f4] sm:$0xf]  ;;  %v2966_v10 = vor.u32 %v3791_v54, %v2963_v57  ;;  %v3163_v34 = vld [vmem:[%s5918_s1 + $0x598] sm:$0xf0] }
  0xd4   :  { %2116 = vmatpush.bf16.msra.mxu0 %v2862_v11  ;;  %v3885_v11 = vld [vmem:[%s5918_s1 + $0x6f4] sm:$0xf]  ;;  %v3214_v19 = vor.u32 %v3853_v3, %v3211_v5  ;;  %v3227_v39 = vld [vmem:[%s5918_s1 + $0x618] sm:$0xf0] }
  0xd5   :  { %2129 = vmatpush.bf16.msra.mxu1 %v2926_v13  ;;  %v3339_v13 = vld [vmem:[%s5918_s1 + $0x6f8] sm:$0xf0]  ;;  %v3861_v3 = vld [vmem:[%s5918_s1 + $0x634] sm:$0xf] }
  0xd6   :  { %2142 = vmatpush.bf16.msra.mxu2 %v2990_v14  ;;  %v3030_v14 = vor.u32 %v3807_v58, %v3027_v59  ;;  %v3342_v24 = vor.u32 %v3885_v11, %v3339_v13  ;;  %v3829_v58 = vld [vmem:[%s5918_s1 + $0x534] sm:$0xf]  ;;  %v3115_v59 = vld [vmem:[%s5918_s1 + $0x538] sm:$0xf0]  ;;  %v3827_v11 = vld [vmem:[%s5918_s1 + $0x524] sm:$0xf] }
  0xd7   :  { %2155 = vmatpush.bf16.msra.mxu3 %v3054_v22  ;;  %v3139_v22 = vld [vmem:[%s5918_s1 + $0x568] sm:$0xf0]  ;;  %v3877_v5 = vld [vmem:[%s5918_s1 + $0x6b4] sm:$0xf]  ;;  %v3118_v7 = vor.u32 %v3829_v58, %v3115_v59  ;;  %v3467_v59 = vld [vmem:[%s5918_s1 + $0x7f8] sm:$0xf0] }
  0xd8   :  { %2117 = vmatpush.bf16.msra.mxu0 %v2854_v33  ;;  %v3142_v33 = vor.u32 %v3835_v21, %v3139_v22  ;;  %v3107_v13 = vld [vmem:[%s5918_s1 + $0x528] sm:$0xf0]  ;;  %v3859_v21 = vld [vmem:[%s5918_s1 + $0x624] sm:$0xf] }
  0xd9   :  { %2130 = vmatpush.bf16.msra.mxu1 %v2918_v37  ;;  %v3270_v37 = vor.u32 %v3867_v26, %v3267_v30  ;;  %v3235_v22 = vld [vmem:[%s5918_s1 + $0x628] sm:$0xf0]  ;;  %v3110_v30 = vor.u32 %v3827_v11, %v3107_v13  ;;  %v3899_v11 = vld [vmem:[%s5918_s1 + $0x764] sm:$0xf] }
  0xda   :  { %2143 = vmatpush.bf16.msra.mxu2 %v2982_v28  ;;  %v3833_v28 = vld [vmem:[%s5918_s1 + $0x554] sm:$0xf]  ;;  %v3395_v13 = vld [vmem:[%s5918_s1 + $0x768] sm:$0xf0] }
  0xdb   :  { %2156 = vmatpush.bf16.msra.mxu3 %v3046_v40  ;;  %v3865_v40 = vld [vmem:[%s5918_s1 + $0x654] sm:$0xf]  ;;  %v3134_v43 = vor.u32 %v3833_v28, %v3131_v38 }
  0xdc   :  { %2118 = vmatpush.bf16.msra.mxu0 %v2846_v2  ;;  %v3262_v27 = vor.u32 %v3865_v40, %v3259_v41  ;;  %v3847_v2 = vld [vmem:[%s5918_s1 + $0x5c4] sm:$0xf]  ;;  %v3841_v28 = vld [vmem:[%s5918_s1 + $0x594] sm:$0xf]  ;;  %v3291_v41 = vld [vmem:[%s5918_s1 + $0x698] sm:$0xf0] }
  0xdd   :  { %2131 = vmatpush.bf16.msra.mxu1 %v2910_v50  ;;  %v3251_v50 = vld [vmem:[%s5918_s1 + $0x648] sm:$0xf0]  ;;  %v3873_v40 = vld [vmem:[%s5918_s1 + $0x694] sm:$0xf] }
  0xde   :  { %2144 = vmatpush.bf16.msra.mxu2 %v2974_v51  ;;  %v3254_v57 = vor.u32 %v3863_v29, %v3251_v50  ;;  %v3871_v29 = vld [vmem:[%s5918_s1 + $0x684] sm:$0xf]  ;;  %v3283_v50 = vld [vmem:[%s5918_s1 + $0x688] sm:$0xf0] }
  0xdf   :  { %2157 = vmatpush.bf16.msra.mxu3 %v3038_v56  ;;  %v3190_v56 = vor.u32 %v3847_v2, %v3187_v45  ;;  %v3855_v2 = vld [vmem:[%s5918_s1 + $0x604] sm:$0xf]  ;;  %v3219_v45 = vld [vmem:[%s5918_s1 + $0x608] sm:$0xf0] }
  0xe0   :  { %2119 = vmatpush.bf16.msra.mxu0 %v2838_v4  ;;  %v5537_v51 = vpop.f32.mrf.mxu0  ;;  %v3243_v4 = vld [vmem:[%s5918_s1 + $0x638] sm:$0xf0] }
  0xe1   :  { %2132 = vmatpush.bf16.msra.mxu1 %v2902_v8  ;;  %v5545_v55 = vpop.f32.mrf.mxu1  ;;  %v3182_v8 = vor.u32 %v3845_v61, %v3179_v63  ;;  %v3933_v61 = vld [vmem:[%s5918_s1 + $0x874] sm:$0xf] }
  0xe2   :  { %2145 = vmatpush.bf16.msra.mxu2 %v2966_v10  ;;  %v3246_v10 = vor.u32 %v3861_v3, %v3243_v4  ;;  %v3222_v3 = vor.u32 %v3855_v2, %v3219_v45  ;;  %v3949_v4 = vld [vmem:[%s5918_s1 + $0x8f4] sm:$0xf] }
  0xe3   :  { %2158 = vmatpush.bf16.msra.mxu3 %v3030_v14  ;;  %2120 = vmatmul.bf16.vlgmr.msra.gmra.mxu0 %v4421_v60  ;;  %v3881_v60 = vld [vmem:[%s5918_s1 + $0x6d4] sm:$0xf]  ;;  %v3843_v14 = vld [vmem:[%s5918_s1 + $0x5a4] sm:$0xf] }
  0xe4   :  { %2164 = vmatpush.bf16.msrb.mxu0 %v3150_v18  ;;  %2133 = vmatmul.bf16.vlgmr.msra.gmra.mxu1 %v4428_v1  ;;  %v3831_v1 = vld [vmem:[%s5918_s1 + $0x544] sm:$0xf]  ;;  %v3310_v18 = vor.u32 %v3877_v5, %v3307_v6  ;;  %v3595_v5 = vld [vmem:[%s5918_s1 + $0x8f8] sm:$0xf0]  ;;  %v3286_v6 = vor.u32 %v3871_v29, %v3283_v50  ;;  %v3893_v50 = vld [vmem:[%s5918_s1 + $0x734] sm:$0xf] }
  0xe5   :  { %2177 = vmatpush.bf16.msrb.mxu1 %v3214_v19  ;;  %2146 = vmatmul.bf16.vlgmr.msra.gmra.mxu2 %v4676_v12  ;;  %v3123_v12 = vld [vmem:[%s5918_s1 + $0x548] sm:$0xf0] }
  0xe6   :  { %2190 = vmatpush.bf16.msrb.mxu2 %v3278_v20  ;;  %2159 = vmatmul.bf16.vlgmr.msra.gmra.mxu3 %v4686_v16  ;;  %v3326_v16 = vor.u32 %v3881_v60, %v3323_v42  ;;  %v3126_v54 = vor.u32 %v3831_v1, %v3123_v12  ;;  %v3171_v20 = vld [vmem:[%s5918_s1 + $0x5a8] sm:$0xf0]  ;;  %v3823_v42 = vld [vmem:[%s5918_s1 + $0x504] sm:$0xf] }
  0xe7   :  { %2203 = vmatpush.bf16.msrb.mxu3 %v3342_v24  ;;  %v3875_v24 = vld [vmem:[%s5918_s1 + $0x6a4] sm:$0xf]  ;;  %v3174_v32 = vor.u32 %v3843_v14, %v3171_v20  ;;  %v3155_v12 = vld [vmem:[%s5918_s1 + $0x588] sm:$0xf0] }
  0xe8   :  { %2165 = vmatpush.bf16.msrb.mxu0 %v3142_v33  ;;  %v5580_v19 = vpop.f32.mrf.mxu2  ;;  %v1915_v26 = vpop.f32.mrf.mxu0  ;;  %v3238_v33 = vor.u32 %v3859_v21, %v3235_v22  ;;  %v3302_v38 = vor.u32 %v3875_v24, %v3299_v25  ;;  %v3839_v1 = vld [vmem:[%s5918_s1 + $0x584] sm:$0xf]  ;;  %v3459_v20 = vld [vmem:[%s5918_s1 + $0x7e8] sm:$0xf0] }
  0xe9   :  { %2178 = vmatpush.bf16.msrb.mxu1 %v3206_v36  ;;  %v5591_v23 = vpop.f32.mrf.mxu3  ;;  %v1928_v31 = vpop.f32.mrf.mxu1  ;;  %v3825_v36 = vld [vmem:[%s5918_s1 + $0x514] sm:$0xf]  ;;  %v3158_v63 = vor.u32 %v3839_v1, %v3155_v12  ;;  %v3915_v14 = vld [vmem:[%s5918_s1 + $0x7e4] sm:$0xf]  ;;  %v3523_v22 = vld [vmem:[%s5918_s1 + $0x868] sm:$0xf0]  ;;  %v3398_v26 = vor.u32 %v3899_v11, %v3395_v13 }
  0xea   :  { %2191 = vmatpush.bf16.msrb.mxu2 %v3270_v37  ;;  %v3099_v37 = vld [vmem:[%s5918_s1 + $0x518] sm:$0xf0]  ;;  %v3931_v21 = vld [vmem:[%s5918_s1 + $0x864] sm:$0xf]  ;;  %v3587_v25 = vld [vmem:[%s5918_s1 + $0x8e8] sm:$0xf0] }
  0xeb   :  { %2204 = vmatpush.bf16.msrb.mxu3 %v3334_v0  ;;  %v3857_v0 = vld [vmem:[%s5918_s1 + $0x614] sm:$0xf]  ;;  %v3102_v60 = vor.u32 %v3825_v36, %v3099_v37  ;;  %v3947_v24 = vld [vmem:[%s5918_s1 + $0x8e4] sm:$0xf]  ;;  %v3526_v31 = vor.u32 %v3931_v21, %v3523_v22  ;;  %v3571_v12 = vld [vmem:[%s5918_s1 + $0x8c8] sm:$0xf0] }
  0xec   :  { %2166 = vmatpush.bf16.msrb.mxu0 %v3134_v43  ;;  %v3091_v43 = vld [vmem:[%s5918_s1 + $0x508] sm:$0xf0]  ;;  %v3913_v36 = vld [vmem:[%s5918_s1 + $0x7d4] sm:$0xf]  ;;  %v3590_v37 = vor.u32 %v3947_v24, %v3587_v25  ;;  %v3943_v1 = vld [vmem:[%s5918_s1 + $0x8c4] sm:$0xf] }
  0xed   :  { %2179 = vmatpush.bf16.msrb.mxu1 %v3198_v44  ;;  %v3166_v44 = vor.u32 %v3841_v28, %v3163_v34  ;;  %v3094_v58 = vor.u32 %v3823_v42, %v3091_v43  ;;  %v3451_v28 = vld [vmem:[%s5918_s1 + $0x7d8] sm:$0xf0]  ;;  %v3443_v42 = vld [vmem:[%s5918_s1 + $0x7c8] sm:$0xf0]  ;;  %v3927_v43 = vld [vmem:[%s5918_s1 + $0x844] sm:$0xf] }
  0xee   :  { %2192 = vmatpush.bf16.msrb.mxu2 %v3262_v27  ;;  %v3230_v27 = vor.u32 %v3857_v0, %v3227_v39  ;;  %v3515_v34 = vld [vmem:[%s5918_s1 + $0x858] sm:$0xf0]  ;;  %v3923_v11 = vld [vmem:[%s5918_s1 + $0x824] sm:$0xf]  ;;  %v3491_v13 = vld [vmem:[%s5918_s1 + $0x828] sm:$0xf0] }
  0xef   :  { %2205 = vmatpush.bf16.msrb.mxu3 %v3326_v16  ;;  %v3294_v16 = vor.u32 %v3873_v40, %v3291_v41  ;;  %v3579_v0 = vld [vmem:[%s5918_s1 + $0x8d8] sm:$0xf0]  ;;  %v3454_v40 = vor.u32 %v3913_v36, %v3451_v28 }
  0xf0   :  { %2167 = vmatpush.bf16.msrb.mxu0 %v3126_v54  ;;  %v1941_v52 = vpop.f32.mrf.mxu2  ;;  %v3403_v54 = vld [vmem:[%s5918_s1 + $0x778] sm:$0xf0] }
  0xf1   :  { %2180 = vmatpush.bf16.msrb.mxu1 %v3190_v56  ;;  %v3917_v56 = vld [vmem:[%s5918_s1 + $0x7f4] sm:$0xf]  ;;  %v3371_v52 = vld [vmem:[%s5918_s1 + $0x738] sm:$0xf0] }
  0xf2   :  { %2193 = vmatpush.bf16.msrb.mxu2 %v3254_v57  ;;  %v1954_v57 = vpop.f32.mrf.mxu3  ;;  %v3419_v36 = vld [vmem:[%s5918_s1 + $0x798] sm:$0xf0] }
  0xf3   :  { %2206 = vmatpush.bf16.msrb.mxu3 %v3318_v62  ;;  %v3531_v62 = vld [vmem:[%s5918_s1 + $0x878] sm:$0xf0]  ;;  %v3925_v57 = vld [vmem:[%s5918_s1 + $0x834] sm:$0xf] }
  0xf4   :  { %2168 = vmatpush.bf16.msrb.mxu0 %v3118_v7  ;;  %v3406_v7 = vor.u32 %v3901_v53, %v3403_v54  ;;  %v3909_v53 = vld [vmem:[%s5918_s1 + $0x7b4] sm:$0xf]  ;;  %v3574_v54 = vor.u32 %v3943_v1, %v3571_v12  ;;  %v3483_v28 = vld [vmem:[%s5918_s1 + $0x818] sm:$0xf0]  ;;  %v3935_v1 = vld [vmem:[%s5918_s1 + $0x884] sm:$0xf] }
  0xf5   :  { %2181 = vmatpush.bf16.msrb.mxu1 %v3182_v8  ;;  %v3470_v8 = vor.u32 %v3917_v56, %v3467_v59  ;;  %v3435_v56 = vld [vmem:[%s5918_s1 + $0x7b8] sm:$0xf0]  ;;  %v3941_v59 = vld [vmem:[%s5918_s1 + $0x8b4] sm:$0xf]  ;;  %v3539_v12 = vld [vmem:[%s5918_s1 + $0x888] sm:$0xf0] }
  0xf6   :  { %2194 = vmatpush.bf16.msrb.mxu2 %v3246_v10  ;;  %v3534_v10 = vor.u32 %v3933_v61, %v3531_v62  ;;  %v3563_v61 = vld [vmem:[%s5918_s1 + $0x8b8] sm:$0xf0]  ;;  %v3374_v62 = vor.u32 %v3893_v50, %v3371_v52  ;;  %v3542_v52 = vor.u32 %v3935_v1, %v3539_v12  ;;  %v3961_v12 = vld [vmem:[%s5920_s3 + $0x50] sm:$0xff] }
  0xf7   :  { %2207 = vmatpush.bf16.msrb.mxu3 %v3310_v18  ;;  %v3598_v18 = vor.u32 %v3949_v4, %v3595_v5  ;;  %v3891_v4 = vld [vmem:[%s5918_s1 + $0x724] sm:$0xf]  ;;  %v3363_v5 = vld [vmem:[%s5918_s1 + $0x728] sm:$0xf0] }
  0xf8   :  { %2169 = vmatpush.bf16.msrb.mxu0 %v3110_v30  ;;  %v3462_v30 = vor.u32 %v3915_v14, %v3459_v20  ;;  %v3555_v20 = vld [vmem:[%s5918_s1 + $0x8a8] sm:$0xf0]  ;;  %v3366_v22 = vor.u32 %v3891_v4, %v3363_v5 }
  0xf9   :  { %2182 = vmatpush.bf16.msrb.mxu1 %v3174_v32  ;;  %v3897_v32 = vld [vmem:[%s5918_s1 + $0x754] sm:$0xf] }
  0xfa   :  { %2195 = vmatpush.bf16.msrb.mxu2 %v3238_v33  ;;  %v3387_v33 = vld [vmem:[%s5918_s1 + $0x758] sm:$0xf0] }
  0xfb   :  { %2208 = vmatpush.bf16.msrb.mxu3 %v3302_v38  ;;  %v3929_v38 = vld [vmem:[%s5918_s1 + $0x854] sm:$0xf]  ;;  %v3390_v39 = vor.u32 %v3897_v32, %v3387_v33 }
  0xfc   :  { %2170 = vmatpush.bf16.msrb.mxu0 %v3102_v60  ;;  %v3518_v41 = vor.u32 %v3929_v38, %v3515_v34  ;;  %v3911_v60 = vld [vmem:[%s5918_s1 + $0x7c4] sm:$0xf]  ;;  %v3905_v32 = vld [vmem:[%s5918_s1 + $0x794] sm:$0xf]  ;;  %v3547_v34 = vld [vmem:[%s5918_s1 + $0x898] sm:$0xf0] }
  0xfd   :  { %2183 = vmatpush.bf16.msrb.mxu1 %v3166_v44  ;;  %v3507_v44 = vld [vmem:[%s5918_s1 + $0x848] sm:$0xf0]  ;;  %v3446_v45 = vor.u32 %v3911_v60, %v3443_v42  ;;  %v3937_v38 = vld [vmem:[%s5918_s1 + $0x894] sm:$0xf] }
  0xfe   :  { %2196 = vmatpush.bf16.msrb.mxu2 %v3230_v27  ;;  %v3510_v29 = vor.u32 %v3927_v43, %v3507_v44  ;;  %v3411_v60 = vld [vmem:[%s5918_s1 + $0x788] sm:$0xf0]  ;;  %v1914_v44 = vadd.f32 %v5537_v51, %v5393_v35  ;;  %v3958_v35 = vld [vmem:[%s5920_s3 + $0x38] sm:$0xff] }
  0xff   :  { %2209 = vmatpush.bf16.msrb.mxu3 %v3294_v16  ;;  %v3475_v42 = vld [vmem:[%s5918_s1 + $0x808] sm:$0xf0] }
 0x100   :  { %2171 = vmatpush.bf16.msrb.mxu0 %v3094_v58  ;;  %v5741_v27 = vpop.f32.mrf.mxu0  ;;  %v3499_v58 = vld [vmem:[%s5918_s1 + $0x838] sm:$0xf0]  ;;  %v1927_v51 = vadd.f32 %v5545_v55, %v1914_v44  ;;  %v3970_v55 = vld [vmem:[#allocation1 + $0x9] sm:$0xff] }
 0x101   :  { %2184 = vmatpush.bf16.msrb.mxu1 %v3158_v63  ;;  %v5749_v16 = vpop.f32.mrf.mxu1  ;;  %v3438_v63 = vor.u32 %v3909_v53, %v3435_v56  ;;  %v3969_v56 = vld [vmem:[#allocation1] sm:$0xff]  ;;  %v3962_v44 = vld [vmem:[%s5920_s3 + $0x58] sm:$0xff] }
 0x102   :  { %2197 = vmatpush.bf16.msrb.mxu2 %v3222_v3  ;;  %v3502_v3 = vor.u32 %v3925_v57, %v3499_v58  ;;  %v1940_v53 = vadd.f32 %v5580_v19, %v1927_v51  ;;  %v3956_v19 = vld [vmem:[%s5920_s3 + $0x28] sm:$0xff] }
 0x103   :  { %2210 = vmatpush.bf16.msrb.mxu3 %v3286_v6  ;;  %2172 = vmatmul.bf16.vlgmr.msrb.gmra.mxu0 %v4684_v15  ;;  %v3945_v15 = vld [vmem:[%s5918_s1 + $0x8d4] sm:$0xf]  ;;  %v3907_v6 = vld [vmem:[%s5918_s1 + $0x7a4] sm:$0xf] }
 0x104   :  { %2216 = vmatpush.bf16.msra.mxu0 %v3406_v7  ;;  %2185 = vmatmul.bf16.vlgmr.msrb.gmra.mxu1 %v4688_v17  ;;  %v3895_v17 = vld [vmem:[%s5918_s1 + $0x744] sm:$0xf]  ;;  %v3566_v7 = vor.u32 %v3941_v59, %v3563_v61  ;;  %v1953_v57 = vadd.f32 %v5591_v23, %v1940_v53 }
 0x105   :  { %2229 = vmatpush.bf16.msra.mxu1 %v3470_v8  ;;  %2198 = vmatmul.bf16.vlgmr.msrb.gmra.mxu2 %v4850_v46  ;;  %v3379_v46 = vld [vmem:[%s5918_s1 + $0x748] sm:$0xf0]  ;;  %v3959_v53 = vld [vmem:[%s5920_s3 + $0x40] sm:$0xff] }
 0x106   :  { %2242 = vmatpush.bf16.msra.mxu2 %v3534_v10  ;;  %2211 = vmatmul.bf16.vlgmr.msrb.gmra.mxu3 %v4854_v48  ;;  %v3582_v48 = vor.u32 %v3945_v15, %v3579_v0  ;;  %v3382_v2 = vor.u32 %v3895_v17, %v3379_v46  ;;  %v3427_v10 = vld [vmem:[%s5918_s1 + $0x7a8] sm:$0xf0]  ;;  %v3422_v0 = vor.u32 %v3905_v32, %v3419_v36  ;;  %v3903_v17 = vld [vmem:[%s5918_s1 + $0x784] sm:$0xf] }
 0x107   :  { %2255 = vmatpush.bf16.msra.mxu3 %v3598_v18  ;;  %v3939_v18 = vld [vmem:[%s5918_s1 + $0x8a4] sm:$0xf]  ;;  %v3430_v25 = vor.u32 %v3907_v6, %v3427_v10  ;;  %v3550_v46 = vor.u32 %v3937_v38, %v3547_v34  ;;  %v1966_v58 = vadd.f32 %v5741_v27, %v1953_v57 }
 0x108   :  { %2217 = vmatpush.bf16.msra.mxu0 %v3398_v26  ;;  %v5784_v8 = vpop.f32.mrf.mxu2  ;;  %v1967_v21 = vpop.f32.mrf.mxu0  ;;  %v3494_v26 = vor.u32 %v3923_v11, %v3491_v13  ;;  %v3558_v33 = vor.u32 %v3939_v18, %v3555_v20 }
 0x109   :  { %2230 = vmatpush.bf16.msra.mxu1 %v3462_v30  ;;  %v5795_v14 = vpop.f32.mrf.mxu3  ;;  %v1980_v24 = vpop.f32.mrf.mxu1  ;;  %v3889_v30 = vld [vmem:[%s5918_s1 + $0x714] sm:$0xf]  ;;  %v1979_v61 = vadd.f32 %v5749_v16, %v1966_v58 }
 0x10a   :  { %2243 = vmatpush.bf16.msra.mxu2 %v3526_v31  ;;  %v3355_v31 = vld [vmem:[%s5918_s1 + $0x718] sm:$0xf0]  ;;  %v3953_v16 = vld [vmem:[%s5920_s3 + $0x10] sm:$0xff] }
 0x10b   :  { %2256 = vmatpush.bf16.msra.mxu3 %v3590_v37  ;;  %v3921_v37 = vld [vmem:[%s5918_s1 + $0x814] sm:$0xf]  ;;  %v3358_v15 = vor.u32 %v3889_v30, %v3355_v31  ;;  %v1992_v23 = vadd.f32 %v5784_v8, %v1979_v61 }
 0x10c   :  { %2218 = vmatpush.bf16.msra.mxu0 %v3390_v39  ;;  %v3486_v39 = vor.u32 %v3921_v37, %v3483_v28 }
 0x10d   :  { %2231 = vmatpush.bf16.msra.mxu1 %v3454_v40  ;;  %v3887_v40 = vld [vmem:[%s5918_s1 + $0x704] sm:$0xf]  ;;  %v2005_v27 = vadd.f32 %v5795_v14, %v1992_v23 }
 0x10e   :  { %2244 = vmatpush.bf16.msra.mxu2 %v3518_v41  ;;  %v3347_v41 = vld [vmem:[%s5918_s1 + $0x708] sm:$0xf0]  ;;  %v3951_v14 = vld [vmem:[%s5920_s3] sm:$0xff] }
 0x10f   :  { %2257 = vmatpush.bf16.msra.mxu3 %v3582_v48  ;;  %v3919_v48 = vld [vmem:[%s5918_s1 + $0x804] sm:$0xf] }
 0x110   :  { %2219 = vmatpush.bf16.msra.mxu0 %v3382_v2  ;;  %v1993_v43 = vpop.f32.mrf.mxu2  ;;  %v3478_v50 = vor.u32 %v3919_v48, %v3475_v42 }
 0x111   :  { %2232 = vmatpush.bf16.msra.mxu1 %v3446_v45  ;;  %v2006_v2 = vpop.f32.mrf.mxu3  ;;  %v3350_v45 = vor.u32 %v3887_v40, %v3347_v41  ;;  %v3966_v41 = vld [vmem:[%s5920_s3 + $0x78] sm:$0xff]  ;;  %v3963_v43 = vld [vmem:[%s5920_s3 + $0x60] sm:$0xff] }
 0x112   :  { %2245 = vmatpush.bf16.msra.mxu2 %v3510_v29  ;;  %v3414_v29 = vor.u32 %v3903_v17, %v3411_v60  ;;  %v3964_v60 = vld [vmem:[%s5920_s3 + $0x68] sm:$0xff] }
 0x113   :  { %2258 = vmatpush.bf16.msra.mxu3 %v3574_v54  ;;  %v3957_v54 = vld [vmem:[%s5920_s3 + $0x30] sm:$0xff] }
 0x114   :  { %2220 = vmatpush.bf16.msra.mxu0 %v3374_v62  ;;  %v315_v62 = vperm.slane %v5188_v9, 1  ;;  %v3952_v9 = vld [vmem:[%s5920_s3 + $0x8] sm:$0xff] }
 0x115   :  { %2233 = vmatpush.bf16.msra.mxu1 %v3438_v63  ;;  %v3954_v63 = vld [vmem:[%s5920_s3 + $0x18] sm:$0xff] }
 0x116   :  { %2246 = vmatpush.bf16.msra.mxu2 %v3502_v3 }
 0x117   :  { %2259 = vmatpush.bf16.msra.mxu3 %v3566_v7 }
 0x118   :  { %2221 = vmatpush.bf16.msra.mxu0 %v3366_v22 }
 0x119   :  { %2234 = vmatpush.bf16.msra.mxu1 %v3430_v25 }
 0x11a   :  { %2247 = vmatpush.bf16.msra.mxu2 %v3494_v26 }
 0x11b   :  { %2260 = vmatpush.bf16.msra.mxu3 %v3558_v33 }
 0x11c   :  { %2222 = vmatpush.bf16.msra.mxu0 %v3358_v15 }
 0x11d   :  { %2235 = vmatpush.bf16.msra.mxu1 %v3422_v0 }
 0x11e   :  { %2248 = vmatpush.bf16.msra.mxu2 %v3486_v39 }
 0x11f   :  { %2261 = vmatpush.bf16.msra.mxu3 %v3550_v46  ;;  %v3965_v46 = vld [vmem:[%s5920_s3 + $0x70] sm:$0xff] }
 0x120   :  { %2223 = vmatpush.bf16.msra.mxu0 %v3350_v45  ;;  %v2017_v59 = vpop.f32.mrf.mxu0  ;;  %v3960_v45 = vld [vmem:[%s5920_s3 + $0x48] sm:$0xff] }
 0x121   :  { %2236 = vmatpush.bf16.msra.mxu1 %v3414_v29  ;;  %v2018_v8 = vadd.f32 %v2017_v59, %v2005_v27 }
 0x122   :  { %2249 = vmatpush.bf16.msra.mxu2 %v3478_v50 }
 0x123   :  { %2262 = vmatpush.bf16.msra.mxu3 %v3542_v52  ;;  %2224 = vmatmul.bf16.vlgmr.msra.gmra.mxu0 %v4852_v47  ;;  %v3955_v47 = vld [vmem:[%s5920_s3 + $0x20] sm:$0xff] }
 0x124   :  { %2404 = vmatpush.bf16.msrb.mxu0 %v3958_v35  ;;  %2237 = vmatmul.bf16.vlgmr.msra.gmra.mxu1 %v4856_v49  ;;  %v2030_v49 = vpop.f32.mrf.mxu1 }
 0x125   :  { %2250 = vmatmul.bf16.vlgmr.msra.gmra.mxu2 %v3969_v56  ;;  %v2031_v11 = vadd.f32 %v2030_v49, %v2018_v8  ;;  %2417 = vmatpush.bf16.msrb.mxu1 %v3966_v41 }
 0x126   :  { %2263 = vmatmul.bf16.vlgmr.msra.gmra.mxu3 %v3970_v55 }
 0x127   :  { %v2268_v20 = vmax.f32 %v2031_v11, 0.0 }
 0x128   :  { %2405 = vmatpush.bf16.msrb.mxu0 %v3957_v54  ;;  %v2043_v3 = vpop.f32.mrf.mxu2  ;;  %v2019_v6 = vpop.f32.mrf.mxu0 }
 0x129   :  { %v2044_v4 = vadd.f32 %v2043_v3, %v315_v62  ;;  %v2056_v5 = vpop.f32.mrf.mxu3  ;;  %v2270_v21 = vpack.c.bf16 %v2268_v20, %v2268_v20  ;;  %2418 = vmatpush.bf16.msrb.mxu1 %v3965_v46 }
 0x12b   :  { %v2057_v10 = vadd.f32 %v2056_v5, %v2044_v4 }
 0x12c   :  { %2406 = vmatpush.bf16.msrb.mxu0 %v3956_v19  ;;  %v2032_v7 = vpop.f32.mrf.mxu1 }
 0x12d   :  { %2419 = vmatpush.bf16.msrb.mxu1 %v3964_v60 }
 0x130   :  { %2407 = vmatpush.bf16.msrb.mxu0 %v3955_v47  ;;  %v2045_v13 = vpop.f32.mrf.mxu2 }
 0x131   :  { %v2058_v18 = vpop.f32.mrf.mxu3  ;;  %2420 = vmatpush.bf16.msrb.mxu1 %v3963_v43 }
 0x132   :  { %v3968_v18 = vld [vmem:[%s5921_s4] ss:$0 sm:$0xff] }
 0x134   :  { %2408 = vmatpush.bf16.msrb.mxu0 %v3954_v63 }
 0x135   :  { %2421 = vmatpush.bf16.msrb.mxu1 %v3962_v44 }
 0x138   :  { %2409 = vmatpush.bf16.msrb.mxu0 %v3953_v16 }
 0x139   :  { %2422 = vmatpush.bf16.msrb.mxu1 %v3961_v12 }
 0x13c   :  { %2410 = vmatpush.bf16.msrb.mxu0 %v3952_v9 }
 0x13d   :  { %2423 = vmatpush.bf16.msrb.mxu1 %v3960_v45 }
 0x140   :  { %2411 = vmatpush.bf16.msrb.mxu0 %v3951_v14  ;;  %v2069_v22 = vpop.f32.mrf.mxu0 }
 0x141   :  { %v2070_v24 = vadd.f32 %v2069_v22, %v2057_v10  ;;  %v2082_v25 = vpop.f32.mrf.mxu1  ;;  %2424 = vmatpush.bf16.msrb.mxu1 %v3959_v53 }
 0x143   :  { %2412 = vmatmul.bf16.vlgmr.msrb.gmra.mxu0 %v2270_v21  ;;  %v2083_v26 = vadd.f32 %v2082_v25, %v2070_v24 }
 0x148   :  { %v2095_v30 = vpop.f32.mrf.mxu2  ;;  %v2071_v36 = vpop.f32.mrf.mxu0 }
 0x149   :  { %v2096_v31 = vadd.f32 %v2095_v30, %v2083_v26  ;;  %v2108_v32 = vpop.f32.mrf.mxu3  ;;  %v2084_v37 = vpop.f32.mrf.mxu1 }
 0x14b   :  { %v2109_v33 = vadd.f32 %v2108_v32, %v2096_v31 }
 0x150   :  { %v2097_v28 = vpop.f32.mrf.mxu2 }
 0x151   :  { %v2110_v38 = vpop.f32.mrf.mxu3 }
 0x160   :  { %v2121_v34 = vpop.f32.mrf.mxu0 }
 0x161   :  { %v2134_v15 = vpop.f32.mrf.mxu1  ;;  %v2122_v29 = vadd.f32 %v2121_v34, %v2109_v33 }
 0x163   :  { %v2135_v54 = vadd.f32 %v2134_v15, %v2122_v29 }
 0x168   :  { %v2147_v0 = vpop.f32.mrf.mxu2  ;;  %v2123_v40 = vpop.f32.mrf.mxu0 }
 0x169   :  { %v2160_v39 = vpop.f32.mrf.mxu3  ;;  %v2136_v17 = vpop.f32.mrf.mxu1  ;;  %v2148_v56 = vadd.f32 %v2147_v0, %v2135_v54 }
 0x16b   :  { %v2161_v19 = vadd.f32 %v2160_v39, %v2148_v56 }
 0x170   :  { %v2149_v48 = vpop.f32.mrf.mxu2 }
 0x171   :  { %v2162_v42 = vpop.f32.mrf.mxu3 }
 0x180   :  { %v2173_v1 = vpop.f32.mrf.mxu0 }
 0x181   :  { %v2186_v2 = vpop.f32.mrf.mxu1  ;;  %v2174_v58 = vadd.f32 %v2173_v1, %v2161_v19 }
 0x183   :  { %v2187_v59 = vadd.f32 %v2186_v2, %v2174_v58 }
 0x188   :  { %v2199_v50 = vpop.f32.mrf.mxu2  ;;  %v2175_v35 = vpop.f32.mrf.mxu0 }
 0x189   :  { %v2212_v52 = vpop.f32.mrf.mxu3  ;;  %v2188_v51 = vpop.f32.mrf.mxu1  ;;  %v2200_v47 = vadd.f32 %v2199_v50, %v2187_v59 }
 0x18b   :  { %v2213_v49 = vadd.f32 %v2212_v52, %v2200_v47 }
 0x190   :  { %v2201_v57 = vpop.f32.mrf.mxu2 }
 0x191   :  { %v2214_v55 = vpop.f32.mrf.mxu3 }
 0x1a0   :  { %v2225_v61 = vpop.f32.mrf.mxu0 }
 0x1a1   :  { %v2238_v23 = vpop.f32.mrf.mxu1  ;;  %v2226_v62 = vadd.f32 %v2225_v61, %v2213_v49 }
 0x1a3   :  { %v2239_v63 = vadd.f32 %v2238_v23, %v2226_v62 }
 0x1a8   :  { %v2251_v3 = vpop.f32.mrf.mxu2  ;;  %v2227_v5 = vpop.f32.mrf.mxu0 }
 0x1a9   :  { %v2252_v27 = vadd.f32 %v2251_v3, %v2239_v63  ;;  %v2264_v4 = vpop.f32.mrf.mxu3  ;;  %v2240_v6 = vpop.f32.mrf.mxu1 }
 0x1ab   :  { %v2265_v16 = vadd.f32 %v2264_v4, %v2252_v27 }
 0x1ad   :  { %v2269_v7 = vmax.f32 %v2265_v16, 0.0 }
 0x1af   :  { %v2271_v8 = vpack.c.bf16 %v2269_v7, %v2269_v7 }
 0x1b0   :  { %v2253_v10 = vpop.f32.mrf.mxu2 }
 0x1b1   :  { %v2266_v9 = vpop.f32.mrf.mxu3  ;;  %2425 = vmatmul.bf16.vlgmr.msrb.gmra.mxu1 %v2271_v8 }
 0x1c0   :  { %v2413_v11 = vpop.f32.mrf.mxu0 }
 0x1c1   :  { %v2414_v14 = vadd.f32 %v3968_v18, %v2413_v11 }
 0x1c8   :  { %v2415_v13 = vpop.f32.mrf.mxu0 }
 0x22e   :  { %v2426_v20 = vpop.f32.mrf.mxu1 }
 0x22f   :  { %v2427_v21 = vadd.f32 %v2426_v20, %v2414_v14 }
 0x231   :  { %2430 = vst [vmem:[#allocation2] sm:$0x3] %v2427_v21 }
 0x232   :  { %2441 = dma.vmem_to_hbm [thread:$0]  %s2437_s18, 32, %s2439_s21, [#allocation3]  }
 0x236   :  { %v2428_v22 = vpop.f32.mrf.mxu1 }
 0x237   :  { %3995 = dma.done.wait [#allocation3], 32  }
 0x238   :  { %3996 = vsyncadd [#allocation3], 4294967264 }
 0x239   :  { %2446 = vsyncpa [#allocation3], 1 }

</bundles_post_ra>
